<compile_context>
chip_gen: v7x
topology: tpu7x:2x2x1
jax: 0.10.0
libtpu: 0.0.40
codegen_flags: <defaults>
</compile_context>

<pallas_src>
import numpy as np
import jax
import jax.numpy as jnp
from jax.experimental import pallas as pl
from jax.experimental.pallas import tpu as pltpu


CLS_PAD = 128        # lane-dense padded class dimension
BATCH_TILE_MAX = 128 # max batch rows per grid step


# ----------------------------- Pallas kernel --------------------------------
def _byte_classifier_kernel(x_ref,
                            m1_ref, b1_ref,
                            m2_ref, b2_ref,
                            m3_ref, b3_ref,
                            w4_ref, b4_ref, w5_ref, b5_ref,
                            out_ref):
    f32 = jnp.float32
    bf16 = jnp.bfloat16

    def mm(a_f32, w_ref):
        # bf16 operands, f32 accumulation on the MXU.
        return jnp.dot(a_f32.astype(bf16), w_ref[...], preferred_element_type=f32)

    def conv_relu_pool(h, m_ref, b_ref):
        # Conv1d(k=3, s=2, p=1) as a single Toeplitz matmul with columns laid out
        # [even | odd]; MaxPool1d(2,2) = max of the two halves, then one ReLU.
        hcat = mm(h, m_ref) + b_ref[...]            # (BT, 2N)
        n = hcat.shape[1] // 2                      # static; multiple of 128 lanes
        return jnp.maximum(jnp.maximum(hcat[:, :n], hcat[:, n:]), 0.0)

    h = x_ref[...]                                  # (BT, 256) f32, channel-major
    h = conv_relu_pool(h, m1_ref, b1_ref)           # (BT, 16*64 = 1024)
    h = conv_relu_pool(h, m2_ref, b2_ref)           # (BT, 32*16 =  512)
    h = conv_relu_pool(h, m3_ref, b3_ref)           # (BT, 64*4  =  256)

    # flatten is the identity in this channel-major layout; fc1 + ReLU
    h = jnp.maximum(mm(h, w4_ref) + b4_ref[...], 0.0)   # (BT, 128)

    # fc2 (class dim zero-padded to 128 lanes, padded bias = -1e30) + softmax
    logits = mm(h, w5_ref) + b5_ref[...]                 # (BT, 128)
    m = jnp.max(logits, axis=1, keepdims=True)
    e = jnp.exp(logits - m)
    inv = pl.reciprocal(jnp.sum(e, axis=1, keepdims=True), approx=True)
    out_ref[...] = e * inv


# --------------------- parameter setup (plain numpy glue) -------------------
def conv1d_as_pooled_matmul(W, b, L_in, stride=2, pad=1):
    """Dense matrix M_cat (columns = [even|odd] pooled output positions) and bias
    b_cat s.t. relu(max over the two halves of x @ M_cat + b_cat) equals
    maxpool2(relu(conv1d(x, W, b))) in channel-major flattened layout."""
    W = np.asarray(W, np.float32)
    b = np.asarray(b, np.float32)
    C_out, C_in, K = W.shape
    L_out = (L_in + 2 * pad - K) // stride + 1
    M = np.zeros((C_in * L_in, C_out * L_out), np.float32)
    rows0 = np.arange(C_in) * L_in
    cols0 = np.arange(C_out) * L_out
    for k in range(K):
        for i in range(L_out):
            j = stride * i + k - pad
            if 0 <= j < L_in:
                M[np.ix_(rows0 + j, cols0 + i)] += W[:, :, k].T
    L_pool = L_out // 2                            # MaxPool1d(2,2)
    M3d = M.reshape(C_in * L_in, C_out, L_out)
    Me = np.ascontiguousarray(M3d[:, :, 0::2]).reshape(C_in * L_in, C_out * L_pool)
    Mo = np.ascontiguousarray(M3d[:, :, 1::2]).reshape(C_in * L_in, C_out * L_pool)
    M_cat = np.concatenate([Me, Mo], axis=1)       # (C_in*L_in, 2*C_out*L_pool)
    b_pool = np.repeat(b, L_pool)[None, :].astype(np.float32)
    b_cat = np.concatenate([b_pool, b_pool], axis=1)
    return M_cat, b_cat, L_pool


def init_params(key, classes):
    ks = jax.random.split(key, 10)
    rnd = lambda k, shape, s: jax.random.normal(k, shape, jnp.float32) * s
    W1 = rnd(ks[0], (16, 1, 3), 0.3);   b1 = rnd(ks[1], (16,), 0.1)
    W2 = rnd(ks[2], (32, 16, 3), 0.1);  b2 = rnd(ks[3], (32,), 0.1)
    W3 = rnd(ks[4], (64, 32, 3), 0.1);  b3 = rnd(ks[5], (64,), 0.1)
    Wfc1T = rnd(ks[6], (256, 128), 0.05); bfc1 = rnd(ks[7], (1, 128), 0.1)
    Wfc2T = rnd(ks[8], (128, classes), 0.05); bfc2 = rnd(ks[9], (1, classes), 0.1)
    return W1, b1, W2, b2, W3, b3, Wfc1T, bfc1, Wfc2T, bfc2


# ------------------------------ wrapper --------------------------------------
def byte_classifier_pallas(x_ncw, operands, classes):
    B = x_ncw.shape[0]
    x2d = x_ncw.reshape(B, -1).astype(jnp.float32)   # (B, 256) channel-major
    F = x2d.shape[1]

    # Adaptive batch tile: multiple of 8 sublanes, capped at 128 rows.
    bt = min(BATCH_TILE_MAX, ((B + 7) // 8) * 8)
    Bp = ((B + bt - 1) // bt) * bt
    if Bp != B:
        x2d = jnp.pad(x2d, ((0, Bp - B), (0, 0)))

    # Weights: whole-array blocks with a constant index_map -> DMA'd once and
    # kept VMEM-resident across all batch grid steps.
    weight_specs = [pl.BlockSpec(op.shape, lambda i: (0, 0)) for op in operands]

    out = pl.pallas_call(
        _byte_classifier_kernel,
        out_shape=jax.ShapeDtypeStruct((Bp, CLS_PAD), jnp.float32),
        grid=(Bp // bt,),
        in_specs=[pl.BlockSpec((bt, F), lambda i: (i, 0))] + weight_specs,
        out_specs=pl.BlockSpec((bt, CLS_PAD), lambda i: (i, 0)),
        compiler_params=pltpu.CompilerParams(
            dimension_semantics=("parallel",),
            vmem_limit_bytes=32 * 1024 * 1024),
    )(x2d, *operands)
    return out[:B, :classes]


# --------------------------- plain-JAX reference -----------------------------
def reference_forward(x, W1, b1, W2, b2, W3, b3, Wfc1T, bfc1, Wfc2T, bfc2):
    def conv1d(h, W, b):
        out = jax.lax.conv_general_dilated(
            h, W, window_strides=(2,), padding=((1, 1),),
            dimension_numbers=('NCH', 'OIH', 'NCH'))
        return out + b[None, :, None]

    def maxpool(h):
        B, C, L = h.shape
        return jnp.max(h.reshape(B, C, L // 2, 2), axis=-1)

    h = maxpool(jax.nn.relu(conv1d(x, W1, b1)))
    h = maxpool(jax.nn.relu(conv1d(h, W2, b2)))
    h = maxpool(jax.nn.relu(conv1d(h, W3, b3)))
    h = h.reshape(h.shape[0], -1)
    h = jax.nn.relu(h @ Wfc1T + bfc1)
    logits = h @ Wfc2T + bfc2
    return jax.nn.softmax(logits, axis=1)


# --------------------------------- main ---------------------------------------
if __name__ == "__main__":
    classes = 8
    B, L = 2, 256                 # fc1 (64*4 -> 128) forces input length 256

    key = jax.random.PRNGKey(0)
    kx, kp = jax.random.split(key)
    x = jax.random.normal(kx, (B, 1, L), jnp.float32)   # NCW like PyTorch

    W1, b1, W2, b2, W3, b3, Wfc1T, bfc1, Wfc2T, bfc2 = init_params(kp, classes)

    # Lower convs (+ fused maxpool) to [even|odd] Toeplitz matmul operands.
    M1, b1f, Lp1 = conv1d_as_pooled_matmul(W1, b1, L)        # (256, 2048)
    M2, b2f, Lp2 = conv1d_as_pooled_matmul(W2, b2, Lp1)      # (1024, 1024)
    M3, b3f, Lp3 = conv1d_as_pooled_matmul(W3, b3, Lp2)      # (512, 512)

    # fc2 padded to 128 lanes: zero weight columns, -1e30 bias on padding.
    W5p = np.zeros((128, CLS_PAD), np.float32)
    W5p[:, :classes] = np.asarray(Wfc2T, np.float32)
    b5p = np.full((1, CLS_PAD), -1e30, np.float32)
    b5p[:, :classes] = np.asarray(bfc2, np.float32)

    bf16 = jnp.bfloat16
    f32 = jnp.float32
    operands = (
        jnp.asarray(M1, bf16), jnp.asarray(b1f, f32),
        jnp.asarray(M2, bf16), jnp.asarray(b2f, f32),
        jnp.asarray(M3, bf16), jnp.asarray(b3f, f32),
        jnp.asarray(Wfc1T, bf16), jnp.asarray(bfc1, f32),
        jnp.asarray(W5p, bf16), jnp.asarray(b5p, f32),
    )

    out = byte_classifier_pallas(x, operands, classes)
    out = jax.block_until_ready(out)

    ref = reference_forward(x, W1, b1, W2, b2, W3, b3, Wfc1T, bfc1, Wfc2T, bfc2)
    ref = jax.block_until_ready(ref)

    assert out.shape == (B, classes)
    # bf16 weights + approx reciprocal -> slightly looser tolerance.
    np.testing.assert_allclose(np.asarray(out), np.asarray(ref), rtol=5e-2, atol=5e-3)
    np.testing.assert_allclose(np.asarray(out).sum(axis=1), np.ones(B), atol=1e-2)
    print("KERNEL_OK")
</pallas_src>

<mosaic_0001>
module attributes {stable_mosaic.version = 11 : i64} {
  func.func @_byte_classifier_kernel(%arg0: i32, %arg1: memref<8x256xf32, #tpu.memory_space<vmem>>, %arg2: memref<256x2048xbf16, #tpu.memory_space<vmem>>, %arg3: memref<1x2048xf32, #tpu.memory_space<vmem>>, %arg4: memref<1024x1024xbf16, #tpu.memory_space<vmem>>, %arg5: memref<1x1024xf32, #tpu.memory_space<vmem>>, %arg6: memref<512x512xbf16, #tpu.memory_space<vmem>>, %arg7: memref<1x512xf32, #tpu.memory_space<vmem>>, %arg8: memref<256x128xbf16, #tpu.memory_space<vmem>>, %arg9: memref<1x128xf32, #tpu.memory_space<vmem>>, %arg10: memref<128x128xbf16, #tpu.memory_space<vmem>>, %arg11: memref<1x128xf32, #tpu.memory_space<vmem>>, %arg12: memref<8x128xf32, #tpu.memory_space<vmem>>) attributes {dimension_semantics = [#tpu.dimension_semantics<parallel>], iteration_bounds = array<i64: 1>, scalar_prefetch = 0 : i64, scratch_operands = 0 : i64, tpu.core_type = #tpu.core_type<tc>, window_params = [{transform_indices = @transform_0, window_bounds = array<i64: 8, 256>}, {pipeline_mode = #tpu.pipeline_mode<synchronous>, transform_indices = @transform_1, window_bounds = array<i64: 256, 2048>}, {pipeline_mode = #tpu.pipeline_mode<synchronous>, transform_indices = @transform_2, window_bounds = array<i64: 1, 2048>}, {pipeline_mode = #tpu.pipeline_mode<synchronous>, transform_indices = @transform_3, window_bounds = array<i64: 1024, 1024>}, {pipeline_mode = #tpu.pipeline_mode<synchronous>, transform_indices = @transform_4, window_bounds = array<i64: 1, 1024>}, {pipeline_mode = #tpu.pipeline_mode<synchronous>, transform_indices = @transform_5, window_bounds = array<i64: 512, 512>}, {pipeline_mode = #tpu.pipeline_mode<synchronous>, transform_indices = @transform_6, window_bounds = array<i64: 1, 512>}, {pipeline_mode = #tpu.pipeline_mode<synchronous>, transform_indices = @transform_7, window_bounds = array<i64: 256, 128>}, {pipeline_mode = #tpu.pipeline_mode<synchronous>, transform_indices = @transform_8, window_bounds = array<i64: 1, 128>}, {pipeline_mode = #tpu.pipeline_mode<synchronous>, transform_indices = @transform_9, window_bounds = array<i64: 128, 128>}, {pipeline_mode = #tpu.pipeline_mode<synchronous>, transform_indices = @transform_10, window_bounds = array<i64: 1, 128>}, {transform_indices = @transform_11, window_bounds = array<i64: 8, 128>}]} {
    %c0 = arith.constant 0 : index
    %c0_0 = arith.constant 0 : index
    %0 = vector.load %arg1[%c0, %c0_0] : memref<8x256xf32, #tpu.memory_space<vmem>>, vector<8x256xf32>
    %1 = arith.truncf %0 : vector<8x256xf32> to vector<8x256xbf16>
    %c0_1 = arith.constant 0 : index
    %c0_2 = arith.constant 0 : index
    %2 = vector.load %arg2[%c0_1, %c0_2] : memref<256x2048xbf16, #tpu.memory_space<vmem>>, vector<256x2048xbf16>
    %cst = arith.constant dense<0.000000e+00> : vector<8x2048xf32>
    %3 = tpu.matmul %1, %2, %cst {dimension_numbers = #tpu.dot_dimension_numbers<[1], [0], [0], [1], [0, 0, 1, 1], [], []>} : vector<8x256xbf16>, vector<256x2048xbf16>, vector<8x2048xf32> -> vector<8x2048xf32>
    %c0_3 = arith.constant 0 : index
    %c0_4 = arith.constant 0 : index
    %4 = vector.load %arg3[%c0_3, %c0_4] : memref<1x2048xf32, #tpu.memory_space<vmem>>, vector<1x2048xf32>
    %5 = vector.broadcast %4 : vector<1x2048xf32> to vector<8x2048xf32>
    %6 = arith.addf %3, %5 : vector<8x2048xf32>
    %7 = vector.extract_strided_slice %6 {offsets = [0, 0], sizes = [8, 1024], strides = [1, 1]} : vector<8x2048xf32> to vector<8x1024xf32>
    %8 = vector.extract_strided_slice %6 {offsets = [0, 1024], sizes = [8, 1024], strides = [1, 1]} : vector<8x2048xf32> to vector<8x1024xf32>
    %9 = arith.maximumf %7, %8 : vector<8x1024xf32>
    %cst_5 = arith.constant 0.000000e+00 : f32
    %10 = vector.broadcast %cst_5 : f32 to vector<8x1024xf32>
    %11 = arith.maximumf %9, %10 : vector<8x1024xf32>
    %12 = arith.truncf %11 : vector<8x1024xf32> to vector<8x1024xbf16>
    %c0_6 = arith.constant 0 : index
    %c0_7 = arith.constant 0 : index
    %13 = vector.load %arg4[%c0_6, %c0_7] : memref<1024x1024xbf16, #tpu.memory_space<vmem>>, vector<1024x1024xbf16>
    %cst_8 = arith.constant dense<0.000000e+00> : vector<8x1024xf32>
    %14 = tpu.matmul %12, %13, %cst_8 {dimension_numbers = #tpu.dot_dimension_numbers<[1], [0], [0], [1], [0, 0, 1, 1], [], []>} : vector<8x1024xbf16>, vector<1024x1024xbf16>, vector<8x1024xf32> -> vector<8x1024xf32>
    %c0_9 = arith.constant 0 : index
    %c0_10 = arith.constant 0 : index
    %15 = vector.load %arg5[%c0_9, %c0_10] : memref<1x1024xf32, #tpu.memory_space<vmem>>, vector<1x1024xf32>
    %16 = vector.broadcast %15 : vector<1x1024xf32> to vector<8x1024xf32>
    %17 = arith.addf %14, %16 : vector<8x1024xf32>
    %18 = vector.extract_strided_slice %17 {offsets = [0, 0], sizes = [8, 512], strides = [1, 1]} : vector<8x1024xf32> to vector<8x512xf32>
    %19 = vector.extract_strided_slice %17 {offsets = [0, 512], sizes = [8, 512], strides = [1, 1]} : vector<8x1024xf32> to vector<8x512xf32>
    %20 = arith.maximumf %18, %19 : vector<8x512xf32>
    %cst_11 = arith.constant 0.000000e+00 : f32
    %21 = vector.broadcast %cst_11 : f32 to vector<8x512xf32>
    %22 = arith.maximumf %20, %21 : vector<8x512xf32>
    %23 = arith.truncf %22 : vector<8x512xf32> to vector<8x512xbf16>
    %c0_12 = arith.constant 0 : index
    %c0_13 = arith.constant 0 : index
    %24 = vector.load %arg6[%c0_12, %c0_13] : memref<512x512xbf16, #tpu.memory_space<vmem>>, vector<512x512xbf16>
    %cst_14 = arith.constant dense<0.000000e+00> : vector<8x512xf32>
    %25 = tpu.matmul %23, %24, %cst_14 {dimension_numbers = #tpu.dot_dimension_numbers<[1], [0], [0], [1], [0, 0, 1, 1], [], []>} : vector<8x512xbf16>, vector<512x512xbf16>, vector<8x512xf32> -> vector<8x512xf32>
    %c0_15 = arith.constant 0 : index
    %c0_16 = arith.constant 0 : index
    %26 = vector.load %arg7[%c0_15, %c0_16] : memref<1x512xf32, #tpu.memory_space<vmem>>, vector<1x512xf32>
    %27 = vector.broadcast %26 : vector<1x512xf32> to vector<8x512xf32>
    %28 = arith.addf %25, %27 : vector<8x512xf32>
    %29 = vector.extract_strided_slice %28 {offsets = [0, 0], sizes = [8, 256], strides = [1, 1]} : vector<8x512xf32> to vector<8x256xf32>
    %30 = vector.extract_strided_slice %28 {offsets = [0, 256], sizes = [8, 256], strides = [1, 1]} : vector<8x512xf32> to vector<8x256xf32>
    %31 = arith.maximumf %29, %30 : vector<8x256xf32>
    %cst_17 = arith.constant 0.000000e+00 : f32
    %32 = vector.broadcast %cst_17 : f32 to vector<8x256xf32>
    %33 = arith.maximumf %31, %32 : vector<8x256xf32>
    %34 = arith.truncf %33 : vector<8x256xf32> to vector<8x256xbf16>
    %c0_18 = arith.constant 0 : index
    %c0_19 = arith.constant 0 : index
    %35 = vector.load %arg8[%c0_18, %c0_19] : memref<256x128xbf16, #tpu.memory_space<vmem>>, vector<256x128xbf16>
    %cst_20 = arith.constant dense<0.000000e+00> : vector<8x128xf32>
    %36 = tpu.matmul %34, %35, %cst_20 {dimension_numbers = #tpu.dot_dimension_numbers<[1], [0], [0], [1], [0, 0, 1, 1], [], []>} : vector<8x256xbf16>, vector<256x128xbf16>, vector<8x128xf32> -> vector<8x128xf32>
    %c0_21 = arith.constant 0 : index
    %c0_22 = arith.constant 0 : index
    %37 = vector.load %arg9[%c0_21, %c0_22] : memref<1x128xf32, #tpu.memory_space<vmem>>, vector<1x128xf32>
    %38 = vector.broadcast %37 : vector<1x128xf32> to vector<8x128xf32>
    %39 = arith.addf %36, %38 : vector<8x128xf32>
    %cst_23 = arith.constant 0.000000e+00 : f32
    %40 = vector.broadcast %cst_23 : f32 to vector<8x128xf32>
    %41 = arith.maximumf %39, %40 : vector<8x128xf32>
    %42 = arith.truncf %41 : vector<8x128xf32> to vector<8x128xbf16>
    %c0_24 = arith.constant 0 : index
    %c0_25 = arith.constant 0 : index
    %43 = vector.load %arg10[%c0_24, %c0_25] : memref<128x128xbf16, #tpu.memory_space<vmem>>, vector<128x128xbf16>
    %cst_26 = arith.constant dense<0.000000e+00> : vector<8x128xf32>
    %44 = tpu.matmul %42, %43, %cst_26 {dimension_numbers = #tpu.dot_dimension_numbers<[1], [0], [0], [1], [0, 0, 1, 1], [], []>} : vector<8x128xbf16>, vector<128x128xbf16>, vector<8x128xf32> -> vector<8x128xf32>
    %c0_27 = arith.constant 0 : index
    %c0_28 = arith.constant 0 : index
    %45 = vector.load %arg11[%c0_27, %c0_28] : memref<1x128xf32, #tpu.memory_space<vmem>>, vector<1x128xf32>
    %46 = vector.broadcast %45 : vector<1x128xf32> to vector<8x128xf32>
    %47 = arith.addf %44, %46 : vector<8x128xf32>
    %cst_29 = arith.constant dense<0xFF800000> : vector<8xf32>
    %48 = vector.multi_reduction <maximumf>, %47, %cst_29 [1] : vector<8x128xf32> to vector<8xf32>
    %49 = vector.shape_cast %48 : vector<8xf32> to vector<8x1xf32>
    %50 = vector.broadcast %49 : vector<8x1xf32> to vector<8x128xf32>
    %51 = arith.subf %47, %50 : vector<8x128xf32>
    %52 = math.exp %51 : vector<8x128xf32>
    %cst_30 = arith.constant dense<0.000000e+00> : vector<8xf32>
    %53 = vector.multi_reduction <add>, %52, %cst_30 [1] : vector<8x128xf32> to vector<8xf32>
    %54 = vector.shape_cast %53 : vector<8xf32> to vector<8x1xf32>
    %55 = tpu.reciprocal %54 {approx = true} : vector<8x1xf32> -> vector<8x1xf32>
    %56 = vector.broadcast %55 : vector<8x1xf32> to vector<8x128xf32>
    %57 = arith.mulf %52, %56 : vector<8x128xf32>
    %c0_31 = arith.constant 0 : index
    %c0_32 = arith.constant 0 : index
    %58 = vector.load %arg12[%c0_31, %c0_32] : memref<8x128xf32, #tpu.memory_space<vmem>>, vector<8x128xf32>
    tpu.vector_store %arg12[%c0_31, %c0_32], %57 {strides = array<i32>} : memref<8x128xf32, #tpu.memory_space<vmem>>, vector<8x128xf32>,
    return
  }
  func.func @transform_0(%arg0: i32) -> (i32, i32) {
    %c0_i32 = arith.constant 0 : i32
    %c0_i32_0 = arith.constant 0 : i32
    return %arg0, %c0_i32 : i32, i32
  }
  func.func @transform_1(%arg0: i32) -> (i32, i32) {
    %c0_i32 = arith.constant 0 : i32
    %c0_i32_0 = arith.constant 0 : i32
    %c0_i32_1 = arith.constant 0 : i32
    return %c0_i32, %c0_i32_0 : i32, i32
  }
  func.func @transform_2(%arg0: i32) -> (i32, i32) {
    %c0_i32 = arith.constant 0 : i32
    %c0_i32_0 = arith.constant 0 : i32
    %c0_i32_1 = arith.constant 0 : i32
    return %c0_i32, %c0_i32_0 : i32, i32
  }
  func.func @transform_3(%arg0: i32) -> (i32, i32) {
    %c0_i32 = arith.constant 0 : i32
    %c0_i32_0 = arith.constant 0 : i32
    %c0_i32_1 = arith.constant 0 : i32
    return %c0_i32, %c0_i32_0 : i32, i32
  }
  func.func @transform_4(%arg0: i32) -> (i32, i32) {
    %c0_i32 = arith.constant 0 : i32
    %c0_i32_0 = arith.constant 0 : i32
    %c0_i32_1 = arith.constant 0 : i32
    return %c0_i32, %c0_i32_0 : i32, i32
  }
  func.func @transform_5(%arg0: i32) -> (i32, i32) {
    %c0_i32 = arith.constant 0 : i32
    %c0_i32_0 = arith.constant 0 : i32
    %c0_i32_1 = arith.constant 0 : i32
    return %c0_i32, %c0_i32_0 : i32, i32
  }
  func.func @transform_6(%arg0: i32) -> (i32, i32) {
    %c0_i32 = arith.constant 0 : i32
    %c0_i32_0 = arith.constant 0 : i32
    %c0_i32_1 = arith.constant 0 : i32
    return %c0_i32, %c0_i32_0 : i32, i32
  }
  func.func @transform_7(%arg0: i32) -> (i32, i32) {
    %c0_i32 = arith.constant 0 : i32
    %c0_i32_0 = arith.constant 0 : i32
    %c0_i32_1 = arith.constant 0 : i32
    return %c0_i32, %c0_i32_0 : i32, i32
  }
  func.func @transform_8(%arg0: i32) -> (i32, i32) {
    %c0_i32 = arith.constant 0 : i32
    %c0_i32_0 = arith.constant 0 : i32
    %c0_i32_1 = arith.constant 0 : i32
    return %c0_i32, %c0_i32_0 : i32, i32
  }
  func.func @transform_9(%arg0: i32) -> (i32, i32) {
    %c0_i32 = arith.constant 0 : i32
    %c0_i32_0 = arith.constant 0 : i32
    %c0_i32_1 = arith.constant 0 : i32
    return %c0_i32, %c0_i32_0 : i32, i32
  }
  func.func @transform_10(%arg0: i32) -> (i32, i32) {
    %c0_i32 = arith.constant 0 : i32
    %c0_i32_0 = arith.constant 0 : i32
    %c0_i32_1 = arith.constant 0 : i32
    return %c0_i32, %c0_i32_0 : i32, i32
  }
  func.func @transform_11(%arg0: i32) -> (i32, i32) {
    %c0_i32 = arith.constant 0 : i32
    %c0_i32_0 = arith.constant 0 : i32
    return %arg0, %c0_i32 : i32, i32
  }
}

</mosaic_0001>

<bundles_post_ra>
// kernel: tpu_custom_call.1
= control target key start
LH: loop header
LB: loop body
LE: loop exit
PB: predicated region body
PF: predicated region fallthrough
CT: control target
= control target key end

     0   :  { %16 = vsyncpa [#allocation3], 0  ;;  %s9248_s0 = inlined_call_operand.hbm [shape: f32[8,256], index: 0, kind: input, shape index: {}]   ;;  %s9249_s1 = inlined_call_operand.hbm [shape: bf16[256,2048], index: 1, kind: input, shape index: {}]   ;;  %s9250_s2 = inlined_call_operand.hbm [shape: f32[1,2048], index: 2, kind: input, shape index: {}]   ;;  %s9251_s3 = inlined_call_operand.hbm [shape: bf16[1024,1024], index: 3, kind: input, shape index: {}]   ;;  %s9252_s4 = inlined_call_operand.hbm [shape: f32[1,1024], index: 4, kind: input, shape index: {}]   ;;  %s9253_s5 = inlined_call_operand.hbm [shape: bf16[512,512], index: 5, kind: input, shape index: {}]   ;;  %s9254_s6 = inlined_call_operand.hbm [shape: f32[1,512], index: 6, kind: input, shape index: {}]   ;;  %s9255_s7 = inlined_call_operand.hbm [shape: bf16[256,128], index: 7, kind: input, shape index: {}]   ;;  %s9256_s8 = inlined_call_operand.hbm [shape: f32[1,128], index: 8, kind: input, shape index: {}]   ;;  %s9257_s9 = inlined_call_operand.hbm [shape: bf16[128,128], index: 9, kind: input, shape index: {}]   ;;  %s9258_s10 = inlined_call_operand.hbm [shape: f32[1,128], index: 10, kind: input, shape index: {}]   ;;  %s9259_s11 = inlined_call_operand.hbm [shape: f32[8,128], index: 11, kind: output, shape index: {}]  }
   0x1   :  { %17 = vsyncpa [#allocation6], 0 }
   0x2   :  { %18 = vsyncpa [#allocation9], 0 }
   0x3   :  { %19 = vsyncpa [#allocation12], 0 }
   0x4   :  { %20 = vsyncpa [#allocation15], 0 }
   0x5   :  { %21 = vsyncpa [#allocation18], 0 }
   0x6   :  { %22 = vsyncpa [#allocation4], 0  ;;  %s8773_s17 = smov [#allocation5]   ;;  %s8495_s21 = scalar_lea.hbm %s9249_s1, 32768 }
   0x7   :  { %s38_s18 = sshll.u32 %s8773_s17, 4  ;;  %p8496_p0 = scmp.ne.s32.totalorder %s9249_s1, %s8495_s21  ;;  %s39_s18 = int_to_ptr.vmem [resolvable:$true] %s38_s18 }
   0x8   :  { %p8499_p1 = scmp.lt.u32.totalorder %s8495_s21, %s9249_s1 }
   0xa   :  { %p8501_p2 = pnand %p8499_p1, %p8496_p0 }
   0xc   :  { %8504 = shalt.err (!%p8501_p2)
}
   0xd   :  { %s8505_s26 = scalar_lea.vmem %s39_s18, 32768  ;;  %p8510_p4 = scmp.lt.s32.totalorder %s39_s18, %s39_s18 }
   0xe   :  { %p8506_p3 = scmp.ne.s32.totalorder %s39_s18, %s8505_s26  ;;  %p8511_p5 = scmp.lt.s32.totalorder %s8505_s26, %s8505_s26 }
  0x10   :  { %p8512_p6 = por %p8511_p5, %p8510_p4 }
  0x12   :  { %p8513_p7 = pnand %p8512_p6, %p8506_p3 }
  0x14   :  { %8516 = shalt.err (!%p8513_p7)
}
  0x15   :  { %s8774_s27 = smov 1024   ;;  %s8775_s28 = smov 64  }
  0x16   :  { %44 = dma.hbm_to_vmem [thread:$0]  %s9249_s1, 32768, %s39_s18, [#allocation6], %s8774_s27, %s8774_s27, %s8775_s28  }
  0x17   :  { %s8776_s12 = smov [#allocation8]   ;;  %s8517_s16 = scalar_lea.hbm %s9251_s3, 65536 }
  0x18   :  { %s60_s13 = sshll.u32 %s8776_s12, 4  ;;  %p8518_p8 = scmp.ne.s32.totalorder %s9251_s3, %s8517_s16  ;;  %s61_s13 = int_to_ptr.vmem [resolvable:$true] %s60_s13 }
  0x19   :  { %p8521_p9 = scmp.lt.u32.totalorder %s8517_s16, %s9251_s3 }
  0x1b   :  { %p8523_p10 = pnand %p8521_p9, %p8518_p8 }
  0x1d   :  { %8526 = shalt.err (!%p8523_p10)
}
  0x1e   :  { %s8527_s22 = scalar_lea.vmem %s61_s13, 65536  ;;  %p8532_p12 = scmp.lt.s32.totalorder %s61_s13, %s61_s13 }
  0x1f   :  { %p8528_p11 = scmp.ne.s32.totalorder %s61_s13, %s8527_s22  ;;  %p8533_p13 = scmp.lt.s32.totalorder %s8527_s22, %s8527_s22 }
  0x21   :  { %p8534_p0 = por %p8533_p13, %p8532_p12 }
  0x23   :  { %p8535_p1 = pnand %p8534_p0, %p8528_p11 }
  0x25   :  { %8538 = shalt.err (!%p8535_p1)
}
  0x26   :  { %s8777_s1 = smov 512   ;;  %s8778_s18 = smov 32  }
  0x27   :  { %66 = dma.hbm_to_vmem [thread:$0]  %s9251_s3, 65536, %s61_s13, [#allocation9], %s8777_s1, %s8777_s1, %s8778_s18  }
  0x28   :  { %s8779_s25 = smov [#allocation11]   ;;  %s8539_s30 = scalar_lea.hbm %s9253_s5, 16384 }
  0x29   :  { %s82_s26 = sshll.u32 %s8779_s25, 4  ;;  %p8540_p2 = scmp.ne.s32.totalorder %s9253_s5, %s8539_s30  ;;  %s83_s26 = int_to_ptr.vmem [resolvable:$true] %s82_s26 }
  0x2a   :  { %p8543_p3 = scmp.lt.u32.totalorder %s8539_s30, %s9253_s5 }
  0x2c   :  { %p8545_p4 = pnand %p8543_p3, %p8540_p2 }
  0x2e   :  { %8548 = shalt.err (!%p8545_p4)
}
  0x2f   :  { %s8549_s17 = scalar_lea.vmem %s83_s26, 16384  ;;  %p8554_p6 = scmp.lt.s32.totalorder %s83_s26, %s83_s26 }
  0x30   :  { %p8550_p5 = scmp.ne.s32.totalorder %s83_s26, %s8549_s17  ;;  %p8555_p7 = scmp.lt.s32.totalorder %s8549_s17, %s8549_s17 }
  0x32   :  { %p8556_p8 = por %p8555_p7, %p8554_p6 }
  0x34   :  { %p8557_p9 = pnand %p8556_p8, %p8550_p5 }
  0x36   :  { %8560 = shalt.err (!%p8557_p9)
}
  0x37   :  { %s8780_s3 = smov 256   ;;  %s8781_s13 = smov 16  }
  0x38   :  { %88 = dma.hbm_to_vmem [thread:$0]  %s9253_s5, 16384, %s83_s26, [#allocation12], %s8780_s3, %s8780_s3, %s8781_s13  }
  0x39   :  { %s8782_s21 = smov [#allocation14]   ;;  %s8561_s23 = scalar_lea.hbm %s9255_s7, 2048 }
  0x3a   :  { %s104_s22 = sshll.u32 %s8782_s21, 4  ;;  %p8562_p10 = scmp.ne.s32.totalorder %s9255_s7, %s8561_s23  ;;  %s105_s22 = int_to_ptr.vmem [resolvable:$true] %s104_s22 }
  0x3b   :  { %p8565_p11 = scmp.lt.u32.totalorder %s8561_s23, %s9255_s7 }
  0x3d   :  { %p8567_p12 = pnand %p8565_p11, %p8562_p10 }
  0x3f   :  { %8570 = shalt.err (!%p8567_p12)
}
  0x40   :  { %s8571_s30 = scalar_lea.vmem %s105_s22, 2048  ;;  %p8576_p0 = scmp.lt.s32.totalorder %s105_s22, %s105_s22 }
  0x41   :  { %p8572_p13 = scmp.ne.s32.totalorder %s105_s22, %s8571_s30  ;;  %p8577_p1 = scmp.lt.s32.totalorder %s8571_s30, %s8571_s30 }
  0x43   :  { %p8578_p2 = por %p8577_p1, %p8576_p0 }
  0x45   :  { %p8579_p3 = pnand %p8578_p2, %p8572_p13 }
  0x47   :  { %8582 = shalt.err (!%p8579_p3)
}
  0x48   :  { %s8783_s5 = smov 4   ;;  %s8784_s14 = smov [#allocation17]  }
  0x49   :  { %110 = dma.hbm_to_vmem [thread:$0]  %s9255_s7, 2048, %s105_s22, [#allocation15], %s8775_s28, %s8775_s28, %s8783_s5  }
  0x4a   :  { %s126_s15 = sshll.u32 %s8784_s14, 4  ;;  %s8785_s16 = smov [#allocation2]   ;;  %s127_s15 = int_to_ptr.vmem [resolvable:$true] %s126_s15 }
  0x4b   :  { %s29_s17 = sshll.u32 %s8785_s16, 4  ;;  %s8583_s19 = scalar_lea.hbm %s9257_s9, 1024  ;;  %s30_s17 = int_to_ptr.vmem [resolvable:$true] %s29_s17 }
  0x4c   :  { %p8584_p4 = scmp.ne.s32.totalorder %s9257_s9, %s8583_s19  ;;  %p8587_p5 = scmp.lt.u32.totalorder %s8583_s19, %s9257_s9 }
  0x4e   :  { %p8589_p6 = pnand %p8587_p5, %p8584_p4 }
  0x50   :  { %8592 = shalt.err (!%p8589_p6)
}
  0x51   :  { %s8593_s7 = scalar_lea.vmem %s127_s15, 1024  ;;  %p8598_p8 = scmp.lt.s32.totalorder %s127_s15, %s127_s15 }
  0x52   :  { %p8594_p7 = scmp.ne.s32.totalorder %s127_s15, %s8593_s7  ;;  %p8599_p9 = scmp.lt.s32.totalorder %s8593_s7, %s8593_s7 }
  0x54   :  { %p8600_p10 = por %p8599_p9, %p8598_p8 }
  0x56   :  { %p8601_p11 = pnand %p8600_p10, %p8594_p7 }
  0x58   :  { %8604 = shalt.err (!%p8601_p11)
}
  0x59   :  { %132 = dma.hbm_to_vmem [thread:$0]  %s9257_s9, 1024, %s127_s15, [#allocation18], %s8775_s28, %s8775_s28, %s8783_s5  }
  0x5a   :  { %s8605_s27 = scalar_lea.hbm %s9248_s0, 256 }
  0x5b   :  { %p8606_p12 = scmp.ne.s32.totalorder %s9248_s0, %s8605_s27  ;;  %p8609_p13 = scmp.lt.u32.totalorder %s8605_s27, %s9248_s0 }
  0x5d   :  { %p8611_p0 = pnand %p8609_p13, %p8606_p12 }
  0x5f   :  { %8614 = shalt.err (!%p8611_p0)
}
  0x60   :  { %s8615_s14 = scalar_lea.vmem %s30_s17, 256  ;;  %p8620_p2 = scmp.lt.s32.totalorder %s30_s17, %s30_s17 }
  0x61   :  { %p8616_p1 = scmp.ne.s32.totalorder %s30_s17, %s8615_s14  ;;  %p8621_p3 = scmp.lt.s32.totalorder %s8615_s14, %s8615_s14 }
  0x63   :  { %p8622_p4 = por %p8621_p3, %p8620_p2 }
  0x65   :  { %p8623_p5 = pnand %p8622_p4, %p8616_p1 }
  0x67   :  { %8626 = shalt.err (!%p8623_p5)
}
  0x68   :  { %32 = dma.hbm_to_vmem [thread:$0]  %s9248_s0, 256, %s30_s17, [#allocation3]  }
  0x69   :  { %s8786_s5 = smov [#allocation7]   ;;  %s8787_s16 = smov [#allocation10]  }
  0x6a   :  { %s51_s15 = sshll.u32 %s8786_s5, 4  ;;  %s73_s3 = sshll.u32 %s8787_s16, 4  ;;  %s52_s15 = int_to_ptr.vmem [resolvable:$true] %s51_s15  ;;  %s74_s3 = int_to_ptr.vmem [resolvable:$true] %s73_s3 }
  0x6b   :  { %s8627_s20 = scalar_lea.hbm %s9250_s2, 256 }
  0x6c   :  { %p8628_p6 = scmp.ne.s32.totalorder %s9250_s2, %s8627_s20  ;;  %p8631_p7 = scmp.lt.u32.totalorder %s8627_s20, %s9250_s2 }
  0x6e   :  { %p8633_p8 = pnand %p8631_p7, %p8628_p6 }
  0x70   :  { %8636 = shalt.err (!%p8633_p8)
}
  0x71   :  { %s8637_s0 = scalar_lea.vmem %s52_s15, 256  ;;  %p8642_p10 = scmp.lt.s32.totalorder %s52_s15, %s52_s15 }
  0x72   :  { %p8638_p9 = scmp.ne.s32.totalorder %s52_s15, %s8637_s0  ;;  %p8643_p11 = scmp.lt.s32.totalorder %s8637_s0, %s8637_s0 }
  0x74   :  { %p8644_p12 = por %p8643_p11, %p8642_p10 }
  0x76   :  { %p8645_p13 = pnand %p8644_p12, %p8638_p9 }
  0x78   :  { %8648 = shalt.err (!%p8645_p13)
}
  0x79   :  { %54 = dma.hbm_to_vmem [thread:$0]  %s9250_s2, 256, %s52_s15, [#allocation6]  }
  0x7a   :  { %s8649_s25 = scalar_lea.hbm %s9252_s4, 128 }
  0x7b   :  { %p8650_p0 = scmp.ne.s32.totalorder %s9252_s4, %s8649_s25  ;;  %p8653_p1 = scmp.lt.u32.totalorder %s8649_s25, %s9252_s4 }
  0x7d   :  { %p8655_p2 = pnand %p8653_p1, %p8650_p0 }
  0x7f   :  { %8658 = shalt.err (!%p8655_p2)
}
  0x80   :  { %s8659_s12 = scalar_lea.vmem %s74_s3, 128  ;;  %p8664_p4 = scmp.lt.s32.totalorder %s74_s3, %s74_s3 }
  0x81   :  { %p8660_p3 = scmp.ne.s32.totalorder %s74_s3, %s8659_s12  ;;  %p8665_p5 = scmp.lt.s32.totalorder %s8659_s12, %s8659_s12 }
  0x83   :  { %p8666_p6 = por %p8665_p5, %p8664_p4 }
  0x85   :  { %p8667_p7 = pnand %p8666_p6, %p8660_p3 }
  0x87   :  { %8670 = shalt.err (!%p8667_p7)
}
  0x88   :  { %76 = dma.hbm_to_vmem [thread:$0]  %s9252_s4, 128, %s74_s3, [#allocation9]  }
  0x89   :  { %s8788_s9 = smov [#allocation13]   ;;  %s8789_s5 = smov [#allocation16]  }
  0x8a   :  { %s95_s28 = sshll.u32 %s8788_s9, 4  ;;  %s117_s15 = sshll.u32 %s8789_s5, 4  ;;  %s96_s28 = int_to_ptr.vmem [resolvable:$true] %s95_s28  ;;  %s118_s15 = int_to_ptr.vmem [resolvable:$true] %s117_s15 }
  0x8b   :  { %s8671_s19 = scalar_lea.hbm %s9254_s6, 64 }
  0x8c   :  { %p8672_p8 = scmp.ne.s32.totalorder %s9254_s6, %s8671_s19  ;;  %p8675_p9 = scmp.lt.u32.totalorder %s8671_s19, %s9254_s6 }
  0x8e   :  { %p8677_p10 = pnand %p8675_p9, %p8672_p8 }
  0x90   :  { %8680 = shalt.err (!%p8677_p10)
}
  0x91   :  { %s8681_s4 = scalar_lea.vmem %s96_s28, 64  ;;  %p8686_p12 = scmp.lt.s32.totalorder %s96_s28, %s96_s28 }
  0x92   :  { %p8682_p11 = scmp.ne.s32.totalorder %s96_s28, %s8681_s4  ;;  %p8687_p13 = scmp.lt.s32.totalorder %s8681_s4, %s8681_s4 }
  0x94   :  { %p8688_p0 = por %p8687_p13, %p8686_p12 }
  0x96   :  { %p8689_p1 = pnand %p8688_p0, %p8682_p11 }
  0x98   :  { %8692 = shalt.err (!%p8689_p1)
}
  0x99   :  { %98 = dma.hbm_to_vmem [thread:$0]  %s9254_s6, 64, %s96_s28, [#allocation12]  }
  0x9a   :  { %s8693_s22 = scalar_lea.hbm %s9256_s8, 16 }
  0x9b   :  { %p8694_p2 = scmp.ne.s32.totalorder %s9256_s8, %s8693_s22  ;;  %p8697_p3 = scmp.lt.u32.totalorder %s8693_s22, %s9256_s8 }
  0x9d   :  { %p8699_p4 = pnand %p8697_p3, %p8694_p2 }
  0x9f   :  { %8702 = shalt.err (!%p8699_p4)
}
  0xa0   :  { %s8703_s29 = scalar_lea.vmem %s118_s15, 16  ;;  %s8707_s30 = scalar_lea.vmem %s118_s15, 32 }
  0xa1   :  { %p8704_p5 = scmp.ne.s32.totalorder %s118_s15, %s8703_s29  ;;  %p8708_p6 = scmp.lt.s32.totalorder %s118_s15, %s118_s15 }
  0xa2   :  { %p8709_p7 = scmp.lt.s32.totalorder %s8707_s30, %s8703_s29 }
  0xa4   :  { %p8710_p8 = por %p8709_p7, %p8708_p6 }
  0xa6   :  { %p8711_p9 = pnand %p8710_p8, %p8704_p5 }
  0xa8   :  { %8714 = shalt.err (!%p8711_p9)
}
  0xa9   :  { %120 = dma.hbm_to_vmem [thread:$0]  %s9256_s8, 16, %s118_s15, [#allocation15]  }
  0xaa   :  { %s8790_s12 = smov [#allocation19]   ;;  %s8715_s28 = scalar_lea.hbm %s9258_s10, 16 }
  0xab   :  { %s139_s2 = sshll.u32 %s8790_s12, 4  ;;  %p8716_p10 = scmp.ne.s32.totalorder %s9258_s10, %s8715_s28  ;;  %s140_s2 = int_to_ptr.vmem [resolvable:$true] %s139_s2 }
  0xac   :  { %p8719_p11 = scmp.lt.u32.totalorder %s8715_s28, %s9258_s10 }
  0xae   :  { %p8721_p12 = pnand %p8719_p11, %p8716_p10 }
  0xb0   :  { %8724 = shalt.err (!%p8721_p12)
}
  0xb1   :  { %s8725_s20 = scalar_lea.vmem %s140_s2, 16  ;;  %s8729_s8 = scalar_lea.vmem %s140_s2, 32 }
  0xb2   :  { %p8726_p13 = scmp.ne.s32.totalorder %s140_s2, %s8725_s20  ;;  %p8730_p0 = scmp.lt.s32.totalorder %s140_s2, %s140_s2 }
  0xb3   :  { %p8731_p1 = scmp.lt.s32.totalorder %s8729_s8, %s8725_s20 }
  0xb5   :  { %p8732_p2 = por %p8731_p1, %p8730_p0 }
  0xb7   :  { %p8733_p3 = pnand %p8732_p2, %p8726_p13 }
  0xb9   :  { %8736 = shalt.err (!%p8733_p3)
}
  0xba   :  { %142 = dma.hbm_to_vmem [thread:$0]  %s9258_s10, 16, %s140_s2, [#allocation18]  }
  0xbb   :  { %8759 = dma.done.wait [#allocation3], 256  }
  0xbc   :  { %8760 = vsyncadd [#allocation3], 4294967040 }
  0xbd   :  { %8761 = dma.done.wait [#allocation6], 33024  }
  0xbe   :  { %8762 = vsyncadd [#allocation6], 4294934272 }
  0xbf   :  { %8763 = dma.done.wait [#allocation9], 65664  }
  0xc0   :  { %8764 = vsyncadd [#allocation9], 4294901632 }
  0xc1   :  { %8765 = dma.done.wait [#allocation12], 16448  }
  0xc2   :  { %8766 = vsyncadd [#allocation12], 4294950848 }
  0xc3   :  { %8767 = dma.done.wait [#allocation15], 2064  }
  0xc4   :  { %8768 = vsyncadd [#allocation15], 4294965232 }
  0xc5   :  { %8769 = dma.done.wait [#allocation18], 1040  }
  0xc6   :  { %8770 = vsyncadd [#allocation18], 4294966256  ;;  %v181_v0 = vld [vmem:[#allocation5] sm:$0xff]  ;;  %v182_v2 = vld [vmem:[#allocation5 + $0x8] sm:$0xff]  ;;  %vm8792_vm0 = vmmov 0   ;;  %s8793_s10 = smov [#allocation20]  }
  0xc7   :  { %v189_v1 = vld [vmem:[#allocation5 + $0x40] sm:$0xff]  ;;  %v190_v4 = vld [vmem:[#allocation5 + $0x48] sm:$0xff]  ;;  %v178_v53 = vld [vmem:[#allocation2 + $0x8] sm:$0xff]  ;;  %s7199_s1 = sshll.u32 %s8793_s10, 4  ;;  %s7200_s1 = int_to_ptr.vmem [resolvable:$true] %s7199_s1 }
  0xc8   :  { %v7214_v3 = vcombine.high %v181_v0, %v189_v1  ;;  %v7213_v5 = vcombine.low %v181_v0, %v189_v1  ;;  %v197_v6 = vld [vmem:[#allocation5 + $0x80] sm:$0xff]  ;;  %v7216_v8 = vcombine.high %v182_v2, %v190_v4  ;;  %v7215_v9 = vcombine.low %v182_v2, %v190_v4  ;;  %v198_v11 = vld [vmem:[#allocation5 + $0x88] sm:$0xff]  ;;  %s8737_s18 = scalar_lea.vmem %s7200_s1, 128  ;;  %p8742_p5 = scmp.lt.s32.totalorder %s7200_s1, %s7200_s1 }
  0xc9   :  { %v205_v7 = vld [vmem:[#allocation5 + $0xc0] sm:$0xff]  ;;  %v206_v12 = vld [vmem:[#allocation5 + $0xc8] sm:$0xff]  ;;  %v8991_v57 = vpack.c.bf16 %v178_v53, %v178_v53  ;;  %p8738_p4 = scmp.ne.s32.totalorder %s7200_s1, %s8737_s18  ;;  %p8743_p6 = scmp.lt.s32.totalorder %s8737_s18, %s8737_s18 }
  0xca   :  { %v7230_v10 = vcombine.high %v197_v6, %v205_v7  ;;  %v213_v13 = vld [vmem:[#allocation5 + $0x100] sm:$0xff]  ;;  %1801 = vmatprep.subr.bf16.mxu0 %v7214_v3  ;;  %v7232_v14 = vcombine.high %v198_v11, %v206_v12  ;;  %v214_v16 = vld [vmem:[#allocation5 + $0x108] sm:$0xff]  ;;  %1842 = vmatprep.subr.bf16.mxu1 %v7216_v8  ;;  %v7229_v18 = vcombine.low %v197_v6, %v205_v7 }
  0xcb   :  { %v221_v15 = vld [vmem:[#allocation5 + $0x140] sm:$0xff]  ;;  %v222_v17 = vld [vmem:[#allocation5 + $0x148] sm:$0xff]  ;;  %1802 = vmatpush1.bf16.msra.mxu0 %v7213_v5  ;;  %1843 = vmatpush1.bf16.msra.mxu1 %v7215_v9  ;;  %v7231_v19 = vcombine.low %v198_v11, %v206_v12  ;;  %p8744_p7 = por %p8743_p6, %p8742_p5 }
  0xcc   :  { %1803 = vmatprep.subr.bf16.mxu0 %v7230_v10  ;;  %v7246_v20 = vcombine.high %v213_v13, %v221_v15  ;;  %1844 = vmatprep.subr.bf16.mxu1 %v7232_v14  ;;  %v7248_v21 = vcombine.high %v214_v16, %v222_v17  ;;  %v229_v22 = vld [vmem:[#allocation5 + $0x180] sm:$0xff]  ;;  %v230_v24 = vld [vmem:[#allocation5 + $0x188] sm:$0xff]  ;;  %v7245_v26 = vcombine.low %v213_v13, %v221_v15 }
  0xcd   :  { %v237_v23 = vld [vmem:[#allocation5 + $0x1c0] sm:$0xff]  ;;  %v238_v25 = vld [vmem:[#allocation5 + $0x1c8] sm:$0xff]  ;;  %v7247_v27 = vcombine.low %v214_v16, %v222_v17  ;;  %1833 = vmatprep.mubr.bf16.mxu0 %v8991_v57  ;;  %1874 = vmatprep.mubr.bf16.mxu1 %v8991_v57  ;;  %p8745_p8 = pnand %p8744_p7, %p8738_p4 }
  0xce   :  { %v7262_v28 = vcombine.high %v229_v22, %v237_v23  ;;  %v7264_v29 = vcombine.high %v230_v24, %v238_v25  ;;  %v245_v30 = vld [vmem:[#allocation5 + $0x200] sm:$0xff]  ;;  %v246_v32 = vld [vmem:[#allocation5 + $0x208] sm:$0xff]  ;;  %v7261_v34 = vcombine.low %v229_v22, %v237_v23  ;;  %v7263_v35 = vcombine.low %v230_v24, %v238_v25 }
  0xcf   :  { %1804 = vmatpush1.bf16.msra.mxu0 %v7229_v18  ;;  %1845 = vmatpush1.bf16.msra.mxu1 %v7231_v19  ;;  %v253_v31 = vld [vmem:[#allocation5 + $0x240] sm:$0xff]  ;;  %v254_v33 = vld [vmem:[#allocation5 + $0x248] sm:$0xff] }
  0xd0   :  { %1805 = vmatprep.subr.bf16.mxu0 %v7246_v20  ;;  %1846 = vmatprep.subr.bf16.mxu1 %v7248_v21  ;;  %v7278_v36 = vcombine.high %v245_v30, %v253_v31  ;;  %v7280_v37 = vcombine.high %v246_v32, %v254_v33  ;;  %v261_v38 = vld [vmem:[#allocation5 + $0x280] sm:$0xff]  ;;  %v262_v40 = vld [vmem:[#allocation5 + $0x288] sm:$0xff]  ;;  %v7277_v42 = vcombine.low %v245_v30, %v253_v31 }
  0xd1   :  { %v269_v39 = vld [vmem:[#allocation5 + $0x2c0] sm:$0xff]  ;;  %v270_v41 = vld [vmem:[#allocation5 + $0x2c8] sm:$0xff]  ;;  %v7279_v43 = vcombine.low %v246_v32, %v254_v33 }
  0xd2   :  { %v7294_v44 = vcombine.high %v261_v38, %v269_v39  ;;  %v7296_v45 = vcombine.high %v262_v40, %v270_v41  ;;  %v277_v46 = vld [vmem:[#allocation5 + $0x300] sm:$0xff]  ;;  %v278_v48 = vld [vmem:[#allocation5 + $0x308] sm:$0xff]  ;;  %v7293_v50 = vcombine.low %v261_v38, %v269_v39  ;;  %v7295_v51 = vcombine.low %v262_v40, %v270_v41 }
  0xd3   :  { %1806 = vmatpush1.bf16.msra.mxu0 %v7245_v26  ;;  %1847 = vmatpush1.bf16.msra.mxu1 %v7247_v27  ;;  %v285_v47 = vld [vmem:[#allocation5 + $0x340] sm:$0xff]  ;;  %v286_v49 = vld [vmem:[#allocation5 + $0x348] sm:$0xff] }
  0xd4   :  { %1807 = vmatprep.subr.bf16.mxu0 %v7262_v28  ;;  %1848 = vmatprep.subr.bf16.mxu1 %v7264_v29  ;;  %v7310_v52 = vcombine.high %v277_v46, %v285_v47  ;;  %v7312_v54 = vcombine.high %v278_v48, %v286_v49  ;;  %v293_v55 = vld [vmem:[#allocation5 + $0x380] sm:$0xff]  ;;  %v294_v58 = vld [vmem:[#allocation5 + $0x388] sm:$0xff]  ;;  %v7309_v60 = vcombine.low %v277_v46, %v285_v47 }
  0xd5   :  { %v301_v56 = vld [vmem:[#allocation5 + $0x3c0] sm:$0xff]  ;;  %v302_v59 = vld [vmem:[#allocation5 + $0x3c8] sm:$0xff]  ;;  %v7311_v61 = vcombine.low %v278_v48, %v286_v49 }
  0xd6   :  { %v7326_v62 = vcombine.high %v293_v55, %v301_v56  ;;  %v7328_v63 = vcombine.high %v294_v58, %v302_v59  ;;  %v309_v0 = vld [vmem:[#allocation5 + $0x400] sm:$0xff]  ;;  %v310_v2 = vld [vmem:[#allocation5 + $0x408] sm:$0xff]  ;;  %v7325_v4 = vcombine.low %v293_v55, %v301_v56  ;;  %v7327_v5 = vcombine.low %v294_v58, %v302_v59 }
  0xd7   :  { %1808 = vmatpush1.bf16.msra.mxu0 %v7261_v34  ;;  %1849 = vmatpush1.bf16.msra.mxu1 %v7263_v35  ;;  %v317_v1 = vld [vmem:[#allocation5 + $0x440] sm:$0xff]  ;;  %v318_v3 = vld [vmem:[#allocation5 + $0x448] sm:$0xff] }
  0xd8   :  { %1809 = vmatprep.subr.bf16.mxu0 %v7278_v36  ;;  %1850 = vmatprep.subr.bf16.mxu1 %v7280_v37  ;;  %v7342_v6 = vcombine.high %v309_v0, %v317_v1  ;;  %v7344_v7 = vcombine.high %v310_v2, %v318_v3  ;;  %v325_v8 = vld [vmem:[#allocation5 + $0x480] sm:$0xff]  ;;  %v326_v10 = vld [vmem:[#allocation5 + $0x488] sm:$0xff]  ;;  %v7341_v12 = vcombine.low %v309_v0, %v317_v1  ;;  %v183_v1 = vld [vmem:[#allocation5 + $0x10] sm:$0xff] }
  0xd9   :  { %v333_v9 = vld [vmem:[#allocation5 + $0x4c0] sm:$0xff]  ;;  %v334_v11 = vld [vmem:[#allocation5 + $0x4c8] sm:$0xff]  ;;  %v7343_v13 = vcombine.low %v310_v2, %v318_v3  ;;  %v191_v2 = vld [vmem:[#allocation5 + $0x50] sm:$0xff] }
  0xda   :  { %v7358_v14 = vcombine.high %v325_v8, %v333_v9  ;;  %v7360_v15 = vcombine.high %v326_v10, %v334_v11  ;;  %v341_v16 = vld [vmem:[#allocation5 + $0x500] sm:$0xff]  ;;  %v342_v18 = vld [vmem:[#allocation5 + $0x508] sm:$0xff]  ;;  %v7357_v20 = vcombine.low %v325_v8, %v333_v9  ;;  %v7359_v21 = vcombine.low %v326_v10, %v334_v11  ;;  %v184_v3 = vld [vmem:[#allocation5 + $0x18] sm:$0xff] }
  0xdb   :  { %1810 = vmatpush1.bf16.msra.mxu0 %v7277_v42  ;;  %1851 = vmatpush1.bf16.msra.mxu1 %v7279_v43  ;;  %v349_v17 = vld [vmem:[#allocation5 + $0x540] sm:$0xff]  ;;  %v350_v19 = vld [vmem:[#allocation5 + $0x548] sm:$0xff]  ;;  %v7218_v8 = vcombine.high %v183_v1, %v191_v2  ;;  %v199_v10 = vld [vmem:[#allocation5 + $0x90] sm:$0xff] }
  0xdc   :  { %1811 = vmatprep.subr.bf16.mxu0 %v7294_v44  ;;  %1852 = vmatprep.subr.bf16.mxu1 %v7296_v45  ;;  %v7374_v22 = vcombine.high %v341_v16, %v349_v17  ;;  %v7376_v23 = vcombine.high %v342_v18, %v350_v19  ;;  %v357_v24 = vld [vmem:[#allocation5 + $0x580] sm:$0xff]  ;;  %v358_v26 = vld [vmem:[#allocation5 + $0x588] sm:$0xff]  ;;  %v7373_v28 = vcombine.low %v341_v16, %v349_v17  ;;  %v207_v11 = vld [vmem:[#allocation5 + $0xd0] sm:$0xff] }
  0xdd   :  { %v365_v25 = vld [vmem:[#allocation5 + $0x5c0] sm:$0xff]  ;;  %v366_v27 = vld [vmem:[#allocation5 + $0x5c8] sm:$0xff]  ;;  %v7375_v29 = vcombine.low %v342_v18, %v350_v19  ;;  %v7234_v17 = vcombine.high %v199_v10, %v207_v11  ;;  %v215_v18 = vld [vmem:[#allocation5 + $0x110] sm:$0xff] }
  0xde   :  { %v7390_v30 = vcombine.high %v357_v24, %v365_v25  ;;  %v7392_v31 = vcombine.high %v358_v26, %v366_v27  ;;  %v373_v32 = vld [vmem:[#allocation5 + $0x600] sm:$0xff]  ;;  %v374_v34 = vld [vmem:[#allocation5 + $0x608] sm:$0xff]  ;;  %v7389_v36 = vcombine.low %v357_v24, %v365_v25  ;;  %v7391_v37 = vcombine.low %v358_v26, %v366_v27  ;;  %v223_v19 = vld [vmem:[#allocation5 + $0x150] sm:$0xff] }
  0xdf   :  { %1812 = vmatpush1.bf16.msra.mxu0 %v7293_v50  ;;  %1853 = vmatpush1.bf16.msra.mxu1 %v7295_v51  ;;  %v381_v33 = vld [vmem:[#allocation5 + $0x640] sm:$0xff]  ;;  %v382_v35 = vld [vmem:[#allocation5 + $0x648] sm:$0xff]  ;;  %v7250_v25 = vcombine.high %v215_v18, %v223_v19  ;;  %v231_v26 = vld [vmem:[#allocation5 + $0x190] sm:$0xff] }
  0xe0   :  { %1813 = vmatprep.subr.bf16.mxu0 %v7310_v52  ;;  %1854 = vmatprep.subr.bf16.mxu1 %v7312_v54  ;;  %v7406_v38 = vcombine.high %v373_v32, %v381_v33  ;;  %v7408_v39 = vcombine.high %v374_v34, %v382_v35  ;;  %v389_v40 = vld [vmem:[#allocation5 + $0x680] sm:$0xff]  ;;  %v390_v42 = vld [vmem:[#allocation5 + $0x688] sm:$0xff]  ;;  %v7405_v44 = vcombine.low %v373_v32, %v381_v33  ;;  %v239_v27 = vld [vmem:[#allocation5 + $0x1d0] sm:$0xff] }
  0xe1   :  { %v397_v41 = vld [vmem:[#allocation5 + $0x6c0] sm:$0xff]  ;;  %v398_v43 = vld [vmem:[#allocation5 + $0x6c8] sm:$0xff]  ;;  %v7407_v45 = vcombine.low %v374_v34, %v382_v35  ;;  %v7266_v33 = vcombine.high %v231_v26, %v239_v27  ;;  %v247_v34 = vld [vmem:[#allocation5 + $0x210] sm:$0xff] }
  0xe2   :  { %v7422_v46 = vcombine.high %v389_v40, %v397_v41  ;;  %v7424_v47 = vcombine.high %v390_v42, %v398_v43  ;;  %v405_v48 = vld [vmem:[#allocation5 + $0x700] sm:$0xff]  ;;  %v406_v50 = vld [vmem:[#allocation5 + $0x708] sm:$0xff]  ;;  %v7421_v52 = vcombine.low %v389_v40, %v397_v41  ;;  %v7423_v53 = vcombine.low %v390_v42, %v398_v43  ;;  %v255_v35 = vld [vmem:[#allocation5 + $0x250] sm:$0xff] }
  0xe3   :  { %1814 = vmatpush1.bf16.msra.mxu0 %v7309_v60  ;;  %1855 = vmatpush1.bf16.msra.mxu1 %v7311_v61  ;;  %v413_v49 = vld [vmem:[#allocation5 + $0x740] sm:$0xff]  ;;  %v414_v51 = vld [vmem:[#allocation5 + $0x748] sm:$0xff]  ;;  %v7282_v41 = vcombine.high %v247_v34, %v255_v35  ;;  %v263_v42 = vld [vmem:[#allocation5 + $0x290] sm:$0xff] }
  0xe4   :  { %1815 = vmatprep.subr.bf16.mxu0 %v7326_v62  ;;  %1856 = vmatprep.subr.bf16.mxu1 %v7328_v63  ;;  %v7438_v54 = vcombine.high %v405_v48, %v413_v49  ;;  %v7440_v55 = vcombine.high %v406_v50, %v414_v51  ;;  %v421_v56 = vld [vmem:[#allocation5 + $0x780] sm:$0xff]  ;;  %v422_v59 = vld [vmem:[#allocation5 + $0x788] sm:$0xff]  ;;  %v7437_v61 = vcombine.low %v405_v48, %v413_v49  ;;  %v271_v43 = vld [vmem:[#allocation5 + $0x2d0] sm:$0xff] }
  0xe5   :  { %v429_v58 = vld [vmem:[#allocation5 + $0x7c0] sm:$0xff]  ;;  %v430_v60 = vld [vmem:[#allocation5 + $0x7c8] sm:$0xff]  ;;  %v7439_v62 = vcombine.low %v406_v50, %v414_v51  ;;  %v7298_v49 = vcombine.high %v263_v42, %v271_v43  ;;  %v279_v50 = vld [vmem:[#allocation5 + $0x310] sm:$0xff] }
  0xe6   :  { %v7454_v63 = vcombine.high %v421_v56, %v429_v58  ;;  %v7456_v0 = vcombine.high %v422_v59, %v430_v60  ;;  %v287_v51 = vld [vmem:[#allocation5 + $0x350] sm:$0xff] }
  0xe7   :  { %1816 = vmatpush1.bf16.msra.mxu0 %v7325_v4  ;;  %1857 = vmatpush1.bf16.msra.mxu1 %v7327_v5  ;;  %v192_v4 = vld [vmem:[#allocation5 + $0x58] sm:$0xff]  ;;  %v7453_v5 = vcombine.low %v421_v56, %v429_v58  ;;  %v7314_v58 = vcombine.high %v279_v50, %v287_v51 }
  0xe8   :  { %1817 = vmatprep.subr.bf16.mxu0 %v7342_v6  ;;  %1858 = vmatprep.subr.bf16.mxu1 %v7344_v7  ;;  %v177_v6 = vld [vmem:[#allocation2] sm:$0xff]  ;;  %v7455_v7 = vcombine.low %v422_v59, %v430_v60  ;;  %v7220_v9 = vcombine.high %v184_v3, %v192_v4  ;;  %v7219_v16 = vcombine.low %v184_v3, %v192_v4 }
  0xe9   :  { %v295_v59 = vld [vmem:[#allocation5 + $0x390] sm:$0xff] }
  0xea   :  { %v303_v60 = vld [vmem:[#allocation5 + $0x3d0] sm:$0xff] }
  0xeb   :  { %1818 = vmatpush1.bf16.msra.mxu0 %v7341_v12  ;;  %1859 = vmatpush1.bf16.msra.mxu1 %v7343_v13  ;;  %v8995_v12 = vpack.c.bf16 %v177_v6, %v177_v6  ;;  %v200_v13 = vld [vmem:[#allocation5 + $0x98] sm:$0xff]  ;;  %v311_v3 = vld [vmem:[#allocation5 + $0x410] sm:$0xff] }
  0xec   :  { %1819 = vmatprep.subr.bf16.mxu0 %v7358_v14  ;;  %1860 = vmatprep.subr.bf16.mxu1 %v7360_v15  ;;  %v208_v14 = vld [vmem:[#allocation5 + $0xd8] sm:$0xff]  ;;  %v7217_v15 = vcombine.low %v183_v1, %v191_v2  ;;  %v7330_v2 = vcombine.high %v295_v59, %v303_v60  ;;  %v319_v4 = vld [vmem:[#allocation5 + $0x450] sm:$0xff] }
  0xed   :  { %v7235_v24 = vcombine.low %v200_v13, %v208_v14 }
  0xef   :  { %1820 = vmatpush1.bf16.msra.mxu0 %v7357_v20  ;;  %1861 = vmatpush1.bf16.msra.mxu1 %v7359_v21  ;;  %v216_v20 = vld [vmem:[#allocation5 + $0x118] sm:$0xff]  ;;  %v7236_v21 = vcombine.high %v200_v13, %v208_v14  ;;  %v335_v13 = vld [vmem:[#allocation5 + $0x4d0] sm:$0xff] }
  0xf0   :  { %1821 = vmatprep.subr.bf16.mxu0 %v7374_v22  ;;  %1862 = vmatprep.subr.bf16.mxu1 %v7376_v23  ;;  %v224_v22 = vld [vmem:[#allocation5 + $0x158] sm:$0xff]  ;;  %v7233_v23 = vcombine.low %v199_v10, %v207_v11  ;;  %v7346_v10 = vcombine.high %v311_v3, %v319_v4  ;;  %v327_v11 = vld [vmem:[#allocation5 + $0x490] sm:$0xff] }
  0xf1   :  { %v7251_v32 = vcombine.low %v216_v20, %v224_v22  ;;  %v328_v14 = vld [vmem:[#allocation5 + $0x498] sm:$0xff] }
  0xf3   :  { %1822 = vmatpush1.bf16.msra.mxu0 %v7373_v28  ;;  %1863 = vmatpush1.bf16.msra.mxu1 %v7375_v29  ;;  %v232_v28 = vld [vmem:[#allocation5 + $0x198] sm:$0xff]  ;;  %v7252_v29 = vcombine.high %v216_v20, %v224_v22  ;;  %v343_v20 = vld [vmem:[#allocation5 + $0x510] sm:$0xff] }
  0xf4   :  { %1823 = vmatprep.subr.bf16.mxu0 %v7390_v30  ;;  %1864 = vmatprep.subr.bf16.mxu1 %v7392_v31  ;;  %v240_v30 = vld [vmem:[#allocation5 + $0x1d8] sm:$0xff]  ;;  %v7249_v31 = vcombine.low %v215_v18, %v223_v19  ;;  %v7362_v19 = vcombine.high %v327_v11, %v335_v13 }
  0xf5   :  { %v7267_v40 = vcombine.low %v232_v28, %v240_v30  ;;  %v344_v22 = vld [vmem:[#allocation5 + $0x518] sm:$0xff] }
  0xf7   :  { %1824 = vmatpush1.bf16.msra.mxu0 %v7389_v36  ;;  %1865 = vmatpush1.bf16.msra.mxu1 %v7391_v37  ;;  %v248_v36 = vld [vmem:[#allocation5 + $0x218] sm:$0xff]  ;;  %v7268_v37 = vcombine.high %v232_v28, %v240_v30  ;;  %v359_v28 = vld [vmem:[#allocation5 + $0x590] sm:$0xff] }
  0xf8   :  { %1825 = vmatprep.subr.bf16.mxu0 %v7406_v38  ;;  %1866 = vmatprep.subr.bf16.mxu1 %v7408_v39  ;;  %v256_v38 = vld [vmem:[#allocation5 + $0x258] sm:$0xff]  ;;  %v7265_v39 = vcombine.low %v231_v26, %v239_v27 }
  0xf9   :  { %v7283_v48 = vcombine.low %v248_v36, %v256_v38  ;;  %v360_v30 = vld [vmem:[#allocation5 + $0x598] sm:$0xff] }
  0xfb   :  { %1826 = vmatpush1.bf16.msra.mxu0 %v7405_v44  ;;  %1867 = vmatpush1.bf16.msra.mxu1 %v7407_v45  ;;  %v264_v44 = vld [vmem:[#allocation5 + $0x298] sm:$0xff]  ;;  %v7284_v45 = vcombine.high %v248_v36, %v256_v38  ;;  %v375_v36 = vld [vmem:[#allocation5 + $0x610] sm:$0xff] }
  0xfc   :  { %1827 = vmatprep.subr.bf16.mxu0 %v7422_v46  ;;  %1868 = vmatprep.subr.bf16.mxu1 %v7424_v47  ;;  %v272_v46 = vld [vmem:[#allocation5 + $0x2d8] sm:$0xff]  ;;  %v7281_v47 = vcombine.low %v247_v34, %v255_v35 }
  0xfd   :  { %v7299_v56 = vcombine.low %v264_v44, %v272_v46  ;;  %v376_v38 = vld [vmem:[#allocation5 + $0x618] sm:$0xff] }
  0xff   :  { %1828 = vmatpush1.bf16.msra.mxu0 %v7421_v52  ;;  %1869 = vmatpush1.bf16.msra.mxu1 %v7423_v53  ;;  %v280_v52 = vld [vmem:[#allocation5 + $0x318] sm:$0xff]  ;;  %v7300_v53 = vcombine.high %v264_v44, %v272_v46  ;;  %v391_v44 = vld [vmem:[#allocation5 + $0x690] sm:$0xff] }
 0x100   :  { %1829 = vmatprep.subr.bf16.mxu0 %v7438_v54  ;;  %1870 = vmatprep.subr.bf16.mxu1 %v7440_v55  ;;  %v288_v54 = vld [vmem:[#allocation5 + $0x358] sm:$0xff]  ;;  %v7297_v55 = vcombine.low %v263_v42, %v271_v43 }
 0x101   :  { %v7315_v1 = vcombine.low %v280_v52, %v288_v54  ;;  %v392_v46 = vld [vmem:[#allocation5 + $0x698] sm:$0xff] }
 0x103   :  { %1830 = vmatpush1.bf16.msra.mxu0 %v7437_v61  ;;  %1871 = vmatpush1.bf16.msra.mxu1 %v7439_v62  ;;  %v296_v61 = vld [vmem:[#allocation5 + $0x398] sm:$0xff]  ;;  %v7316_v62 = vcombine.high %v280_v52, %v288_v54  ;;  %v407_v52 = vld [vmem:[#allocation5 + $0x710] sm:$0xff] }
 0x104   :  { %1831 = vmatprep.subr.bf16.mxu0 %v7454_v63  ;;  %1872 = vmatprep.subr.bf16.mxu1 %v7456_v0  ;;  %v304_v63 = vld [vmem:[#allocation5 + $0x3d8] sm:$0xff]  ;;  %v7313_v0 = vcombine.low %v279_v50, %v287_v51 }
 0x105   :  { %v7332_v6 = vcombine.high %v296_v61, %v304_v63  ;;  %v408_v54 = vld [vmem:[#allocation5 + $0x718] sm:$0xff] }
 0x107   :  { %1832 = vmatpush1.bf16.msra.mxu0 %v7453_v5  ;;  %1873 = vmatpush1.bf16.msra.mxu1 %v7455_v7  ;;  %v312_v5 = vld [vmem:[#allocation5 + $0x418] sm:$0xff] }
 0x108   :  { %1883 = vmatprep.subr.bf16.mxu0 %v7218_v8  ;;  %1924 = vmatprep.subr.bf16.mxu1 %v7220_v9  ;;  %v320_v7 = vld [vmem:[#allocation5 + $0x458] sm:$0xff]  ;;  %v7329_v8 = vcombine.low %v295_v59, %v303_v60  ;;  %v7331_v9 = vcombine.low %v296_v61, %v304_v63  ;;  %v423_v61 = vld [vmem:[#allocation5 + $0x790] sm:$0xff] }
 0x109   :  { %v7347_v18 = vcombine.low %v312_v5, %v320_v7  ;;  %v424_v63 = vld [vmem:[#allocation5 + $0x798] sm:$0xff] }
 0x10a   :  { %1834 = vmatmul.mubr.bf16.vlgmr.msra.gmra.mrb[0].mxu0 %v8995_v12  ;;  %1875 = vmatmul.mubr.bf16.vlgmr.msra.gmra.mrb[0].mxu1 %v8995_v12 }
 0x10b   :  { %1884 = vmatpush1.bf16.msra.mxu0 %v7217_v15  ;;  %1925 = vmatpush1.bf16.msra.mxu1 %v7219_v16  ;;  %v7348_v15 = vcombine.high %v312_v5, %v320_v7  ;;  %v336_v16 = vld [vmem:[#allocation5 + $0x4d8] sm:$0xff]  ;;  %v185_v5 = vld [vmem:[#allocation5 + $0x20] sm:$0xff]  ;;  %v186_v7 = vld [vmem:[#allocation5 + $0x28] sm:$0xff] }
 0x10c   :  { %1885 = vmatprep.subr.bf16.mxu0 %v7234_v17  ;;  %1926 = vmatprep.subr.bf16.mxu1 %v7236_v21  ;;  %v7345_v17 = vcombine.low %v311_v3, %v319_v4  ;;  %v351_v21 = vld [vmem:[#allocation5 + $0x550] sm:$0xff]  ;;  %v7363_v26 = vcombine.low %v328_v14, %v336_v16 }
 0x10d   :  { %1915 = vmatprep.mubr.bf16.mxu0 %v8991_v57  ;;  %1956 = vmatprep.mubr.bf16.mxu1 %v8991_v57  ;;  %v7378_v27 = vcombine.high %v343_v20, %v351_v21 }
 0x10f   :  { %1886 = vmatpush1.bf16.msra.mxu0 %v7233_v23  ;;  %1927 = vmatpush1.bf16.msra.mxu1 %v7235_v24  ;;  %v7364_v23 = vcombine.high %v328_v14, %v336_v16  ;;  %v352_v24 = vld [vmem:[#allocation5 + $0x558] sm:$0xff]  ;;  %v201_v14 = vld [vmem:[#allocation5 + $0xa0] sm:$0xff]  ;;  %v202_v16 = vld [vmem:[#allocation5 + $0xa8] sm:$0xff] }
 0x110   :  { %1887 = vmatprep.subr.bf16.mxu0 %v7250_v25  ;;  %1928 = vmatprep.subr.bf16.mxu1 %v7252_v29  ;;  %v7361_v25 = vcombine.low %v327_v11, %v335_v13  ;;  %v367_v29 = vld [vmem:[#allocation5 + $0x5d0] sm:$0xff]  ;;  %v7379_v34 = vcombine.low %v344_v22, %v352_v24 }
 0x111   :  { %v7394_v35 = vcombine.high %v359_v28, %v367_v29 }
 0x113   :  { %1888 = vmatpush1.bf16.msra.mxu0 %v7249_v31  ;;  %1929 = vmatpush1.bf16.msra.mxu1 %v7251_v32  ;;  %v7380_v31 = vcombine.high %v344_v22, %v352_v24  ;;  %v368_v32 = vld [vmem:[#allocation5 + $0x5d8] sm:$0xff]  ;;  %v218_v24 = vld [vmem:[#allocation5 + $0x128] sm:$0xff] }
 0x114   :  { %1889 = vmatprep.subr.bf16.mxu0 %v7266_v33  ;;  %1930 = vmatprep.subr.bf16.mxu1 %v7268_v37  ;;  %v7377_v33 = vcombine.low %v343_v20, %v351_v21  ;;  %v383_v37 = vld [vmem:[#allocation5 + $0x650] sm:$0xff]  ;;  %v7395_v42 = vcombine.low %v360_v30, %v368_v32  ;;  %v217_v20 = vld [vmem:[#allocation5 + $0x120] sm:$0xff] }
 0x115   :  { %v7410_v43 = vcombine.high %v375_v36, %v383_v37  ;;  %v225_v21 = vld [vmem:[#allocation5 + $0x160] sm:$0xff] }
 0x117   :  { %1890 = vmatpush1.bf16.msra.mxu0 %v7265_v39  ;;  %1931 = vmatpush1.bf16.msra.mxu1 %v7267_v40  ;;  %v7396_v39 = vcombine.high %v360_v30, %v368_v32  ;;  %v384_v40 = vld [vmem:[#allocation5 + $0x658] sm:$0xff]  ;;  %v234_v32 = vld [vmem:[#allocation5 + $0x1a8] sm:$0xff] }
 0x118   :  { %1891 = vmatprep.subr.bf16.mxu0 %v7282_v41  ;;  %1932 = vmatprep.subr.bf16.mxu1 %v7284_v45  ;;  %v7393_v41 = vcombine.low %v359_v28, %v367_v29  ;;  %v399_v45 = vld [vmem:[#allocation5 + $0x6d0] sm:$0xff]  ;;  %v7411_v50 = vcombine.low %v376_v38, %v384_v40  ;;  %v233_v28 = vld [vmem:[#allocation5 + $0x1a0] sm:$0xff] }
 0x119   :  { %v7426_v51 = vcombine.high %v391_v44, %v399_v45  ;;  %v241_v29 = vld [vmem:[#allocation5 + $0x1e0] sm:$0xff] }
 0x11b   :  { %1892 = vmatpush1.bf16.msra.mxu0 %v7281_v47  ;;  %1933 = vmatpush1.bf16.msra.mxu1 %v7283_v48  ;;  %v7412_v47 = vcombine.high %v376_v38, %v384_v40  ;;  %v400_v48 = vld [vmem:[#allocation5 + $0x6d8] sm:$0xff]  ;;  %v250_v40 = vld [vmem:[#allocation5 + $0x228] sm:$0xff] }
 0x11c   :  { %1893 = vmatprep.subr.bf16.mxu0 %v7298_v49  ;;  %1934 = vmatprep.subr.bf16.mxu1 %v7300_v53  ;;  %v7409_v49 = vcombine.low %v375_v36, %v383_v37  ;;  %v415_v53 = vld [vmem:[#allocation5 + $0x750] sm:$0xff]  ;;  %v7427_v59 = vcombine.low %v392_v46, %v400_v48  ;;  %v249_v36 = vld [vmem:[#allocation5 + $0x220] sm:$0xff] }
 0x11d   :  { %v7442_v60 = vcombine.high %v407_v52, %v415_v53  ;;  %v257_v37 = vld [vmem:[#allocation5 + $0x260] sm:$0xff] }
 0x11f   :  { %1894 = vmatpush1.bf16.msra.mxu0 %v7297_v55  ;;  %1935 = vmatpush1.bf16.msra.mxu1 %v7299_v56  ;;  %v7428_v55 = vcombine.high %v392_v46, %v400_v48  ;;  %v416_v56 = vld [vmem:[#allocation5 + $0x758] sm:$0xff]  ;;  %v266_v48 = vld [vmem:[#allocation5 + $0x2a8] sm:$0xff] }
 0x120   :  { %1895 = vmatprep.subr.bf16.mxu0 %v7314_v58  ;;  %1936 = vmatprep.subr.bf16.mxu1 %v7316_v62  ;;  %v7425_v58 = vcombine.low %v391_v44, %v399_v45  ;;  %v431_v62 = vld [vmem:[#allocation5 + $0x7d0] sm:$0xff]  ;;  %v7443_v3 = vcombine.low %v408_v54, %v416_v56  ;;  %v265_v44 = vld [vmem:[#allocation5 + $0x2a0] sm:$0xff] }
 0x121   :  { %v7458_v4 = vcombine.high %v423_v61, %v431_v62  ;;  %v273_v45 = vld [vmem:[#allocation5 + $0x2e0] sm:$0xff] }
 0x123   :  { %1896 = vmatpush1.bf16.msra.mxu0 %v7313_v0  ;;  %1937 = vmatpush1.bf16.msra.mxu1 %v7315_v1  ;;  %v7444_v0 = vcombine.high %v408_v54, %v416_v56  ;;  %v432_v1 = vld [vmem:[#allocation5 + $0x7d8] sm:$0xff]  ;;  %v289_v56 = vld [vmem:[#allocation5 + $0x360] sm:$0xff] }
 0x124   :  { %1897 = vmatprep.subr.bf16.mxu0 %v7330_v2  ;;  %1938 = vmatprep.subr.bf16.mxu1 %v7332_v6  ;;  %v7441_v2 = vcombine.low %v407_v52, %v415_v53  ;;  %v193_v6 = vld [vmem:[#allocation5 + $0x60] sm:$0xff]  ;;  %v7459_v11 = vcombine.low %v424_v63, %v432_v1  ;;  %v7302_v53 = vcombine.high %v265_v44, %v273_v45 }
 0x125   :  { %v7222_v13 = vcombine.high %v185_v5, %v193_v6 }
 0x127   :  { %1898 = vmatpush1.bf16.msra.mxu0 %v7329_v8  ;;  %1939 = vmatpush1.bf16.msra.mxu1 %v7331_v9  ;;  %v7460_v8 = vcombine.high %v424_v63, %v432_v1  ;;  %v194_v9 = vld [vmem:[#allocation5 + $0x68] sm:$0xff]  ;;  %v305_v1 = vld [vmem:[#allocation5 + $0x3e0] sm:$0xff] }
 0x128   :  { %1899 = vmatprep.subr.bf16.mxu0 %v7346_v10  ;;  %1940 = vmatprep.subr.bf16.mxu1 %v7348_v15  ;;  %v7457_v10 = vcombine.low %v423_v61, %v431_v62  ;;  %v209_v15 = vld [vmem:[#allocation5 + $0xe0] sm:$0xff]  ;;  %v7223_v22 = vcombine.low %v186_v7, %v194_v9 }
 0x12b   :  { %1900 = vmatpush1.bf16.msra.mxu0 %v7345_v17  ;;  %1941 = vmatpush1.bf16.msra.mxu1 %v7347_v18  ;;  %v7224_v17 = vcombine.high %v186_v7, %v194_v9  ;;  %v210_v18 = vld [vmem:[#allocation5 + $0xe8] sm:$0xff]  ;;  %v321_v9 = vld [vmem:[#allocation5 + $0x460] sm:$0xff] }
 0x12c   :  { %1901 = vmatprep.subr.bf16.mxu0 %v7362_v19  ;;  %1942 = vmatprep.subr.bf16.mxu1 %v7364_v23  ;;  %v7221_v19 = vcombine.low %v185_v5, %v193_v6  ;;  %v7238_v23 = vcombine.high %v201_v14, %v209_v15  ;;  %v7239_v30 = vcombine.low %v202_v16, %v210_v18 }
 0x12f   :  { %1902 = vmatpush1.bf16.msra.mxu0 %v7361_v25  ;;  %1943 = vmatpush1.bf16.msra.mxu1 %v7363_v26  ;;  %v226_v25 = vld [vmem:[#allocation5 + $0x168] sm:$0xff]  ;;  %v7240_v26 = vcombine.high %v202_v16, %v210_v18  ;;  %v337_v18 = vld [vmem:[#allocation5 + $0x4e0] sm:$0xff] }
 0x130   :  { %1903 = vmatprep.subr.bf16.mxu0 %v7378_v27  ;;  %1944 = vmatprep.subr.bf16.mxu1 %v7380_v31  ;;  %v7237_v27 = vcombine.low %v201_v14, %v209_v15  ;;  %v7254_v31 = vcombine.high %v217_v20, %v225_v21  ;;  %v7255_v38 = vcombine.low %v218_v24, %v226_v25 }
 0x133   :  { %1904 = vmatpush1.bf16.msra.mxu0 %v7377_v33  ;;  %1945 = vmatpush1.bf16.msra.mxu1 %v7379_v34  ;;  %v7256_v33 = vcombine.high %v218_v24, %v226_v25  ;;  %v242_v34 = vld [vmem:[#allocation5 + $0x1e8] sm:$0xff]  ;;  %v345_v25 = vld [vmem:[#allocation5 + $0x520] sm:$0xff] }
 0x134   :  { %1905 = vmatprep.subr.bf16.mxu0 %v7394_v35  ;;  %1946 = vmatprep.subr.bf16.mxu1 %v7396_v39  ;;  %v7253_v35 = vcombine.low %v217_v20, %v225_v21  ;;  %v7270_v39 = vcombine.high %v233_v28, %v241_v29  ;;  %v7271_v46 = vcombine.low %v234_v32, %v242_v34  ;;  %v338_v20 = vld [vmem:[#allocation5 + $0x4e8] sm:$0xff] }
 0x137   :  { %1906 = vmatpush1.bf16.msra.mxu0 %v7393_v41  ;;  %1947 = vmatpush1.bf16.msra.mxu1 %v7395_v42  ;;  %v258_v41 = vld [vmem:[#allocation5 + $0x268] sm:$0xff]  ;;  %v7272_v42 = vcombine.high %v234_v32, %v242_v34  ;;  %v369_v34 = vld [vmem:[#allocation5 + $0x5e0] sm:$0xff] }
 0x138   :  { %1907 = vmatprep.subr.bf16.mxu0 %v7410_v43  ;;  %1948 = vmatprep.subr.bf16.mxu1 %v7412_v47  ;;  %v7269_v43 = vcombine.low %v233_v28, %v241_v29  ;;  %v7286_v47 = vcombine.high %v249_v36, %v257_v37  ;;  %v7287_v52 = vcombine.low %v250_v40, %v258_v41  ;;  %v354_v28 = vld [vmem:[#allocation5 + $0x568] sm:$0xff] }
 0x13b   :  { %1908 = vmatpush1.bf16.msra.mxu0 %v7409_v49  ;;  %1949 = vmatpush1.bf16.msra.mxu1 %v7411_v50  ;;  %v274_v49 = vld [vmem:[#allocation5 + $0x2e8] sm:$0xff]  ;;  %v7288_v50 = vcombine.high %v250_v40, %v258_v41  ;;  %v377_v41 = vld [vmem:[#allocation5 + $0x620] sm:$0xff] }
 0x13c   :  { %1909 = vmatprep.subr.bf16.mxu0 %v7426_v51  ;;  %1950 = vmatprep.subr.bf16.mxu1 %v7428_v55  ;;  %v7285_v51 = vcombine.low %v249_v36, %v257_v37  ;;  %v7304_v54 = vcombine.high %v266_v48, %v274_v49  ;;  %v281_v55 = vld [vmem:[#allocation5 + $0x320] sm:$0xff]  ;;  %v7303_v61 = vcombine.low %v266_v48, %v274_v49  ;;  %v370_v36 = vld [vmem:[#allocation5 + $0x5e8] sm:$0xff] }
 0x13d   :  { %v7318_v62 = vcombine.high %v281_v55, %v289_v56  ;;  %v393_v49 = vld [vmem:[#allocation5 + $0x6a0] sm:$0xff] }
 0x13f   :  { %1910 = vmatpush1.bf16.msra.mxu0 %v7425_v58  ;;  %1951 = vmatpush1.bf16.msra.mxu1 %v7427_v59  ;;  %v282_v58 = vld [vmem:[#allocation5 + $0x328] sm:$0xff] }
 0x140   :  { %1911 = vmatprep.subr.bf16.mxu0 %v7442_v60  ;;  %1952 = vmatprep.subr.bf16.mxu1 %v7444_v0  ;;  %v290_v59 = vld [vmem:[#allocation5 + $0x368] sm:$0xff]  ;;  %v7301_v60 = vcombine.low %v265_v44, %v273_v45  ;;  %v297_v0 = vld [vmem:[#allocation5 + $0x3a0] sm:$0xff] }
 0x141   :  { %v7320_v63 = vcombine.high %v282_v58, %v290_v59  ;;  %v7319_v5 = vcombine.low %v282_v58, %v290_v59  ;;  %v7334_v6 = vcombine.high %v297_v0, %v305_v1  ;;  %v386_v44 = vld [vmem:[#allocation5 + $0x668] sm:$0xff]  ;;  %v409_v58 = vld [vmem:[#allocation5 + $0x720] sm:$0xff] }
 0x142   :  { %v417_v59 = vld [vmem:[#allocation5 + $0x760] sm:$0xff] }
 0x143   :  { %1912 = vmatpush1.bf16.msra.mxu0 %v7441_v2  ;;  %1953 = vmatpush1.bf16.msra.mxu1 %v7443_v3  ;;  %v298_v2 = vld [vmem:[#allocation5 + $0x3a8] sm:$0xff] }
 0x144   :  { %1913 = vmatprep.subr.bf16.mxu0 %v7458_v4  ;;  %1954 = vmatprep.subr.bf16.mxu1 %v7460_v8  ;;  %v306_v3 = vld [vmem:[#allocation5 + $0x3e8] sm:$0xff]  ;;  %v7317_v4 = vcombine.low %v281_v55, %v289_v56  ;;  %v313_v8 = vld [vmem:[#allocation5 + $0x420] sm:$0xff] }
 0x145   :  { %v7336_v7 = vcombine.high %v298_v2, %v306_v3  ;;  %v7335_v14 = vcombine.low %v298_v2, %v306_v3  ;;  %v7350_v15 = vcombine.high %v313_v8, %v321_v9  ;;  %v7349_v21 = vcombine.low %v313_v8, %v321_v9  ;;  %v425_v2 = vld [vmem:[#allocation5 + $0x7a0] sm:$0xff] }
 0x146   :  { %v433_v3 = vld [vmem:[#allocation5 + $0x7e0] sm:$0xff] }
 0x147   :  { %1914 = vmatpush1.bf16.msra.mxu0 %v7457_v10  ;;  %1955 = vmatpush1.bf16.msra.mxu1 %v7459_v11  ;;  %v314_v10 = vld [vmem:[#allocation5 + $0x428] sm:$0xff]  ;;  %v7462_v8 = vcombine.high %v425_v2, %v433_v3 }
 0x148   :  { %1965 = vmatprep.subr.bf16.mxu0 %v7222_v13  ;;  %2006 = vmatprep.subr.bf16.mxu1 %v7224_v17  ;;  %v322_v11 = vld [vmem:[#allocation5 + $0x468] sm:$0xff]  ;;  %v7333_v13 = vcombine.low %v297_v0, %v305_v1  ;;  %v329_v17 = vld [vmem:[#allocation5 + $0x4a0] sm:$0xff]  ;;  %v7446_v0 = vcombine.high %v409_v58, %v417_v59 }
 0x149   :  { %v7352_v16 = vcombine.high %v314_v10, %v322_v11  ;;  %v7365_v29 = vcombine.low %v329_v17, %v337_v18 }
 0x14a   :  { %1916 = vmatmul.mubr.bf16.vlgmr.msra.gmra.mrb[4].mxu0 %v8995_v12  ;;  %1957 = vmatmul.mubr.bf16.vlgmr.msra.gmra.mrb[4].mxu1 %v8995_v12 }
 0x14b   :  { %1966 = vmatpush1.bf16.msra.mxu0 %v7221_v19  ;;  %2007 = vmatpush1.bf16.msra.mxu1 %v7223_v22  ;;  %v330_v19 = vld [vmem:[#allocation5 + $0x4a8] sm:$0xff]  ;;  %v7351_v22 = vcombine.low %v314_v10, %v322_v11  ;;  %v187_v10 = vld [vmem:[#allocation5 + $0x30] sm:$0xff] }
 0x14c   :  { %1967 = vmatprep.subr.bf16.mxu0 %v7238_v23  ;;  %2008 = vmatprep.subr.bf16.mxu1 %v7240_v26  ;;  %v7366_v23 = vcombine.high %v329_v17, %v337_v18  ;;  %v7368_v24 = vcombine.high %v330_v19, %v338_v20  ;;  %v353_v26 = vld [vmem:[#allocation5 + $0x560] sm:$0xff]  ;;  %v195_v11 = vld [vmem:[#allocation5 + $0x70] sm:$0xff] }
 0x14d   :  { %1997 = vmatprep.mubr.bf16.mxu0 %v8991_v57  ;;  %2038 = vmatprep.mubr.bf16.mxu1 %v8991_v57  ;;  %v7381_v37 = vcombine.low %v345_v25, %v353_v26  ;;  %v7226_v17 = vcombine.high %v187_v10, %v195_v11 }
 0x14f   :  { %1968 = vmatpush1.bf16.msra.mxu0 %v7237_v27  ;;  %2009 = vmatpush1.bf16.msra.mxu1 %v7239_v30  ;;  %v346_v27 = vld [vmem:[#allocation5 + $0x528] sm:$0xff]  ;;  %v7367_v30 = vcombine.low %v330_v19, %v338_v20  ;;  %v203_v19 = vld [vmem:[#allocation5 + $0xb0] sm:$0xff] }
 0x150   :  { %1969 = vmatprep.subr.bf16.mxu0 %v7254_v31  ;;  %2010 = vmatprep.subr.bf16.mxu1 %v7256_v33  ;;  %v7382_v31 = vcombine.high %v345_v25, %v353_v26  ;;  %v7384_v32 = vcombine.high %v346_v27, %v354_v28  ;;  %v361_v33 = vld [vmem:[#allocation5 + $0x5a0] sm:$0xff]  ;;  %v211_v20 = vld [vmem:[#allocation5 + $0xf0] sm:$0xff] }
 0x151   :  { %v7397_v45 = vcombine.low %v361_v33, %v369_v34  ;;  %v7242_v25 = vcombine.high %v203_v19, %v211_v20 }
 0x153   :  { %1970 = vmatpush1.bf16.msra.mxu0 %v7253_v35  ;;  %2011 = vmatpush1.bf16.msra.mxu1 %v7255_v38  ;;  %v362_v35 = vld [vmem:[#allocation5 + $0x5a8] sm:$0xff]  ;;  %v7383_v38 = vcombine.low %v346_v27, %v354_v28  ;;  %v219_v27 = vld [vmem:[#allocation5 + $0x130] sm:$0xff] }
 0x154   :  { %1971 = vmatprep.subr.bf16.mxu0 %v7270_v39  ;;  %2012 = vmatprep.subr.bf16.mxu1 %v7272_v42  ;;  %v7398_v39 = vcombine.high %v361_v33, %v369_v34  ;;  %v7400_v40 = vcombine.high %v362_v35, %v370_v36  ;;  %v385_v42 = vld [vmem:[#allocation5 + $0x660] sm:$0xff]  ;;  %v227_v28 = vld [vmem:[#allocation5 + $0x170] sm:$0xff] }
 0x155   :  { %v7258_v33 = vcombine.high %v219_v27, %v227_v28 }
 0x157   :  { %1972 = vmatpush1.bf16.msra.mxu0 %v7269_v43  ;;  %2013 = vmatpush1.bf16.msra.mxu1 %v7271_v46  ;;  %v378_v43 = vld [vmem:[#allocation5 + $0x628] sm:$0xff]  ;;  %v7399_v46 = vcombine.low %v362_v35, %v370_v36  ;;  %v235_v35 = vld [vmem:[#allocation5 + $0x1b0] sm:$0xff] }
 0x158   :  { %1973 = vmatprep.subr.bf16.mxu0 %v7286_v47  ;;  %2014 = vmatprep.subr.bf16.mxu1 %v7288_v50  ;;  %v7414_v47 = vcombine.high %v377_v41, %v385_v42  ;;  %v7416_v48 = vcombine.high %v378_v43, %v386_v44  ;;  %v401_v50 = vld [vmem:[#allocation5 + $0x6e0] sm:$0xff]  ;;  %v243_v36 = vld [vmem:[#allocation5 + $0x1f0] sm:$0xff] }
 0x159   :  { %v7430_v55 = vcombine.high %v393_v49, %v401_v50 }
 0x15b   :  { %1974 = vmatpush1.bf16.msra.mxu0 %v7285_v51  ;;  %2015 = vmatpush1.bf16.msra.mxu1 %v7287_v52  ;;  %v394_v51 = vld [vmem:[#allocation5 + $0x6a8] sm:$0xff] }
 0x15c   :  { %1975 = vmatprep.subr.bf16.mxu0 %v7302_v53  ;;  %2016 = vmatprep.subr.bf16.mxu1 %v7304_v54  ;;  %v402_v52 = vld [vmem:[#allocation5 + $0x6e8] sm:$0xff]  ;;  %v7413_v53 = vcombine.low %v377_v41, %v385_v42  ;;  %v7415_v54 = vcombine.low %v378_v43, %v386_v44  ;;  %v7274_v41 = vcombine.high %v235_v35, %v243_v36  ;;  %v251_v43 = vld [vmem:[#allocation5 + $0x230] sm:$0xff] }
 0x15d   :  { %v7432_v56 = vcombine.high %v394_v51, %v402_v52  ;;  %v259_v44 = vld [vmem:[#allocation5 + $0x270] sm:$0xff] }
 0x15f   :  { %1976 = vmatpush1.bf16.msra.mxu0 %v7301_v60  ;;  %2017 = vmatpush1.bf16.msra.mxu1 %v7303_v61  ;;  %v410_v60 = vld [vmem:[#allocation5 + $0x728] sm:$0xff] }
 0x160   :  { %1977 = vmatprep.subr.bf16.mxu0 %v7318_v62  ;;  %2018 = vmatprep.subr.bf16.mxu1 %v7320_v63  ;;  %v418_v61 = vld [vmem:[#allocation5 + $0x768] sm:$0xff]  ;;  %v7429_v62 = vcombine.low %v393_v49, %v401_v50  ;;  %v7431_v63 = vcombine.low %v394_v51, %v402_v52  ;;  %v7290_v49 = vcombine.high %v251_v43, %v259_v44  ;;  %v267_v50 = vld [vmem:[#allocation5 + $0x2b0] sm:$0xff]  ;;  %v268_v52 = vld [vmem:[#allocation5 + $0x2b8] sm:$0xff] }
 0x161   :  { %v7448_v1 = vcombine.high %v410_v60, %v418_v61  ;;  %v275_v51 = vld [vmem:[#allocation5 + $0x2f0] sm:$0xff] }
 0x163   :  { %1978 = vmatpush1.bf16.msra.mxu0 %v7317_v4  ;;  %2019 = vmatpush1.bf16.msra.mxu1 %v7319_v5  ;;  %v426_v4 = vld [vmem:[#allocation5 + $0x7a8] sm:$0xff] }
 0x164   :  { %1979 = vmatprep.subr.bf16.mxu0 %v7334_v6  ;;  %2020 = vmatprep.subr.bf16.mxu1 %v7336_v7  ;;  %v434_v5 = vld [vmem:[#allocation5 + $0x7e8] sm:$0xff]  ;;  %v7445_v6 = vcombine.low %v409_v58, %v417_v59  ;;  %v7447_v7 = vcombine.low %v410_v60, %v418_v61  ;;  %v283_v59 = vld [vmem:[#allocation5 + $0x330] sm:$0xff]  ;;  %v284_v61 = vld [vmem:[#allocation5 + $0x338] sm:$0xff] }
 0x165   :  { %v7464_v9 = vcombine.high %v426_v4, %v434_v5  ;;  %v291_v60 = vld [vmem:[#allocation5 + $0x370] sm:$0xff] }
 0x167   :  { %1980 = vmatpush1.bf16.msra.mxu0 %v7333_v13  ;;  %2021 = vmatpush1.bf16.msra.mxu1 %v7335_v14  ;;  %v188_v13 = vld [vmem:[#allocation5 + $0x38] sm:$0xff] }
 0x168   :  { %1981 = vmatprep.subr.bf16.mxu0 %v7350_v15  ;;  %2022 = vmatprep.subr.bf16.mxu1 %v7352_v16  ;;  %v196_v14 = vld [vmem:[#allocation5 + $0x78] sm:$0xff]  ;;  %v7461_v15 = vcombine.low %v425_v2, %v433_v3  ;;  %v7463_v16 = vcombine.low %v426_v4, %v434_v5  ;;  %v299_v3 = vld [vmem:[#allocation5 + $0x3b0] sm:$0xff] }
 0x169   :  { %v7228_v18 = vcombine.high %v188_v13, %v196_v14  ;;  %v307_v4 = vld [vmem:[#allocation5 + $0x3f0] sm:$0xff]  ;;  %v300_v5 = vld [vmem:[#allocation5 + $0x3b8] sm:$0xff] }
 0x16b   :  { %1982 = vmatpush1.bf16.msra.mxu0 %v7349_v21  ;;  %2023 = vmatpush1.bf16.msra.mxu1 %v7351_v22  ;;  %v204_v21 = vld [vmem:[#allocation5 + $0xb8] sm:$0xff] }
 0x16c   :  { %1983 = vmatprep.subr.bf16.mxu0 %v7366_v23  ;;  %2024 = vmatprep.subr.bf16.mxu1 %v7368_v24  ;;  %v212_v22 = vld [vmem:[#allocation5 + $0xf8] sm:$0xff]  ;;  %v7225_v23 = vcombine.low %v187_v10, %v195_v11  ;;  %v7227_v24 = vcombine.low %v188_v13, %v196_v14  ;;  %v315_v11 = vld [vmem:[#allocation5 + $0x430] sm:$0xff] }
 0x16d   :  { %v7244_v26 = vcombine.high %v204_v21, %v212_v22  ;;  %v323_v13 = vld [vmem:[#allocation5 + $0x470] sm:$0xff]  ;;  %v316_v14 = vld [vmem:[#allocation5 + $0x438] sm:$0xff] }
 0x16f   :  { %1984 = vmatpush1.bf16.msra.mxu0 %v7365_v29  ;;  %2025 = vmatpush1.bf16.msra.mxu1 %v7367_v30  ;;  %v220_v29 = vld [vmem:[#allocation5 + $0x138] sm:$0xff] }
 0x170   :  { %1985 = vmatprep.subr.bf16.mxu0 %v7382_v31  ;;  %2026 = vmatprep.subr.bf16.mxu1 %v7384_v32  ;;  %v228_v30 = vld [vmem:[#allocation5 + $0x178] sm:$0xff]  ;;  %v7241_v31 = vcombine.low %v203_v19, %v211_v20  ;;  %v7243_v32 = vcombine.low %v204_v21, %v212_v22  ;;  %v331_v20 = vld [vmem:[#allocation5 + $0x4b0] sm:$0xff] }
 0x171   :  { %v7260_v34 = vcombine.high %v220_v29, %v228_v30  ;;  %v339_v21 = vld [vmem:[#allocation5 + $0x4f0] sm:$0xff]  ;;  %v332_v22 = vld [vmem:[#allocation5 + $0x4b8] sm:$0xff] }
 0x173   :  { %1986 = vmatpush1.bf16.msra.mxu0 %v7381_v37  ;;  %2027 = vmatpush1.bf16.msra.mxu1 %v7383_v38  ;;  %v236_v37 = vld [vmem:[#allocation5 + $0x1b8] sm:$0xff] }
 0x174   :  { %1987 = vmatprep.subr.bf16.mxu0 %v7398_v39  ;;  %2028 = vmatprep.subr.bf16.mxu1 %v7400_v40  ;;  %v244_v38 = vld [vmem:[#allocation5 + $0x1f8] sm:$0xff]  ;;  %v7257_v39 = vcombine.low %v219_v27, %v227_v28  ;;  %v7259_v40 = vcombine.low %v220_v29, %v228_v30  ;;  %v347_v28 = vld [vmem:[#allocation5 + $0x530] sm:$0xff] }
 0x175   :  { %v7276_v42 = vcombine.high %v236_v37, %v244_v38  ;;  %v355_v29 = vld [vmem:[#allocation5 + $0x570] sm:$0xff]  ;;  %v348_v30 = vld [vmem:[#allocation5 + $0x538] sm:$0xff] }
 0x177   :  { %1988 = vmatpush1.bf16.msra.mxu0 %v7397_v45  ;;  %2029 = vmatpush1.bf16.msra.mxu1 %v7399_v46  ;;  %v252_v45 = vld [vmem:[#allocation5 + $0x238] sm:$0xff] }
 0x178   :  { %1989 = vmatprep.subr.bf16.mxu0 %v7414_v47  ;;  %2030 = vmatprep.subr.bf16.mxu1 %v7416_v48  ;;  %v260_v46 = vld [vmem:[#allocation5 + $0x278] sm:$0xff]  ;;  %v7273_v47 = vcombine.low %v235_v35, %v243_v36  ;;  %v7275_v48 = vcombine.low %v236_v37, %v244_v38  ;;  %v363_v36 = vld [vmem:[#allocation5 + $0x5b0] sm:$0xff] }
 0x179   :  { %v371_v37 = vld [vmem:[#allocation5 + $0x5f0] sm:$0xff]  ;;  %v364_v38 = vld [vmem:[#allocation5 + $0x5b8] sm:$0xff] }
 0x17b   :  { %1990 = vmatpush1.bf16.msra.mxu0 %v7413_v53  ;;  %2031 = vmatpush1.bf16.msra.mxu1 %v7415_v54  ;;  %v276_v53 = vld [vmem:[#allocation5 + $0x2f8] sm:$0xff]  ;;  %v7289_v54 = vcombine.low %v251_v43, %v259_v44  ;;  %v379_v44 = vld [vmem:[#allocation5 + $0x630] sm:$0xff] }
 0x17c   :  { %1991 = vmatprep.subr.bf16.mxu0 %v7430_v55  ;;  %2032 = vmatprep.subr.bf16.mxu1 %v7432_v56  ;;  %v7291_v55 = vcombine.low %v252_v45, %v260_v46  ;;  %v7306_v56 = vcombine.high %v267_v50, %v275_v51  ;;  %v7308_v58 = vcombine.high %v268_v52, %v276_v53 }
 0x17f   :  { %1992 = vmatpush1.bf16.msra.mxu0 %v7429_v62  ;;  %2033 = vmatpush1.bf16.msra.mxu1 %v7431_v63  ;;  %v292_v62 = vld [vmem:[#allocation5 + $0x378] sm:$0xff]  ;;  %v7305_v63 = vcombine.low %v267_v50, %v275_v51  ;;  %v395_v51 = vld [vmem:[#allocation5 + $0x6b0] sm:$0xff] }
 0x180   :  { %1993 = vmatprep.subr.bf16.mxu0 %v7446_v0  ;;  %2034 = vmatprep.subr.bf16.mxu1 %v7448_v1  ;;  %v7307_v0 = vcombine.low %v268_v52, %v276_v53  ;;  %v7322_v1 = vcombine.high %v283_v59, %v291_v60  ;;  %v7324_v2 = vcombine.high %v284_v61, %v292_v62  ;;  %v403_v52 = vld [vmem:[#allocation5 + $0x6f0] sm:$0xff]  ;;  %v396_v53 = vld [vmem:[#allocation5 + $0x6b8] sm:$0xff] }
 0x183   :  { %1994 = vmatpush1.bf16.msra.mxu0 %v7445_v6  ;;  %2035 = vmatpush1.bf16.msra.mxu1 %v7447_v7  ;;  %v308_v6 = vld [vmem:[#allocation5 + $0x3f8] sm:$0xff]  ;;  %v7321_v7 = vcombine.low %v283_v59, %v291_v60  ;;  %v411_v60 = vld [vmem:[#allocation5 + $0x730] sm:$0xff] }
 0x184   :  { %1995 = vmatprep.subr.bf16.mxu0 %v7462_v8  ;;  %2036 = vmatprep.subr.bf16.mxu1 %v7464_v9  ;;  %v7323_v8 = vcombine.low %v284_v61, %v292_v62  ;;  %v7338_v9 = vcombine.high %v299_v3, %v307_v4  ;;  %v7340_v10 = vcombine.high %v300_v5, %v308_v6  ;;  %v419_v61 = vld [vmem:[#allocation5 + $0x770] sm:$0xff]  ;;  %v412_v62 = vld [vmem:[#allocation5 + $0x738] sm:$0xff] }
 0x187   :  { %1996 = vmatpush1.bf16.msra.mxu0 %v7461_v15  ;;  %2037 = vmatpush1.bf16.msra.mxu1 %v7463_v16  ;;  %v324_v15 = vld [vmem:[#allocation5 + $0x478] sm:$0xff]  ;;  %v7337_v16 = vcombine.low %v299_v3, %v307_v4  ;;  %v427_v4 = vld [vmem:[#allocation5 + $0x7b0] sm:$0xff] }
 0x188   :  { %2047 = vmatprep.subr.bf16.mxu0 %v7226_v17  ;;  %2088 = vmatprep.subr.bf16.mxu1 %v7228_v18  ;;  %v7339_v17 = vcombine.low %v300_v5, %v308_v6  ;;  %v7354_v18 = vcombine.high %v315_v11, %v323_v13  ;;  %v7356_v19 = vcombine.high %v316_v14, %v324_v15  ;;  %v435_v5 = vld [vmem:[#allocation5 + $0x7f0] sm:$0xff]  ;;  %v428_v6 = vld [vmem:[#allocation5 + $0x7b8] sm:$0xff] }
 0x18a   :  { %1998 = vmatmul.mubr.bf16.vlgmr.msra.gmra.mrb[8].mxu0 %v8995_v12  ;;  %2039 = vmatmul.mubr.bf16.vlgmr.msra.gmra.mrb[8].mxu1 %v8995_v12 }
 0x18b   :  { %2048 = vmatpush1.bf16.msra.mxu0 %v7225_v23  ;;  %2089 = vmatpush1.bf16.msra.mxu1 %v7227_v24  ;;  %v340_v23 = vld [vmem:[#allocation5 + $0x4f8] sm:$0xff]  ;;  %v7353_v24 = vcombine.low %v315_v11, %v323_v13  ;;  %v2153_v13 = vld [vmem:[#allocation8] sm:$0xff] }
 0x18c   :  { %2049 = vmatprep.subr.bf16.mxu0 %v7242_v25  ;;  %2090 = vmatprep.subr.bf16.mxu1 %v7244_v26  ;;  %v7355_v25 = vcombine.low %v316_v14, %v324_v15  ;;  %v7370_v26 = vcombine.high %v331_v20, %v339_v21  ;;  %v7372_v27 = vcombine.high %v332_v22, %v340_v23  ;;  %v2157_v14 = vld [vmem:[#allocation8 + $0x20] sm:$0xff]  ;;  %v2154_v15 = vld [vmem:[#allocation8 + $0x8] sm:$0xff] }
 0x18d   :  { %2079 = vmatprep.mubr.bf16.mxu0 %v8991_v57  ;;  %2120 = vmatprep.mubr.bf16.mxu1 %v8991_v57  ;;  %v7292_v57 = vcombine.high %v252_v45, %v260_v46  ;;  %v387_v45 = vld [vmem:[#allocation5 + $0x670] sm:$0xff]  ;;  %v380_v46 = vld [vmem:[#allocation5 + $0x638] sm:$0xff] }
 0x18f   :  { %2050 = vmatpush1.bf16.msra.mxu0 %v7241_v31  ;;  %2091 = vmatpush1.bf16.msra.mxu1 %v7243_v32  ;;  %v356_v31 = vld [vmem:[#allocation5 + $0x578] sm:$0xff]  ;;  %v7369_v32 = vcombine.low %v331_v20, %v339_v21  ;;  %v2161_v21 = vld [vmem:[#allocation8 + $0x40] sm:$0xff] }
 0x190   :  { %2051 = vmatprep.subr.bf16.mxu0 %v7258_v33  ;;  %2092 = vmatprep.subr.bf16.mxu1 %v7260_v34  ;;  %v7371_v33 = vcombine.low %v332_v22, %v340_v23  ;;  %v7386_v34 = vcombine.high %v347_v28, %v355_v29  ;;  %v7388_v35 = vcombine.high %v348_v30, %v356_v31  ;;  %v2165_v22 = vld [vmem:[#allocation8 + $0x60] sm:$0xff]  ;;  %v2162_v23 = vld [vmem:[#allocation8 + $0x48] sm:$0xff] }
 0x193   :  { %2052 = vmatpush1.bf16.msra.mxu0 %v7257_v39  ;;  %2093 = vmatpush1.bf16.msra.mxu1 %v7259_v40  ;;  %v372_v39 = vld [vmem:[#allocation5 + $0x5f8] sm:$0xff]  ;;  %v7385_v40 = vcombine.low %v347_v28, %v355_v29  ;;  %v2169_v29 = vld [vmem:[#allocation8 + $0x80] sm:$0xff] }
 0x194   :  { %2053 = vmatprep.subr.bf16.mxu0 %v7274_v41  ;;  %2094 = vmatprep.subr.bf16.mxu1 %v7276_v42  ;;  %v7387_v41 = vcombine.low %v348_v30, %v356_v31  ;;  %v7402_v42 = vcombine.high %v363_v36, %v371_v37  ;;  %v7404_v43 = vcombine.high %v364_v38, %v372_v39  ;;  %v2173_v30 = vld [vmem:[#allocation8 + $0xa0] sm:$0xff]  ;;  %v2170_v31 = vld [vmem:[#allocation8 + $0x88] sm:$0xff] }
 0x197   :  { %2054 = vmatpush1.bf16.msra.mxu0 %v7273_v47  ;;  %2095 = vmatpush1.bf16.msra.mxu1 %v7275_v48  ;;  %v388_v47 = vld [vmem:[#allocation5 + $0x678] sm:$0xff]  ;;  %v7401_v48 = vcombine.low %v363_v36, %v371_v37  ;;  %v2177_v37 = vld [vmem:[#allocation8 + $0xc0] sm:$0xff] }
 0x198   :  { %2055 = vmatprep.subr.bf16.mxu0 %v7290_v49  ;;  %2096 = vmatprep.subr.bf16.mxu1 %v7292_v57  ;;  %v7403_v49 = vcombine.low %v364_v38, %v372_v39  ;;  %v7418_v57 = vcombine.high %v379_v44, %v387_v45  ;;  %v7420_v50 = vcombine.high %v380_v46, %v388_v47  ;;  %v2181_v38 = vld [vmem:[#allocation8 + $0xe0] sm:$0xff]  ;;  %v2178_v39 = vld [vmem:[#allocation8 + $0xc8] sm:$0xff] }
 0x19b   :  { %2056 = vmatpush1.bf16.msra.mxu0 %v7289_v54  ;;  %2097 = vmatpush1.bf16.msra.mxu1 %v7291_v55  ;;  %v404_v54 = vld [vmem:[#allocation5 + $0x6f8] sm:$0xff]  ;;  %v7417_v55 = vcombine.low %v379_v44, %v387_v45  ;;  %v2185_v44 = vld [vmem:[#allocation8 + $0x100] sm:$0xff] }
 0x19c   :  { %2057 = vmatprep.subr.bf16.mxu0 %v7306_v56  ;;  %2098 = vmatprep.subr.bf16.mxu1 %v7308_v58  ;;  %v7419_v56 = vcombine.low %v380_v46, %v388_v47  ;;  %v7434_v58 = vcombine.high %v395_v51, %v403_v52  ;;  %v7436_v59 = vcombine.high %v396_v53, %v404_v54  ;;  %v2189_v45 = vld [vmem:[#allocation8 + $0x120] sm:$0xff]  ;;  %v2186_v46 = vld [vmem:[#allocation8 + $0x108] sm:$0xff] }
 0x19d   :  { %v2190_v47 = vld [vmem:[#allocation8 + $0x128] sm:$0xff] }
 0x19f   :  { %2058 = vmatpush1.bf16.msra.mxu0 %v7305_v63  ;;  %2099 = vmatpush1.bf16.msra.mxu1 %v7307_v0  ;;  %v420_v63 = vld [vmem:[#allocation5 + $0x778] sm:$0xff]  ;;  %v7433_v0 = vcombine.low %v395_v51, %v403_v52  ;;  %v2193_v51 = vld [vmem:[#allocation8 + $0x140] sm:$0xff] }
 0x1a0   :  { %2059 = vmatprep.subr.bf16.mxu0 %v7322_v1  ;;  %2100 = vmatprep.subr.bf16.mxu1 %v7324_v2  ;;  %v7435_v1 = vcombine.low %v396_v53, %v404_v54  ;;  %v7450_v2 = vcombine.high %v411_v60, %v419_v61  ;;  %v7452_v3 = vcombine.high %v412_v62, %v420_v63  ;;  %v2197_v52 = vld [vmem:[#allocation8 + $0x160] sm:$0xff]  ;;  %v2194_v53 = vld [vmem:[#allocation8 + $0x148] sm:$0xff] }
 0x1a1   :  { %v2198_v54 = vld [vmem:[#allocation8 + $0x168] sm:$0xff] }
 0x1a3   :  { %2060 = vmatpush1.bf16.msra.mxu0 %v7321_v7  ;;  %2101 = vmatpush1.bf16.msra.mxu1 %v7323_v8  ;;  %v436_v7 = vld [vmem:[#allocation5 + $0x7f8] sm:$0xff]  ;;  %v7449_v8 = vcombine.low %v411_v60, %v419_v61  ;;  %v2201_v60 = vld [vmem:[#allocation8 + $0x180] sm:$0xff] }
 0x1a4   :  { %2061 = vmatprep.subr.bf16.mxu0 %v7338_v9  ;;  %2102 = vmatprep.subr.bf16.mxu1 %v7340_v10  ;;  %v7451_v9 = vcombine.low %v412_v62, %v420_v63  ;;  %v7466_v10 = vcombine.high %v427_v4, %v435_v5  ;;  %v7468_v11 = vcombine.high %v428_v6, %v436_v7  ;;  %v2205_v61 = vld [vmem:[#allocation8 + $0x1a0] sm:$0xff]  ;;  %v2202_v62 = vld [vmem:[#allocation8 + $0x188] sm:$0xff] }
 0x1a5   :  { %v2206_v63 = vld [vmem:[#allocation8 + $0x1a8] sm:$0xff] }
 0x1a7   :  { %2062 = vmatpush1.bf16.msra.mxu0 %v7337_v16  ;;  %2103 = vmatpush1.bf16.msra.mxu1 %v7339_v17  ;;  %v2158_v16 = vld [vmem:[#allocation8 + $0x28] sm:$0xff]  ;;  %v7465_v17 = vcombine.low %v427_v4, %v435_v5  ;;  %v7520_v4 = vcombine.high %v2202_v62, %v2206_v63  ;;  %v2209_v5 = vld [vmem:[#allocation8 + $0x1c0] sm:$0xff] }
 0x1a8   :  { %2063 = vmatprep.subr.bf16.mxu0 %v7354_v18  ;;  %2104 = vmatprep.subr.bf16.mxu1 %v7356_v19  ;;  %v7467_v18 = vcombine.low %v428_v6, %v436_v7  ;;  %v7470_v19 = vcombine.high %v2153_v13, %v2157_v14  ;;  %v7472_v20 = vcombine.high %v2154_v15, %v2158_v16  ;;  %v2213_v6 = vld [vmem:[#allocation8 + $0x1e0] sm:$0xff] }
 0x1ab   :  { %2064 = vmatpush1.bf16.msra.mxu0 %v7353_v24  ;;  %2105 = vmatpush1.bf16.msra.mxu1 %v7355_v25  ;;  %v2166_v24 = vld [vmem:[#allocation8 + $0x68] sm:$0xff]  ;;  %v7469_v25 = vcombine.low %v2153_v13, %v2157_v14  ;;  %v7517_v14 = vcombine.low %v2201_v60, %v2205_v61 }
 0x1ac   :  { %2065 = vmatprep.subr.bf16.mxu0 %v7370_v26  ;;  %2106 = vmatprep.subr.bf16.mxu1 %v7372_v27  ;;  %v7471_v26 = vcombine.low %v2154_v15, %v2158_v16  ;;  %v7478_v27 = vcombine.high %v2161_v21, %v2165_v22  ;;  %v7480_v28 = vcombine.high %v2162_v23, %v2166_v24 }
 0x1af   :  { %2066 = vmatpush1.bf16.msra.mxu0 %v7369_v32  ;;  %2107 = vmatpush1.bf16.msra.mxu1 %v7371_v33  ;;  %v2174_v32 = vld [vmem:[#allocation8 + $0xa8] sm:$0xff]  ;;  %v7477_v33 = vcombine.low %v2161_v21, %v2165_v22  ;;  %v2217_v21 = vld [vmem:[#allocation8 + $0x200] sm:$0xff] }
 0x1b0   :  { %2067 = vmatprep.subr.bf16.mxu0 %v7386_v34  ;;  %2108 = vmatprep.subr.bf16.mxu1 %v7388_v35  ;;  %v7479_v34 = vcombine.low %v2162_v23, %v2166_v24  ;;  %v7486_v35 = vcombine.high %v2169_v29, %v2173_v30  ;;  %v7488_v36 = vcombine.high %v2170_v31, %v2174_v32  ;;  %v2221_v22 = vld [vmem:[#allocation8 + $0x220] sm:$0xff]  ;;  %v2218_v23 = vld [vmem:[#allocation8 + $0x208] sm:$0xff] }
 0x1b1   :  { %v2222_v24 = vld [vmem:[#allocation8 + $0x228] sm:$0xff] }
 0x1b3   :  { %2068 = vmatpush1.bf16.msra.mxu0 %v7385_v40  ;;  %2109 = vmatpush1.bf16.msra.mxu1 %v7387_v41  ;;  %v2182_v40 = vld [vmem:[#allocation8 + $0xe8] sm:$0xff]  ;;  %v7485_v41 = vcombine.low %v2169_v29, %v2173_v30  ;;  %v2229_v29 = vld [vmem:[#allocation8 + $0x260] sm:$0xff]  ;;  %v7536_v30 = vcombine.high %v2218_v23, %v2222_v24 }
 0x1b4   :  { %2069 = vmatprep.subr.bf16.mxu0 %v7402_v42  ;;  %2110 = vmatprep.subr.bf16.mxu1 %v7404_v43  ;;  %v7487_v42 = vcombine.low %v2170_v31, %v2174_v32  ;;  %v7494_v43 = vcombine.high %v2177_v37, %v2181_v38  ;;  %v9019_v31 = vld [vmem:[#allocation8 + $0x400] sm:$0xff] }
 0x1b5   :  { %v9021_v32 = vld [vmem:[#allocation8 + $0x420] sm:$0xff] }
 0x1b7   :  { %2070 = vmatpush1.bf16.msra.mxu0 %v7401_v48  ;;  %2111 = vmatpush1.bf16.msra.mxu1 %v7403_v49  ;;  %v7493_v48 = vcombine.low %v2177_v37, %v2181_v38  ;;  %v7495_v49 = vcombine.low %v2178_v39, %v2182_v40  ;;  %v7533_v37 = vcombine.low %v2217_v21, %v2221_v22 }
 0x1b8   :  { %2071 = vmatprep.subr.bf16.mxu0 %v7418_v57  ;;  %2112 = vmatprep.subr.bf16.mxu1 %v7420_v50  ;;  %v7502_v57 = vcombine.high %v2185_v44, %v2189_v45  ;;  %v7504_v50 = vcombine.high %v2186_v46, %v2190_v47  ;;  %v7597_v38 = vcombine.low %v9019_v31, %v9021_v32 }
 0x1bb   :  { %2072 = vmatpush1.bf16.msra.mxu0 %v7417_v55  ;;  %2113 = vmatpush1.bf16.msra.mxu1 %v7419_v56  ;;  %v7501_v55 = vcombine.low %v2185_v44, %v2189_v45  ;;  %v7503_v56 = vcombine.low %v2186_v46, %v2190_v47  ;;  %v2234_v44 = vld [vmem:[#allocation8 + $0x288] sm:$0xff] }
 0x1bc   :  { %2073 = vmatprep.subr.bf16.mxu0 %v7434_v58  ;;  %2114 = vmatprep.subr.bf16.mxu1 %v7436_v59  ;;  %v7510_v58 = vcombine.high %v2193_v51, %v2197_v52  ;;  %v7512_v59 = vcombine.high %v2194_v53, %v2198_v54  ;;  %v2238_v45 = vld [vmem:[#allocation8 + $0x2a8] sm:$0xff] }
 0x1bf   :  { %2074 = vmatpush1.bf16.msra.mxu0 %v7433_v0  ;;  %2115 = vmatpush1.bf16.msra.mxu1 %v7435_v1  ;;  %v7509_v0 = vcombine.low %v2193_v51, %v2197_v52  ;;  %v7511_v1 = vcombine.low %v2194_v53, %v2198_v54  ;;  %v2242_v51 = vld [vmem:[#allocation8 + $0x2c8] sm:$0xff]  ;;  %v7551_v54 = vcombine.low %v2234_v44, %v2238_v45 }
 0x1c0   :  { %2075 = vmatprep.subr.bf16.mxu0 %v7450_v2  ;;  %2116 = vmatprep.subr.bf16.mxu1 %v7452_v3  ;;  %v7518_v2 = vcombine.high %v2201_v60, %v2205_v61  ;;  %v2246_v52 = vld [vmem:[#allocation8 + $0x2e8] sm:$0xff] }
 0x1c1   :  { %v2250_v60 = vld [vmem:[#allocation8 + $0x308] sm:$0xff] }
 0x1c2   :  { %v2254_v61 = vld [vmem:[#allocation8 + $0x328] sm:$0xff] }
 0x1c3   :  { %2076 = vmatpush1.bf16.msra.mxu0 %v7449_v8  ;;  %2117 = vmatpush1.bf16.msra.mxu1 %v7451_v9  ;;  %v2210_v9 = vld [vmem:[#allocation8 + $0x1c8] sm:$0xff] }
 0x1c4   :  { %2077 = vmatprep.subr.bf16.mxu0 %v7466_v10  ;;  %2118 = vmatprep.subr.bf16.mxu1 %v7468_v11  ;;  %v2214_v10 = vld [vmem:[#allocation8 + $0x1e8] sm:$0xff] }
 0x1c7   :  { %2078 = vmatpush1.bf16.msra.mxu0 %v7465_v17  ;;  %2119 = vmatpush1.bf16.msra.mxu1 %v7467_v18  ;;  %v7519_v17 = vcombine.low %v2202_v62, %v2206_v63  ;;  %v7526_v18 = vcombine.high %v2209_v5, %v2213_v6  ;;  %v7559_v63 = vcombine.low %v2242_v51, %v2246_v52 }
 0x1c8   :  { %5267 = vmatprep.subr.bf16.mxu0 %v7470_v19  ;;  %5431 = vmatprep.subr.bf16.mxu1 %v7472_v20  ;;  %v7528_v20 = vcombine.high %v2210_v9, %v2214_v10 }
 0x1ca   :  { %2080 = vmatmul.mubr.bf16.vlgmr.msra.gmra.mrb[12].mxu0 %v8995_v12  ;;  %2121 = vmatmul.mubr.bf16.vlgmr.msra.gmra.mrb[12].mxu1 %v8995_v12  ;;  %v7496_v12 = vcombine.high %v2178_v39, %v2182_v40  ;;  %v7535_v40 = vcombine.low %v2218_v23, %v2222_v24  ;;  %v2273_v23 = vld [vmem:[#allocation8 + $0x3c0] sm:$0xff] }
 0x1cb   :  { %5268 = vmatpush1.bf16.msra.mxu0 %v7469_v25  ;;  %5432 = vmatpush1.bf16.msra.mxu1 %v7471_v26  ;;  %v7525_v25 = vcombine.low %v2209_v5, %v2213_v6  ;;  %v7527_v26 = vcombine.low %v2210_v9, %v2214_v10  ;;  %v2258_v5 = vld [vmem:[#allocation8 + $0x348] sm:$0xff]  ;;  %v7567_v10 = vcombine.low %v2250_v60, %v2254_v61  ;;  %v2277_v24 = vld [vmem:[#allocation8 + $0x3e0] sm:$0xff] }
 0x1cc   :  { %5269 = vmatprep.subr.bf16.mxu0 %v7478_v27  ;;  %5433 = vmatprep.subr.bf16.mxu1 %v7480_v28  ;;  %v7534_v27 = vcombine.high %v2217_v21, %v2221_v22  ;;  %v2225_v28 = vld [vmem:[#allocation8 + $0x240] sm:$0xff]  ;;  %v2262_v6 = vld [vmem:[#allocation8 + $0x368] sm:$0xff] }
 0x1cd   :  { %v7541_v46 = vcombine.low %v2225_v28, %v2229_v29 }
 0x1cf   :  { %5270 = vmatpush1.bf16.msra.mxu0 %v7477_v33  ;;  %5434 = vmatpush1.bf16.msra.mxu1 %v7479_v34  ;;  %v9023_v33 = vld [vmem:[#allocation8 + $0x408] sm:$0xff] }
 0x1d0   :  { %5271 = vmatprep.subr.bf16.mxu0 %v7486_v35  ;;  %5435 = vmatprep.subr.bf16.mxu1 %v7488_v36  ;;  %v2226_v34 = vld [vmem:[#allocation8 + $0x248] sm:$0xff] }
 0x1d1   :  { %v2230_v35 = vld [vmem:[#allocation8 + $0x268] sm:$0xff] }
 0x1d2   :  { %v9025_v36 = vld [vmem:[#allocation8 + $0x428] sm:$0xff]  ;;  %v7543_v47 = vcombine.low %v2226_v34, %v2230_v35 }
 0x1d3   :  { %5272 = vmatpush1.bf16.msra.mxu0 %v7485_v41  ;;  %5436 = vmatpush1.bf16.msra.mxu1 %v7487_v42  ;;  %v7599_v39 = vcombine.low %v9023_v33, %v9025_v36  ;;  %v7542_v41 = vcombine.high %v2225_v28, %v2229_v29  ;;  %v7544_v42 = vcombine.high %v2226_v34, %v2230_v35 }
 0x1d4   :  { %5273 = vmatprep.subr.bf16.mxu0 %v7494_v43  ;;  %5437 = vmatprep.subr.bf16.mxu1 %v7496_v12  ;;  %v2233_v43 = vld [vmem:[#allocation8 + $0x280] sm:$0xff]  ;;  %v7590_v29 = vcombine.high %v2273_v23, %v2277_v24  ;;  %v7589_v34 = vcombine.low %v2273_v23, %v2277_v24 }
 0x1d5   :  { %v2237_v12 = vld [vmem:[#allocation8 + $0x2a0] sm:$0xff] }
 0x1d6   :  { %v7549_v53 = vcombine.low %v2233_v43, %v2237_v12  ;;  %v2289_v24 = vld [vmem:[#allocation8 + $0x440] sm:$0xff] }
 0x1d7   :  { %5274 = vmatpush1.bf16.msra.mxu0 %v7493_v48  ;;  %5438 = vmatpush1.bf16.msra.mxu1 %v7495_v49  ;;  %v7550_v48 = vcombine.high %v2233_v43, %v2237_v12  ;;  %v7552_v49 = vcombine.high %v2234_v44, %v2238_v45 }
 0x1d8   :  { %5275 = vmatprep.subr.bf16.mxu0 %v7502_v57  ;;  %5439 = vmatprep.subr.bf16.mxu1 %v7504_v50  ;;  %v2241_v57 = vld [vmem:[#allocation8 + $0x2c0] sm:$0xff] }
 0x1d9   :  { %v2245_v50 = vld [vmem:[#allocation8 + $0x2e0] sm:$0xff] }
 0x1da   :  { %v7557_v62 = vcombine.low %v2241_v57, %v2245_v50 }
 0x1db   :  { %5276 = vmatpush1.bf16.msra.mxu0 %v7501_v55  ;;  %5440 = vmatpush1.bf16.msra.mxu1 %v7503_v56  ;;  %v7558_v55 = vcombine.high %v2241_v57, %v2245_v50  ;;  %v7560_v56 = vcombine.high %v2242_v51, %v2246_v52  ;;  %v9048_v50 = vld [vmem:[#allocation7] sm:$0xff] }
 0x1dc   :  { %5277 = vmatprep.subr.bf16.mxu0 %v7510_v58  ;;  %5441 = vmatprep.subr.bf16.mxu1 %v7512_v59  ;;  %v2249_v58 = vld [vmem:[#allocation8 + $0x300] sm:$0xff] }
 0x1dd   :  { %v9011_v3 = vpop.f32.mrb[0].mxu0  ;;  %v9015_v8 = vpop.f32.mrb[0].mxu1  ;;  %v2253_v59 = vld [vmem:[#allocation8 + $0x320] sm:$0xff] }
 0x1de   :  { %v9013_v7 = vpop.f32.mrb[1].mxu0  ;;  %v9017_v13 = vpop.f32.mrb[1].mxu1  ;;  %v7565_v9 = vcombine.low %v2249_v58, %v2253_v59 }
 0x1df   :  { %v1839_v11 = vpop.f32.mrb[2].mxu0  ;;  %5278 = vmatpush1.bf16.msra.mxu0 %v7509_v0  ;;  %v1880_v16 = vpop.f32.mrb[2].mxu1  ;;  %5442 = vmatpush1.bf16.msra.mxu1 %v7511_v1  ;;  %v7566_v0 = vcombine.high %v2249_v58, %v2253_v59  ;;  %v7568_v1 = vcombine.high %v2250_v60, %v2254_v61 }
 0x1e0   :  { %v1840_v15 = vpop.f32.mrb[3].mxu0  ;;  %5279 = vmatprep.subr.bf16.mxu0 %v7518_v2  ;;  %v1881_v19 = vpop.f32.mrb[3].mxu1  ;;  %5443 = vmatprep.subr.bf16.mxu1 %v7520_v4  ;;  %v2257_v2 = vld [vmem:[#allocation8 + $0x340] sm:$0xff] }
 0x1e1   :  { %v2261_v4 = vld [vmem:[#allocation8 + $0x360] sm:$0xff] }
 0x1e2   :  { %v7574_v11 = vcombine.high %v2257_v2, %v2261_v4  ;;  %v2265_v15 = vld [vmem:[#allocation8 + $0x380] sm:$0xff]  ;;  %v7573_v19 = vcombine.low %v2257_v2, %v2261_v4 }
 0x1e3   :  { %5280 = vmatpush1.bf16.msra.mxu0 %v7517_v14  ;;  %5444 = vmatpush1.bf16.msra.mxu1 %v7519_v17  ;;  %v7576_v14 = vcombine.high %v2258_v5, %v2262_v6  ;;  %v2269_v16 = vld [vmem:[#allocation8 + $0x3a0] sm:$0xff]  ;;  %v2266_v17 = vld [vmem:[#allocation8 + $0x388] sm:$0xff] }
 0x1e4   :  { %5281 = vmatprep.subr.bf16.mxu0 %v7526_v18  ;;  %5445 = vmatprep.subr.bf16.mxu1 %v7528_v20  ;;  %v2270_v18 = vld [vmem:[#allocation8 + $0x3a8] sm:$0xff]  ;;  %v7575_v20 = vcombine.low %v2258_v5, %v2262_v6  ;;  %v7582_v21 = vcombine.high %v2265_v15, %v2269_v16 }
 0x1e5   :  { %v7584_v22 = vcombine.high %v2266_v17, %v2270_v18  ;;  %v7583_v28 = vcombine.low %v2266_v17, %v2270_v18 }
 0x1e7   :  { %5282 = vmatpush1.bf16.msra.mxu0 %v7525_v25  ;;  %5446 = vmatpush1.bf16.msra.mxu1 %v7527_v26  ;;  %v2274_v25 = vld [vmem:[#allocation8 + $0x3c8] sm:$0xff] }
 0x1e8   :  { %5283 = vmatprep.subr.bf16.mxu0 %v7534_v27  ;;  %5447 = vmatprep.subr.bf16.mxu1 %v7536_v30  ;;  %v2278_v26 = vld [vmem:[#allocation8 + $0x3e8] sm:$0xff]  ;;  %v7581_v27 = vcombine.low %v2265_v15, %v2269_v16 }
 0x1e9   :  { %v7592_v30 = vcombine.high %v2274_v25, %v2278_v26  ;;  %v7591_v35 = vcombine.low %v2274_v25, %v2278_v26  ;;  %v2293_v26 = vld [vmem:[#allocation8 + $0x460] sm:$0xff] }
 0x1eb   :  { %5284 = vmatpush1.bf16.msra.mxu0 %v7533_v37  ;;  %5448 = vmatpush1.bf16.msra.mxu1 %v7535_v40  ;;  %v7598_v37 = vcombine.high %v9019_v31, %v9021_v32  ;;  %v7600_v40 = vcombine.high %v9023_v33, %v9025_v36 }
 0x1ec   :  { %5285 = vmatprep.subr.bf16.mxu0 %v7542_v41  ;;  %5449 = vmatprep.subr.bf16.mxu1 %v7544_v42 }
 0x1ef   :  { %5286 = vmatpush1.bf16.msra.mxu0 %v7541_v46  ;;  %5450 = vmatpush1.bf16.msra.mxu1 %v7543_v47 }
 0x1f0   :  { %5287 = vmatprep.subr.bf16.mxu0 %v7550_v48  ;;  %5451 = vmatprep.subr.bf16.mxu1 %v7552_v49  ;;  %v441_v48 = vlaneseq }
 0x1f2   :  { %v9043_v49 = vshrl.u32 %v441_v48, 7 }
 0x1f3   :  { %5288 = vmatpush1.bf16.msra.mxu0 %v7549_v53  ;;  %5452 = vmatpush1.bf16.msra.mxu1 %v7551_v54  ;;  %v9056_v53 = vld [vmem:[#allocation7 + $0x8] sm:$0xff] }
 0x1f4   :  { %5289 = vmatprep.subr.bf16.mxu0 %v7558_v55  ;;  %5453 = vmatprep.subr.bf16.mxu1 %v7560_v56  ;;  %v9046_v57 = vsub.s32 0, %v9043_v49  ;;  %v9051_v51 = vsub.s32 1, %v9043_v49  ;;  %v9054_v52 = vsub.s32 2, %v9043_v49  ;;  %v9059_v54 = vsub.s32 3, %v9043_v49 }
 0x1f6   :  { %v444_v55 = vrot.slane %v9048_v50, %v9046_v57  ;;  %v476_v56 = vrot.slane %v9056_v53, %v9046_v57  ;;  %v448_v58 = vrot.slane %v9048_v50, %v9051_v51  ;;  %v452_v59 = vrot.slane %v9048_v50, %v9054_v52 }
 0x1f7   :  { %5290 = vmatpush1.bf16.msra.mxu0 %v7557_v62  ;;  %5454 = vmatpush1.bf16.msra.mxu1 %v7559_v63  ;;  %v484_v60 = vrot.slane %v9056_v53, %v9054_v52  ;;  %v480_v61 = vrot.slane %v9056_v53, %v9051_v51  ;;  %v456_v62 = vrot.slane %v9048_v50, %v9059_v54 }
 0x1f8   :  { %5291 = vmatprep.subr.bf16.mxu0 %v7566_v0  ;;  %5455 = vmatprep.subr.bf16.mxu1 %v7568_v1  ;;  %v488_v63 = vrot.slane %v9056_v53, %v9059_v54  ;;  %v1836_v1 = vadd.f32 %v9011_v3, %v444_v55  ;;  %v1838_v6 = vadd.f32 %v9013_v7, %v448_v58  ;;  %v2309_v58 = vld [vmem:[#allocation8 + $0x4e0] sm:$0xff] }
 0x1f9   :  { %v1879_v16 = vadd.f32 %v9017_v13, %v456_v62  ;;  %v2318_v62 = vld [vmem:[#allocation8 + $0x528] sm:$0xff] }
 0x1fb   :  { %5292 = vmatpush1.bf16.msra.mxu0 %v7565_v9  ;;  %5456 = vmatpush1.bf16.msra.mxu1 %v7567_v10  ;;  %v9080_v9 = vadd.f32 %v9015_v8, %v452_v59  ;;  %v2306_v59 = vld [vmem:[#allocation8 + $0x4c8] sm:$0xff] }
 0x1fc   :  { %5293 = vmatprep.subr.bf16.mxu0 %v7574_v11  ;;  %5457 = vmatprep.subr.bf16.mxu1 %v7576_v14 }
 0x1ff   :  { %5294 = vmatpush1.bf16.msra.mxu0 %v7573_v19  ;;  %5458 = vmatpush1.bf16.msra.mxu1 %v7575_v20 }
 0x200   :  { %5295 = vmatprep.subr.bf16.mxu0 %v7582_v21  ;;  %5459 = vmatprep.subr.bf16.mxu1 %v7584_v22 }
 0x203   :  { %5296 = vmatpush1.bf16.msra.mxu0 %v7581_v27  ;;  %5460 = vmatpush1.bf16.msra.mxu1 %v7583_v28  ;;  %v2290_v27 = vld [vmem:[#allocation8 + $0x448] sm:$0xff] }
 0x204   :  { %5297 = vmatprep.subr.bf16.mxu0 %v7590_v29  ;;  %5461 = vmatprep.subr.bf16.mxu1 %v7592_v30  ;;  %v2294_v28 = vld [vmem:[#allocation8 + $0x468] sm:$0xff]  ;;  %v2297_v30 = vld [vmem:[#allocation8 + $0x480] sm:$0xff] }
 0x207   :  { %5298 = vmatpush1.bf16.msra.mxu0 %v7589_v34  ;;  %5462 = vmatpush1.bf16.msra.mxu1 %v7591_v35  ;;  %v7606_v34 = vcombine.high %v2289_v24, %v2293_v26  ;;  %v7608_v35 = vcombine.high %v2290_v27, %v2294_v28 }
 0x208   :  { %5308 = vmatprep.subr.bf16.mxu0 %v7598_v37  ;;  %5472 = vmatprep.subr.bf16.mxu1 %v7600_v40  ;;  %v2301_v37 = vld [vmem:[#allocation8 + $0x4a0] sm:$0xff]  ;;  %v2298_v40 = vld [vmem:[#allocation8 + $0x488] sm:$0xff] }
 0x209   :  { %v7614_v48 = vcombine.high %v2297_v30, %v2301_v37  ;;  %v7613_v31 = vcombine.low %v2297_v30, %v2301_v37  ;;  %v2345_v37 = vld [vmem:[#allocation8 + $0x600] sm:$0xff] }
 0x21d   :  { %v9035_v41 = vpop.f32.mrb[4].mxu0  ;;  %v9039_v43 = vpop.f32.mrb[4].mxu1 }
 0x21e   :  { %v9037_v42 = vpop.f32.mrb[5].mxu0  ;;  %v9041_v44 = vpop.f32.mrb[5].mxu1 }
 0x21f   :  { %v1921_v12 = vpop.f32.mrb[6].mxu0  ;;  %v1962_v46 = vpop.f32.mrb[6].mxu1 }
 0x220   :  { %v1922_v45 = vpop.f32.mrb[7].mxu0  ;;  %v1963_v47 = vpop.f32.mrb[7].mxu1  ;;  %v2302_v12 = vld [vmem:[#allocation8 + $0x4a8] sm:$0xff]  ;;  %v7605_v46 = vcombine.low %v2289_v24, %v2293_v26  ;;  %v2337_v24 = vld [vmem:[#allocation8 + $0x5c0] sm:$0xff] }
 0x221   :  { %v7607_v47 = vcombine.low %v2290_v27, %v2294_v28  ;;  %v7616_v55 = vcombine.high %v2298_v40, %v2302_v12  ;;  %v7615_v32 = vcombine.low %v2298_v40, %v2302_v12  ;;  %v2338_v26 = vld [vmem:[#allocation8 + $0x5c8] sm:$0xff]  ;;  %v2349_v40 = vld [vmem:[#allocation8 + $0x620] sm:$0xff] }
 0x222   :  { %v2342_v27 = vld [vmem:[#allocation8 + $0x5e8] sm:$0xff] }
 0x223   :  { %v2346_v12 = vld [vmem:[#allocation8 + $0x608] sm:$0xff] }
 0x25d   :  { %v1999_v0 = vpop.f32.mrb[8].mxu0  ;;  %v2040_v4 = vpop.f32.mrb[8].mxu1 }
 0x25e   :  { %v2000_v2 = vadd.f32 %v1999_v0, %v476_v56  ;;  %v2001_v5 = vpop.f32.mrb[9].mxu0  ;;  %v9082_v10 = vadd.f32 %v2040_v4, %v484_v60  ;;  %v2042_v14 = vpop.f32.mrb[9].mxu1  ;;  %v2305_v56 = vld [vmem:[#allocation8 + $0x4c0] sm:$0xff]  ;;  %v2310_v60 = vld [vmem:[#allocation8 + $0x4e8] sm:$0xff] }
 0x25f   :  { %v2002_v11 = vadd.f32 %v2001_v5, %v480_v61  ;;  %v2003_v15 = vpop.f32.mrb[10].mxu0  ;;  %v2043_v18 = vadd.f32 %v2042_v14, %v488_v63  ;;  %v2044_v20 = vpop.f32.mrb[10].mxu1  ;;  %v7622_v33 = vcombine.high %v2305_v56, %v2309_v58  ;;  %v7624_v36 = vcombine.high %v2306_v59, %v2310_v60  ;;  %v2314_v61 = vld [vmem:[#allocation8 + $0x508] sm:$0xff]  ;;  %v2321_v4 = vld [vmem:[#allocation8 + $0x540] sm:$0xff] }
 0x260   :  { %v2129_v17 = vmax.f32 %v1836_v1, %v2000_v2  ;;  %v2004_v19 = vpop.f32.mrb[11].mxu0  ;;  %v2131_v3 = vmax.f32 %v9080_v9, %v9082_v10  ;;  %v2045_v22 = vpop.f32.mrb[11].mxu1  ;;  %v7621_v63 = vcombine.low %v2305_v56, %v2309_v58  ;;  %v7623_v0 = vcombine.low %v2306_v59, %v2310_v60  ;;  %v2325_v5 = vld [vmem:[#allocation8 + $0x560] sm:$0xff]  ;;  %v2330_v20 = vld [vmem:[#allocation8 + $0x588] sm:$0xff] }
 0x261   :  { %v2130_v21 = vmax.f32 %v1838_v6, %v2002_v11  ;;  %v2132_v23 = vmax.f32 %v1879_v16, %v2043_v18  ;;  %v7632_v2 = vcombine.high %v2314_v61, %v2318_v62  ;;  %v2322_v6 = vld [vmem:[#allocation8 + $0x548] sm:$0xff]  ;;  %v7631_v15 = vcombine.low %v2314_v61, %v2318_v62  ;;  %v2329_v18 = vld [vmem:[#allocation8 + $0x580] sm:$0xff] }
 0x262   :  { %v2137_v7 = vmax.f32 %v2129_v17, 0.0  ;;  %v2326_v11 = vld [vmem:[#allocation8 + $0x568] sm:$0xff]  ;;  %v7638_v16 = vcombine.high %v2321_v4, %v2325_v5  ;;  %v2333_v19 = vld [vmem:[#allocation8 + $0x5a0] sm:$0xff]  ;;  %v7637_v22 = vcombine.low %v2321_v4, %v2325_v5 }
 0x263   :  { %v2138_v8 = vmax.f32 %v2130_v21, 0.0  ;;  %v2140_v25 = vmax.f32 %v2132_v23, 0.0  ;;  %v7640_v17 = vcombine.high %v2322_v6, %v2326_v11  ;;  %v2334_v21 = vld [vmem:[#allocation8 + $0x5a8] sm:$0xff]  ;;  %v7646_v23 = vcombine.high %v2329_v18, %v2333_v19  ;;  %v2353_v58 = vld [vmem:[#allocation8 + $0x640] sm:$0xff] }
 0x264   :  { %v9089_v13 = vpack.c.bf16 %v2137_v7, %v2137_v7  ;;  %v7639_v7 = vcombine.low %v2322_v6, %v2326_v11  ;;  %v7645_v28 = vcombine.low %v2329_v18, %v2333_v19  ;;  %v7647_v30 = vcombine.low %v2330_v20, %v2334_v21  ;;  %v2357_v59 = vld [vmem:[#allocation8 + $0x660] sm:$0xff]  ;;  %v2354_v60 = vld [vmem:[#allocation8 + $0x648] sm:$0xff] }
 0x265   :  { %v9087_v29 = vpack.c.bf16 %v2138_v8, %v2138_v8  ;;  %v9093_v45 = vpack.c.bf16 %v2140_v25, %v2140_v25  ;;  %v7648_v8 = vcombine.high %v2330_v20, %v2334_v21  ;;  %v2341_v25 = vld [vmem:[#allocation8 + $0x5e0] sm:$0xff]  ;;  %v2362_v62 = vld [vmem:[#allocation8 + $0x688] sm:$0xff] }
 0x266   :  { %v2365_v61 = vld [vmem:[#allocation8 + $0x6a0] sm:$0xff]  ;;  %v2370_v11 = vld [vmem:[#allocation8 + $0x6c8] sm:$0xff] }
 0x267   :  { %5299 = vmatprep.mubr.bf16.mxu0 %v9087_v29  ;;  %5463 = vmatprep.mubr.bf16.mxu1 %v9087_v29  ;;  %v2369_v5 = vld [vmem:[#allocation8 + $0x6c0] sm:$0xff]  ;;  %v2378_v21 = vld [vmem:[#allocation8 + $0x708] sm:$0xff] }
 0x268   :  { %5300 = vmatmul.mubr.bf16.vlgmr.msra.gmra.mrb[16].mxu0 %v9089_v13  ;;  %5464 = vmatmul.mubr.bf16.vlgmr.msra.gmra.mrb[16].mxu1 %v9089_v13  ;;  %v2373_v6 = vld [vmem:[#allocation8 + $0x6e0] sm:$0xff] }
 0x269   :  { %5309 = vmatpush1.bf16.msra.mxu0 %v7597_v38  ;;  %5473 = vmatpush1.bf16.msra.mxu1 %v7599_v39  ;;  %v2313_v38 = vld [vmem:[#allocation8 + $0x500] sm:$0xff] }
 0x26a   :  { %5340 = vmatprep.mubr.bf16.mxu0 %v9093_v45  ;;  %5504 = vmatprep.mubr.bf16.mxu1 %v9093_v45  ;;  %v2317_v39 = vld [vmem:[#allocation8 + $0x520] sm:$0xff] }
 0x26b   :  { %5310 = vmatprep.subr.bf16.mxu0 %v7606_v34  ;;  %5474 = vmatprep.subr.bf16.mxu1 %v7608_v35  ;;  %v7630_v1 = vcombine.high %v2313_v38, %v2317_v39  ;;  %v7629_v14 = vcombine.low %v2313_v38, %v2317_v39  ;;  %v7654_v34 = vcombine.high %v2337_v24, %v2341_v25  ;;  %v2361_v39 = vld [vmem:[#allocation8 + $0x680] sm:$0xff] }
 0x26c   :  { %v7656_v35 = vcombine.high %v2338_v26, %v2342_v27  ;;  %v2377_v19 = vld [vmem:[#allocation8 + $0x700] sm:$0xff] }
 0x26d   :  { %5311 = vmatpush1.bf16.msra.mxu0 %v7605_v46  ;;  %5475 = vmatpush1.bf16.msra.mxu1 %v7607_v47  ;;  %v2350_v46 = vld [vmem:[#allocation8 + $0x628] sm:$0xff]  ;;  %v7653_v47 = vcombine.low %v2337_v24, %v2341_v25  ;;  %v2381_v20 = vld [vmem:[#allocation8 + $0x720] sm:$0xff] }
 0x26e   :  { %5312 = vmatprep.subr.bf16.mxu0 %v7614_v48  ;;  %5476 = vmatprep.subr.bf16.mxu1 %v7616_v55  ;;  %v7655_v48 = vcombine.low %v2338_v26, %v2342_v27  ;;  %v7662_v55 = vcombine.high %v2345_v37, %v2349_v40  ;;  %v7664_v56 = vcombine.high %v2346_v12, %v2350_v46  ;;  %v2385_v25 = vld [vmem:[#allocation8 + $0x740] sm:$0xff]  ;;  %v2386_v27 = vld [vmem:[#allocation8 + $0x748] sm:$0xff] }
 0x26f   :  { %v2389_v26 = vld [vmem:[#allocation8 + $0x760] sm:$0xff] }
 0x271   :  { %5313 = vmatpush1.bf16.msra.mxu0 %v7613_v31  ;;  %5477 = vmatpush1.bf16.msra.mxu1 %v7615_v32  ;;  %v2358_v31 = vld [vmem:[#allocation8 + $0x668] sm:$0xff]  ;;  %v7661_v32 = vcombine.low %v2345_v37, %v2349_v40  ;;  %v7702_v37 = vcombine.high %v2385_v25, %v2389_v26 }
 0x272   :  { %5314 = vmatprep.subr.bf16.mxu0 %v7622_v33  ;;  %5478 = vmatprep.subr.bf16.mxu1 %v7624_v36  ;;  %v7663_v33 = vcombine.low %v2346_v12, %v2350_v46  ;;  %v7670_v36 = vcombine.high %v2353_v58, %v2357_v59  ;;  %v7672_v38 = vcombine.high %v2354_v60, %v2358_v31  ;;  %v2393_v12 = vld [vmem:[#allocation8 + $0x780] sm:$0xff]  ;;  %v9109_v46 = vsub.s32 5, %v9043_v49 }
 0x275   :  { %5315 = vmatpush1.bf16.msra.mxu0 %v7621_v63  ;;  %5479 = vmatpush1.bf16.msra.mxu1 %v7623_v0  ;;  %v2366_v63 = vld [vmem:[#allocation8 + $0x6a8] sm:$0xff]  ;;  %v7669_v0 = vcombine.low %v2353_v58, %v2357_v59  ;;  %v9115_v58 = vsub.s32 7, %v9043_v49 }
 0x276   :  { %5316 = vmatprep.subr.bf16.mxu0 %v7630_v1  ;;  %5480 = vmatprep.subr.bf16.mxu1 %v7632_v2  ;;  %v7671_v1 = vcombine.low %v2354_v60, %v2358_v31  ;;  %v7678_v2 = vcombine.high %v2361_v39, %v2365_v61  ;;  %v7680_v4 = vcombine.high %v2362_v62, %v2366_v63 }
 0x277   :  { %v7701_v60 = vcombine.low %v2385_v25, %v2389_v26 }
 0x279   :  { %5317 = vmatpush1.bf16.msra.mxu0 %v7629_v14  ;;  %5481 = vmatpush1.bf16.msra.mxu1 %v7631_v15  ;;  %v2374_v14 = vld [vmem:[#allocation8 + $0x6e8] sm:$0xff]  ;;  %v7677_v15 = vcombine.low %v2361_v39, %v2365_v61  ;;  %v464_v39 = vrot.slane %v9048_v50, %v9109_v46 }
 0x27a   :  { %5318 = vmatprep.subr.bf16.mxu0 %v7638_v16  ;;  %5482 = vmatprep.subr.bf16.mxu1 %v7640_v17  ;;  %v7679_v16 = vcombine.low %v2362_v62, %v2366_v63  ;;  %v7686_v17 = vcombine.high %v2369_v5, %v2373_v6  ;;  %v7688_v18 = vcombine.high %v2370_v11, %v2374_v14  ;;  %v2405_v63 = vld [vmem:[#allocation8 + $0x7e0] sm:$0xff] }
 0x27b   :  { %v496_v62 = vrot.slane %v9056_v53, %v9109_v46 }
 0x27d   :  { %5319 = vmatpush1.bf16.msra.mxu0 %v7637_v22  ;;  %5483 = vmatpush1.bf16.msra.mxu1 %v7639_v7  ;;  %v2382_v22 = vld [vmem:[#allocation8 + $0x728] sm:$0xff]  ;;  %v7685_v7 = vcombine.low %v2369_v5, %v2373_v6 }
 0x27e   :  { %5320 = vmatprep.subr.bf16.mxu0 %v7646_v23  ;;  %5484 = vmatprep.subr.bf16.mxu1 %v7648_v8  ;;  %v7687_v23 = vcombine.low %v2370_v11, %v2374_v14  ;;  %v7694_v8 = vcombine.high %v2377_v19, %v2381_v20  ;;  %v7696_v24 = vcombine.high %v2378_v21, %v2382_v22 }
 0x281   :  { %5321 = vmatpush1.bf16.msra.mxu0 %v7645_v28  ;;  %5485 = vmatpush1.bf16.msra.mxu1 %v7647_v30  ;;  %v2390_v28 = vld [vmem:[#allocation8 + $0x768] sm:$0xff]  ;;  %v9106_v30 = vsub.s32 4, %v9043_v49 }
 0x282   :  { %5322 = vmatprep.subr.bf16.mxu0 %v7654_v34  ;;  %5486 = vmatprep.subr.bf16.mxu1 %v7656_v35  ;;  %v7693_v34 = vcombine.low %v2377_v19, %v2381_v20  ;;  %v7695_v35 = vcombine.low %v2378_v21, %v2382_v22  ;;  %v7704_v40 = vcombine.high %v2386_v27, %v2390_v28 }
 0x283   :  { %v460_v59 = vrot.slane %v9048_v50, %v9106_v30  ;;  %v7703_v31 = vcombine.low %v2386_v27, %v2390_v28  ;;  %v1920_v20 = vadd.f32 %v9037_v42, %v464_v39  ;;  %v2425_v39 = vld [vmem:[#allocation8 + $0x880] sm:$0xff] }
 0x285   :  { %5323 = vmatpush1.bf16.msra.mxu0 %v7653_v47  ;;  %5487 = vmatpush1.bf16.msra.mxu1 %v7655_v48  ;;  %v9112_v47 = vsub.s32 6, %v9043_v49  ;;  %v2397_v48 = vld [vmem:[#allocation8 + $0x7a0] sm:$0xff]  ;;  %v9134_v5 = vadd.f32 %v9035_v41, %v460_v59 }
 0x286   :  { %5324 = vmatprep.subr.bf16.mxu0 %v7662_v55  ;;  %5488 = vmatprep.subr.bf16.mxu1 %v7664_v56  ;;  %v2394_v55 = vld [vmem:[#allocation8 + $0x788] sm:$0xff]  ;;  %v7709_v11 = vcombine.low %v2393_v12, %v2397_v48  ;;  %v2417_v59 = vld [vmem:[#allocation8 + $0x840] sm:$0xff] }
 0x287   :  { %v2398_v56 = vld [vmem:[#allocation8 + $0x7a8] sm:$0xff]  ;;  %v468_v49 = vrot.slane %v9048_v50, %v9112_v47  ;;  %v500_v61 = vrot.slane %v9056_v53, %v9112_v47 }
 0x288   :  { %v7711_v14 = vcombine.low %v2394_v55, %v2398_v56 }
 0x289   :  { %5325 = vmatpush1.bf16.msra.mxu0 %v7661_v32  ;;  %5489 = vmatpush1.bf16.msra.mxu1 %v7663_v33  ;;  %v492_v32 = vrot.slane %v9056_v53, %v9106_v30  ;;  %v7710_v33 = vcombine.high %v2393_v12, %v2397_v48 }
 0x28a   :  { %5326 = vmatprep.subr.bf16.mxu0 %v7670_v36  ;;  %5490 = vmatprep.subr.bf16.mxu1 %v7672_v38  ;;  %v7712_v36 = vcombine.high %v2394_v55, %v2398_v56  ;;  %v2401_v38 = vld [vmem:[#allocation8 + $0x7c0] sm:$0xff] }
 0x28b   :  { %v7717_v42 = vcombine.low %v2401_v38, %v2405_v63 }
 0x28d   :  { %5327 = vmatpush1.bf16.msra.mxu0 %v7669_v0  ;;  %5491 = vmatpush1.bf16.msra.mxu1 %v7671_v1  ;;  %v2402_v0 = vld [vmem:[#allocation8 + $0x7c8] sm:$0xff] }
 0x28e   :  { %5328 = vmatprep.subr.bf16.mxu0 %v7678_v2  ;;  %5492 = vmatprep.subr.bf16.mxu1 %v7680_v4  ;;  %v2406_v1 = vld [vmem:[#allocation8 + $0x7e8] sm:$0xff]  ;;  %v472_v2 = vrot.slane %v9048_v50, %v9115_v58  ;;  %v504_v4 = vrot.slane %v9056_v53, %v9115_v58  ;;  %v2409_v50 = vld [vmem:[#allocation8 + $0x800] sm:$0xff]  ;;  %v9140_v53 = vadd.f32 %v9039_v43, %v468_v49 }
 0x28f   :  { %v7720_v19 = vcombine.high %v2402_v0, %v2406_v1  ;;  %v2429_v49 = vld [vmem:[#allocation8 + $0x8a0] sm:$0xff] }
 0x290   :  { %v9145_v25 = vadd.f32 %v9041_v44, %v472_v2  ;;  %v2139_v44 = vmax.f32 %v2131_v3, 0.0 }
 0x291   :  { %5329 = vmatpush1.bf16.msra.mxu0 %v7677_v15  ;;  %5493 = vmatpush1.bf16.msra.mxu1 %v7679_v16 }
 0x292   :  { %5330 = vmatprep.subr.bf16.mxu0 %v7686_v17  ;;  %5494 = vmatprep.subr.bf16.mxu1 %v7688_v18  ;;  %v7718_v18 = vcombine.high %v2401_v38, %v2405_v63  ;;  %v9160_v38 = vpack.c.bf16 %v2139_v44, %v2139_v44 }
 0x295   :  { %5331 = vmatpush1.bf16.msra.mxu0 %v7685_v7  ;;  %5495 = vmatpush1.bf16.msra.mxu1 %v7687_v23  ;;  %v2413_v7 = vld [vmem:[#allocation8 + $0x820] sm:$0xff]  ;;  %v2410_v23 = vld [vmem:[#allocation8 + $0x808] sm:$0xff] }
 0x296   :  { %5332 = vmatprep.subr.bf16.mxu0 %v7694_v8  ;;  %5496 = vmatprep.subr.bf16.mxu1 %v7696_v24  ;;  %v2414_v8 = vld [vmem:[#allocation8 + $0x828] sm:$0xff]  ;;  %v7726_v48 = vcombine.high %v2409_v50, %v2413_v7 }
 0x297   :  { %v7728_v55 = vcombine.high %v2410_v23, %v2414_v8  ;;  %v7727_v9 = vcombine.low %v2410_v23, %v2414_v8 }
 0x299   :  { %5333 = vmatpush1.bf16.msra.mxu0 %v7693_v34  ;;  %5497 = vmatpush1.bf16.msra.mxu1 %v7695_v35 }
 0x29a   :  { %5334 = vmatprep.subr.bf16.mxu0 %v7702_v37  ;;  %5498 = vmatprep.subr.bf16.mxu1 %v7704_v40  ;;  %v7719_v37 = vcombine.low %v2402_v0, %v2406_v1  ;;  %v7742_v1 = vcombine.high %v2425_v39, %v2429_v49 }
 0x29d   :  { %5335 = vmatpush1.bf16.msra.mxu0 %v7701_v60  ;;  %5499 = vmatpush1.bf16.msra.mxu1 %v7703_v31  ;;  %v2081_v6 = vpop.f32.mrb[12].mxu0  ;;  %v2122_v16 = vpop.f32.mrb[12].mxu1  ;;  %v2421_v60 = vld [vmem:[#allocation8 + $0x860] sm:$0xff]  ;;  %v2418_v31 = vld [vmem:[#allocation8 + $0x848] sm:$0xff] }
 0x29e   :  { %v9136_v15 = vadd.f32 %v2081_v6, %v492_v32  ;;  %v2083_v17 = vpop.f32.mrb[13].mxu0  ;;  %5336 = vmatprep.subr.bf16.mxu0 %v7710_v33  ;;  %5500 = vmatprep.subr.bf16.mxu1 %v7712_v36  ;;  %v9142_v41 = vadd.f32 %v2122_v16, %v500_v61  ;;  %v2124_v22 = vpop.f32.mrb[13].mxu1  ;;  %v2422_v32 = vld [vmem:[#allocation8 + $0x868] sm:$0xff]  ;;  %v7725_v36 = vcombine.low %v2409_v50, %v2413_v7  ;;  %v2437_v6 = vld [vmem:[#allocation8 + $0x8e0] sm:$0xff] }
 0x29f   :  { %v2084_v21 = vadd.f32 %v2083_v17, %v496_v62  ;;  %v2085_v24 = vpop.f32.mrb[14].mxu0  ;;  %v9149_v27 = vadd.f32 %v2124_v22, %v504_v4  ;;  %v2126_v43 = vpop.f32.mrb[14].mxu1  ;;  %v7734_v10 = vcombine.high %v2417_v59, %v2421_v60  ;;  %v7736_v3 = vcombine.high %v2418_v31, %v2422_v32  ;;  %v2426_v61 = vld [vmem:[#allocation8 + $0x888] sm:$0xff]  ;;  %v2433_v4 = vld [vmem:[#allocation8 + $0x8c0] sm:$0xff] }
 0x2a0   :  { %v2133_v26 = vmax.f32 %v9134_v5, %v9136_v15  ;;  %v2086_v28 = vpop.f32.mrb[15].mxu0  ;;  %v2135_v34 = vmax.f32 %v9140_v53, %v9142_v41  ;;  %v2127_v40 = vpop.f32.mrb[15].mxu1  ;;  %v2430_v62 = vld [vmem:[#allocation8 + $0x8a8] sm:$0xff]  ;;  %v7733_v63 = vcombine.low %v2417_v59, %v2421_v60  ;;  %v7735_v0 = vcombine.low %v2418_v31, %v2422_v32  ;;  %v2441_v50 = vld [vmem:[#allocation8 + $0x900] sm:$0xff]  ;;  %v2171_v41 = vld [vmem:[#allocation8 + $0x90] sm:$0xff] }
 0x2a1   :  { %v2134_v35 = vmax.f32 %v1920_v20, %v2084_v21  ;;  %5337 = vmatpush1.bf16.msra.mxu0 %v7709_v11  ;;  %5501 = vmatpush1.bf16.msra.mxu1 %v7711_v14  ;;  %v2136_v12 = vmax.f32 %v9145_v25, %v9149_v27  ;;  %v7744_v2 = vcombine.high %v2426_v61, %v2430_v62  ;;  %v2434_v11 = vld [vmem:[#allocation8 + $0x8c8] sm:$0xff]  ;;  %v2445_v20 = vld [vmem:[#allocation8 + $0x920] sm:$0xff] }
 0x2a2   :  { %5338 = vmatprep.subr.bf16.mxu0 %v7718_v18  ;;  %5502 = vmatprep.subr.bf16.mxu1 %v7720_v19  ;;  %v2438_v14 = vld [vmem:[#allocation8 + $0x8e8] sm:$0xff]  ;;  %v7741_v16 = vcombine.low %v2425_v39, %v2429_v49  ;;  %v7743_v17 = vcombine.low %v2426_v61, %v2430_v62  ;;  %v7750_v18 = vcombine.high %v2433_v4, %v2437_v6  ;;  %v2453_v28 = vld [vmem:[#allocation8 + $0x960] sm:$0xff] }
 0x2a3   :  { %v2142_v56 = vmax.f32 %v2134_v35, 0.0  ;;  %v7752_v19 = vcombine.high %v2434_v11, %v2438_v14  ;;  %v2442_v21 = vld [vmem:[#allocation8 + $0x908] sm:$0xff]  ;;  %v7749_v7 = vcombine.low %v2433_v4, %v2437_v6  ;;  %v7751_v23 = vcombine.low %v2434_v11, %v2438_v14 }
 0x2a4   :  { %v2446_v22 = vld [vmem:[#allocation8 + $0x928] sm:$0xff]  ;;  %v7758_v8 = vcombine.high %v2441_v50, %v2445_v20 }
 0x2a5   :  { %v9158_v33 = vpack.c.bf16 %v2142_v56, %v2142_v56  ;;  %5339 = vmatpush1.bf16.msra.mxu0 %v7717_v42  ;;  %5503 = vmatpush1.bf16.msra.mxu1 %v7719_v37  ;;  %v7760_v24 = vcombine.high %v2442_v21, %v2446_v22  ;;  %v2449_v42 = vld [vmem:[#allocation8 + $0x940] sm:$0xff]  ;;  %v2450_v43 = vld [vmem:[#allocation8 + $0x948] sm:$0xff]  ;;  %v7757_v37 = vcombine.low %v2441_v50, %v2445_v20 }
 0x2a6   :  { %5349 = vmatprep.subr.bf16.mxu0 %v7726_v48  ;;  %5513 = vmatprep.subr.bf16.mxu1 %v7728_v55  ;;  %v2454_v35 = vld [vmem:[#allocation8 + $0x968] sm:$0xff]  ;;  %v7759_v40 = vcombine.low %v2442_v21, %v2446_v22  ;;  %v7766_v44 = vcombine.high %v2449_v42, %v2453_v28  ;;  %v2457_v55 = vld [vmem:[#allocation8 + $0x980] sm:$0xff]  ;;  %v7765_v31 = vcombine.low %v2449_v42, %v2453_v28 }
 0x2a7   :  { %v7768_v48 = vcombine.high %v2450_v43, %v2454_v35  ;;  %v2461_v56 = vld [vmem:[#allocation8 + $0x9a0] sm:$0xff]  ;;  %v2458_v59 = vld [vmem:[#allocation8 + $0x988] sm:$0xff]  ;;  %v7767_v32 = vcombine.low %v2450_v43, %v2454_v35 }
 0x2a8   :  { %5341 = vmatmul.mubr.bf16.vlgmr.msra.gmra.mrb[16].mxu0 %v9160_v38  ;;  %5505 = vmatmul.mubr.bf16.vlgmr.msra.gmra.mrb[16].mxu1 %v9160_v38  ;;  %v2462_v60 = vld [vmem:[#allocation8 + $0x9a8] sm:$0xff]  ;;  %v7773_v61 = vcombine.low %v2457_v55, %v2461_v56 }
 0x2a9   :  { %5350 = vmatpush1.bf16.msra.mxu0 %v7725_v36  ;;  %5381 = vmatprep.mubr.bf16.mxu0 %v9158_v33  ;;  %v7774_v36 = vcombine.high %v2457_v55, %v2461_v56  ;;  %v2466_v39 = vld [vmem:[#allocation8 + $0x9c8] sm:$0xff]  ;;  %v7775_v62 = vcombine.low %v2458_v59, %v2462_v60 }
 0x2aa   :  { %5514 = vmatpush1.bf16.msra.mxu1 %v7727_v9  ;;  %5545 = vmatprep.mubr.bf16.mxu1 %v9158_v33  ;;  %v7776_v9 = vcombine.high %v2458_v59, %v2462_v60  ;;  %v2470_v49 = vld [vmem:[#allocation8 + $0x9e8] sm:$0xff] }
 0x2ab   :  { %5351 = vmatprep.subr.bf16.mxu0 %v7734_v10  ;;  %5515 = vmatprep.subr.bf16.mxu1 %v7736_v3  ;;  %v2465_v10 = vld [vmem:[#allocation8 + $0x9c0] sm:$0xff]  ;;  %v2474_v4 = vld [vmem:[#allocation8 + $0xa08] sm:$0xff]  ;;  %v7783_v14 = vcombine.low %v2466_v39, %v2470_v49 }
 0x2ac   :  { %v2469_v3 = vld [vmem:[#allocation8 + $0x9e0] sm:$0xff]  ;;  %v2478_v6 = vld [vmem:[#allocation8 + $0xa28] sm:$0xff] }
 0x2ad   :  { %5352 = vmatpush1.bf16.msra.mxu0 %v7733_v63  ;;  %v7782_v63 = vcombine.high %v2465_v10, %v2469_v3  ;;  %v7781_v11 = vcombine.low %v2465_v10, %v2469_v3  ;;  %v2482_v50 = vld [vmem:[#allocation8 + $0xa48] sm:$0xff]  ;;  %v7791_v22 = vcombine.low %v2474_v4, %v2478_v6 }
 0x2ae   :  { %5516 = vmatpush1.bf16.msra.mxu1 %v7735_v0  ;;  %5353 = vmatprep.subr.bf16.mxu0 %v7742_v1  ;;  %v7784_v0 = vcombine.high %v2466_v39, %v2470_v49  ;;  %v2473_v1 = vld [vmem:[#allocation8 + $0xa00] sm:$0xff]  ;;  %v2486_v20 = vld [vmem:[#allocation8 + $0xa68] sm:$0xff] }
 0x2af   :  { %5517 = vmatprep.subr.bf16.mxu1 %v7744_v2  ;;  %v2477_v2 = vld [vmem:[#allocation8 + $0xa20] sm:$0xff]  ;;  %v2490_v42 = vld [vmem:[#allocation8 + $0xa88] sm:$0xff]  ;;  %v7799_v35 = vcombine.low %v2482_v50, %v2486_v20 }
 0x2b0   :  { %v7789_v21 = vcombine.low %v2473_v1, %v2477_v2  ;;  %v2494_v28 = vld [vmem:[#allocation8 + $0xaa8] sm:$0xff] }
 0x2b1   :  { %5354 = vmatpush1.bf16.msra.mxu0 %v7741_v16  ;;  %v7790_v16 = vcombine.high %v2473_v1, %v2477_v2  ;;  %v2498_v55 = vld [vmem:[#allocation8 + $0xac8] sm:$0xff]  ;;  %v7807_v60 = vcombine.low %v2490_v42, %v2494_v28 }
 0x2b2   :  { %5518 = vmatpush1.bf16.msra.mxu1 %v7743_v17  ;;  %5355 = vmatprep.subr.bf16.mxu0 %v7750_v18  ;;  %v7792_v17 = vcombine.high %v2474_v4, %v2478_v6  ;;  %v2481_v18 = vld [vmem:[#allocation8 + $0xa40] sm:$0xff]  ;;  %v2502_v56 = vld [vmem:[#allocation8 + $0xae8] sm:$0xff] }
 0x2b3   :  { %5519 = vmatprep.subr.bf16.mxu1 %v7752_v19  ;;  %v2485_v19 = vld [vmem:[#allocation8 + $0xa60] sm:$0xff]  ;;  %v2506_v10 = vld [vmem:[#allocation8 + $0xb08] sm:$0xff]  ;;  %v7815_v49 = vcombine.low %v2498_v55, %v2502_v56 }
 0x2b4   :  { %v7797_v43 = vcombine.low %v2481_v18, %v2485_v19  ;;  %v2510_v3 = vld [vmem:[#allocation8 + $0xb28] sm:$0xff] }
 0x2b5   :  { %5356 = vmatpush1.bf16.msra.mxu0 %v7749_v7  ;;  %v7798_v7 = vcombine.high %v2481_v18, %v2485_v19  ;;  %v2514_v1 = vld [vmem:[#allocation8 + $0xb48] sm:$0xff]  ;;  %v7823_v6 = vcombine.low %v2506_v10, %v2510_v3 }
 0x2b6   :  { %5520 = vmatpush1.bf16.msra.mxu1 %v7751_v23  ;;  %5357 = vmatprep.subr.bf16.mxu0 %v7758_v8  ;;  %v7800_v23 = vcombine.high %v2482_v50, %v2486_v20  ;;  %v2489_v8 = vld [vmem:[#allocation8 + $0xa80] sm:$0xff]  ;;  %v2518_v2 = vld [vmem:[#allocation8 + $0xb68] sm:$0xff] }
 0x2b7   :  { %5521 = vmatprep.subr.bf16.mxu1 %v7760_v24  ;;  %v2493_v24 = vld [vmem:[#allocation8 + $0xaa0] sm:$0xff]  ;;  %v2522_v18 = vld [vmem:[#allocation8 + $0xb88] sm:$0xff]  ;;  %v7831_v20 = vcombine.low %v2514_v1, %v2518_v2 }
 0x2b8   :  { %v7805_v59 = vcombine.low %v2489_v8, %v2493_v24  ;;  %v2526_v19 = vld [vmem:[#allocation8 + $0xba8] sm:$0xff] }
 0x2b9   :  { %5358 = vmatpush1.bf16.msra.mxu0 %v7757_v37  ;;  %v7806_v37 = vcombine.high %v2489_v8, %v2493_v24  ;;  %v2530_v8 = vld [vmem:[#allocation8 + $0xbc8] sm:$0xff] }
 0x2ba   :  { %5522 = vmatpush1.bf16.msra.mxu1 %v7759_v40  ;;  %5359 = vmatprep.subr.bf16.mxu0 %v7766_v44  ;;  %v7808_v40 = vcombine.high %v2490_v42, %v2494_v28  ;;  %v2497_v44 = vld [vmem:[#allocation8 + $0xac0] sm:$0xff]  ;;  %v2534_v24 = vld [vmem:[#allocation8 + $0xbe8] sm:$0xff]  ;;  %v7839_v28 = vcombine.low %v2522_v18, %v2526_v19 }
 0x2bb   :  { %5523 = vmatprep.subr.bf16.mxu1 %v7768_v48  ;;  %v2501_v48 = vld [vmem:[#allocation8 + $0xae0] sm:$0xff]  ;;  %v2554_v27 = vld [vmem:[#allocation8 + $0xc88] sm:$0xff] }
 0x2bc   :  { %v7813_v39 = vcombine.low %v2497_v44, %v2501_v48 }
 0x2bd   :  { %5360 = vmatpush1.bf16.msra.mxu0 %v7765_v31  ;;  %v7814_v31 = vcombine.high %v2497_v44, %v2501_v48  ;;  %v2538_v44 = vld [vmem:[#allocation8 + $0xc08] sm:$0xff] }
 0x2be   :  { %5524 = vmatpush1.bf16.msra.mxu1 %v7767_v32  ;;  %5361 = vmatprep.subr.bf16.mxu0 %v7774_v36  ;;  %v7816_v32 = vcombine.high %v2498_v55, %v2502_v56  ;;  %v2505_v36 = vld [vmem:[#allocation8 + $0xb00] sm:$0xff]  ;;  %v2542_v48 = vld [vmem:[#allocation8 + $0xc28] sm:$0xff]  ;;  %v2141_v56 = vmax.f32 %v2133_v26, 0.0 }
 0x2bf   :  { %5525 = vmatprep.subr.bf16.mxu1 %v7776_v9  ;;  %v2509_v9 = vld [vmem:[#allocation8 + $0xb20] sm:$0xff]  ;;  %v7855_v5 = vcombine.low %v2538_v44, %v2542_v48 }
 0x2c0   :  { %v7821_v4 = vcombine.low %v2505_v36, %v2509_v9  ;;  %v2553_v26 = vld [vmem:[#allocation8 + $0xc80] sm:$0xff] }
 0x2c1   :  { %5362 = vmatpush1.bf16.msra.mxu0 %v7773_v61  ;;  %v7822_v61 = vcombine.high %v2505_v36, %v2509_v9  ;;  %v2545_v36 = vld [vmem:[#allocation8 + $0xc40] sm:$0xff] }
 0x2c2   :  { %5526 = vmatpush1.bf16.msra.mxu1 %v7775_v62  ;;  %5363 = vmatprep.subr.bf16.mxu0 %v7782_v63  ;;  %v7824_v62 = vcombine.high %v2506_v10, %v2510_v3  ;;  %v2513_v63 = vld [vmem:[#allocation8 + $0xb40] sm:$0xff]  ;;  %v2546_v3 = vld [vmem:[#allocation8 + $0xc48] sm:$0xff] }
 0x2c3   :  { %5527 = vmatprep.subr.bf16.mxu1 %v7784_v0  ;;  %v2517_v0 = vld [vmem:[#allocation8 + $0xb60] sm:$0xff] }
 0x2c4   :  { %v7829_v50 = vcombine.low %v2513_v63, %v2517_v0  ;;  %v2549_v9 = vld [vmem:[#allocation8 + $0xc60] sm:$0xff] }
 0x2c5   :  { %5364 = vmatpush1.bf16.msra.mxu0 %v7781_v11  ;;  %v7830_v11 = vcombine.high %v2513_v63, %v2517_v0  ;;  %v7862_v15 = vcombine.high %v2545_v36, %v2549_v9  ;;  %v7861_v63 = vcombine.low %v2545_v36, %v2549_v9 }
 0x2c6   :  { %5528 = vmatpush1.bf16.msra.mxu1 %v7783_v14  ;;  %5365 = vmatprep.subr.bf16.mxu0 %v7790_v16  ;;  %v7832_v14 = vcombine.high %v2514_v1, %v2518_v2  ;;  %v2521_v16 = vld [vmem:[#allocation8 + $0xb80] sm:$0xff] }
 0x2c7   :  { %5529 = vmatprep.subr.bf16.mxu1 %v7792_v17  ;;  %v2525_v17 = vld [vmem:[#allocation8 + $0xba0] sm:$0xff] }
 0x2c8   :  { %v7837_v42 = vcombine.low %v2521_v16, %v2525_v17 }
 0x2c9   :  { %5366 = vmatpush1.bf16.msra.mxu0 %v7789_v21  ;;  %v7838_v21 = vcombine.high %v2521_v16, %v2525_v17 }
 0x2ca   :  { %5530 = vmatpush1.bf16.msra.mxu1 %v7791_v22  ;;  %5367 = vmatprep.subr.bf16.mxu0 %v7798_v7  ;;  %v7840_v22 = vcombine.high %v2522_v18, %v2526_v19  ;;  %v2529_v7 = vld [vmem:[#allocation8 + $0xbc0] sm:$0xff] }
 0x2cb   :  { %5531 = vmatprep.subr.bf16.mxu1 %v7800_v23  ;;  %v2533_v23 = vld [vmem:[#allocation8 + $0xbe0] sm:$0xff] }
 0x2cc   :  { %v7845_v55 = vcombine.low %v2529_v7, %v2533_v23 }
 0x2cd   :  { %5368 = vmatpush1.bf16.msra.mxu0 %v7797_v43  ;;  %v7846_v43 = vcombine.high %v2529_v7, %v2533_v23 }
 0x2ce   :  { %5532 = vmatpush1.bf16.msra.mxu1 %v7799_v35  ;;  %5369 = vmatprep.subr.bf16.mxu0 %v7806_v37  ;;  %v7848_v35 = vcombine.high %v2530_v8, %v2534_v24  ;;  %v2537_v37 = vld [vmem:[#allocation8 + $0xc00] sm:$0xff] }
 0x2cf   :  { %5533 = vmatprep.subr.bf16.mxu1 %v7808_v40  ;;  %v2541_v40 = vld [vmem:[#allocation8 + $0xc20] sm:$0xff] }
 0x2d0   :  { %v7853_v10 = vcombine.low %v2537_v37, %v2541_v40 }
 0x2d1   :  { %5370 = vmatpush1.bf16.msra.mxu0 %v7805_v59  ;;  %v7847_v59 = vcombine.low %v2530_v8, %v2534_v24 }
 0x2d2   :  { %5534 = vmatpush1.bf16.msra.mxu1 %v7807_v60  ;;  %5371 = vmatprep.subr.bf16.mxu0 %v7814_v31  ;;  %v7854_v60 = vcombine.high %v2537_v37, %v2541_v40  ;;  %v7856_v31 = vcombine.high %v2538_v44, %v2542_v48 }
 0x2d3   :  { %5535 = vmatprep.subr.bf16.mxu1 %v7816_v32  ;;  %v2144_v32 = vmax.f32 %v2136_v12, 0.0  ;;  %v2558_v12 = vld [vmem:[#allocation8 + $0xca8] sm:$0xff] }
 0x2d4   :  { %v7872_v2 = vcombine.high %v2554_v27, %v2558_v12  ;;  %v7871_v17 = vcombine.low %v2554_v27, %v2558_v12  ;;  %v2601_v27 = vld [vmem:[#allocation8 + $0xe00] sm:$0xff] }
 0x2d5   :  { %5372 = vmatpush1.bf16.msra.mxu0 %v7813_v39  ;;  %v2550_v39 = vld [vmem:[#allocation8 + $0xc68] sm:$0xff]  ;;  %v2605_v12 = vld [vmem:[#allocation8 + $0xe20] sm:$0xff] }
 0x2d6   :  { %5536 = vmatpush1.bf16.msra.mxu1 %v7815_v49  ;;  %5373 = vmatprep.subr.bf16.mxu0 %v7822_v61  ;;  %v9172_v49 = vpack.c.bf16 %v2141_v56, %v2141_v56  ;;  %v2557_v61 = vld [vmem:[#allocation8 + $0xca0] sm:$0xff]  ;;  %v7864_v25 = vcombine.high %v2546_v3, %v2550_v39  ;;  %v7863_v0 = vcombine.low %v2546_v3, %v2550_v39  ;;  %v2594_v39 = vld [vmem:[#allocation8 + $0xdc8] sm:$0xff] }
 0x2d7   :  { %5537 = vmatprep.subr.bf16.mxu1 %v7824_v62  ;;  %v9174_v62 = vpack.c.bf16 %v2144_v32, %v2144_v32  ;;  %v7870_v1 = vcombine.high %v2553_v26, %v2557_v61  ;;  %v7869_v16 = vcombine.low %v2553_v26, %v2557_v61  ;;  %v2589_v56 = vld [vmem:[#allocation8 + $0xda0] sm:$0xff] }
 0x2d8   :  { %v2597_v3 = vld [vmem:[#allocation8 + $0xde0] sm:$0xff] }
 0x2d9   :  { %5374 = vmatpush1.bf16.msra.mxu0 %v7821_v4  ;;  %v2561_v4 = vld [vmem:[#allocation8 + $0xcc0] sm:$0xff] }
 0x2da   :  { %5538 = vmatpush1.bf16.msra.mxu1 %v7823_v6  ;;  %5375 = vmatprep.subr.bf16.mxu0 %v7830_v11  ;;  %v2565_v6 = vld [vmem:[#allocation8 + $0xce0] sm:$0xff]  ;;  %v2562_v11 = vld [vmem:[#allocation8 + $0xcc8] sm:$0xff] }
 0x2db   :  { %5539 = vmatprep.subr.bf16.mxu1 %v7832_v14  ;;  %v2566_v14 = vld [vmem:[#allocation8 + $0xce8] sm:$0xff]  ;;  %v7878_v18 = vcombine.high %v2561_v4, %v2565_v6  ;;  %v7877_v7 = vcombine.low %v2561_v4, %v2565_v6  ;;  %v7918_v4 = vcombine.high %v2601_v27, %v2605_v12 }
 0x2dc   :  { %v7880_v19 = vcombine.high %v2562_v11, %v2566_v14  ;;  %v7879_v23 = vcombine.low %v2562_v11, %v2566_v14  ;;  %v2609_v11 = vld [vmem:[#allocation8 + $0xe40] sm:$0xff] }
 0x2dd   :  { %5376 = vmatpush1.bf16.msra.mxu0 %v7829_v50  ;;  %v2569_v50 = vld [vmem:[#allocation8 + $0xd00] sm:$0xff] }
 0x2de   :  { %5540 = vmatpush1.bf16.msra.mxu1 %v7831_v20  ;;  %5377 = vmatprep.subr.bf16.mxu0 %v7838_v21  ;;  %v2573_v20 = vld [vmem:[#allocation8 + $0xd20] sm:$0xff]  ;;  %v2570_v21 = vld [vmem:[#allocation8 + $0xd08] sm:$0xff] }
 0x2df   :  { %5541 = vmatprep.subr.bf16.mxu1 %v7840_v22  ;;  %v2574_v22 = vld [vmem:[#allocation8 + $0xd28] sm:$0xff]  ;;  %v7886_v8 = vcombine.high %v2569_v50, %v2573_v20  ;;  %v7885_v37 = vcombine.low %v2569_v50, %v2573_v20  ;;  %v2613_v14 = vld [vmem:[#allocation8 + $0xe60] sm:$0xff] }
 0x2e0   :  { %v7888_v24 = vcombine.high %v2570_v21, %v2574_v22  ;;  %v7887_v40 = vcombine.low %v2570_v21, %v2574_v22  ;;  %v7926_v50 = vcombine.high %v2609_v11, %v2613_v14  ;;  %v2617_v21 = vld [vmem:[#allocation8 + $0xe80] sm:$0xff] }
 0x2e1   :  { %5378 = vmatpush1.bf16.msra.mxu0 %v7837_v42  ;;  %v2577_v42 = vld [vmem:[#allocation8 + $0xd40] sm:$0xff] }
 0x2e2   :  { %5542 = vmatpush1.bf16.msra.mxu1 %v7839_v28  ;;  %5379 = vmatprep.subr.bf16.mxu0 %v7846_v43  ;;  %v2581_v28 = vld [vmem:[#allocation8 + $0xd60] sm:$0xff]  ;;  %v2578_v43 = vld [vmem:[#allocation8 + $0xd48] sm:$0xff] }
 0x2e3   :  { %5543 = vmatprep.subr.bf16.mxu1 %v7848_v35  ;;  %v2582_v35 = vld [vmem:[#allocation8 + $0xd68] sm:$0xff]  ;;  %v7894_v44 = vcombine.high %v2577_v42, %v2581_v28  ;;  %v2621_v22 = vld [vmem:[#allocation8 + $0xea0] sm:$0xff] }
 0x2e4   :  { %v7896_v48 = vcombine.high %v2578_v43, %v2582_v35  ;;  %v7895_v32 = vcombine.low %v2578_v43, %v2582_v35  ;;  %v2625_v43 = vld [vmem:[#allocation8 + $0xec0] sm:$0xff] }
 0x2e5   :  { %5380 = vmatpush1.bf16.msra.mxu0 %v7845_v55  ;;  %v2585_v55 = vld [vmem:[#allocation8 + $0xd80] sm:$0xff] }
 0x2e6   :  { %5544 = vmatpush1.bf16.msra.mxu1 %v7847_v59  ;;  %5390 = vmatprep.subr.bf16.mxu0 %v7854_v60  ;;  %v2586_v59 = vld [vmem:[#allocation8 + $0xd88] sm:$0xff]  ;;  %v7902_v36 = vcombine.high %v2585_v55, %v2589_v56  ;;  %v2629_v35 = vld [vmem:[#allocation8 + $0xee0] sm:$0xff] }
 0x2e7   :  { %5554 = vmatprep.subr.bf16.mxu1 %v7856_v31  ;;  %v2590_v60 = vld [vmem:[#allocation8 + $0xda8] sm:$0xff]  ;;  %v7893_v31 = vcombine.low %v2577_v42, %v2581_v28  ;;  %v7934_v42 = vcombine.high %v2617_v21, %v2621_v22 }
 0x2e8   :  { %5382 = vmatmul.mubr.bf16.vlgmr.msra.gmra.mrb[16].mxu0 %v9172_v49  ;;  %v7904_v9 = vcombine.high %v2586_v59, %v2590_v60  ;;  %v7903_v26 = vcombine.low %v2586_v59, %v2590_v60  ;;  %v2633_v59 = vld [vmem:[#allocation8 + $0xf00] sm:$0xff] }
 0x2e9   :  { %5546 = vmatmul.mubr.bf16.vlgmr.msra.gmra.mrb[16].mxu1 %v9172_v49  ;;  %5391 = vmatpush1.bf16.msra.mxu0 %v7853_v10  ;;  %v2593_v10 = vld [vmem:[#allocation8 + $0xdc0] sm:$0xff] }
 0x2ea   :  { %5422 = vmatprep.mubr.bf16.mxu0 %v9174_v62  ;;  %5555 = vmatpush1.bf16.msra.mxu1 %v7855_v5  ;;  %v2598_v5 = vld [vmem:[#allocation8 + $0xde8] sm:$0xff]  ;;  %v7910_v61 = vcombine.high %v2593_v10, %v2597_v3  ;;  %v2637_v60 = vld [vmem:[#allocation8 + $0xf20] sm:$0xff] }
 0x2eb   :  { %5586 = vmatprep.mubr.bf16.mxu1 %v9174_v62  ;;  %5392 = vmatprep.subr.bf16.mxu0 %v7862_v15  ;;  %v7901_v15 = vcombine.low %v2585_v55, %v2589_v56  ;;  %v7942_v55 = vcombine.high %v2625_v43, %v2629_v35 }
 0x2ec   :  { %5556 = vmatprep.subr.bf16.mxu1 %v7864_v25  ;;  %v7912_v25 = vcombine.high %v2594_v39, %v2598_v5 }
 0x2ed   :  { %5393 = vmatpush1.bf16.msra.mxu0 %v7861_v63  ;;  %v2602_v63 = vld [vmem:[#allocation8 + $0xe08] sm:$0xff] }
 0x2ee   :  { %5557 = vmatpush1.bf16.msra.mxu1 %v7863_v0  ;;  %5394 = vmatprep.subr.bf16.mxu0 %v7870_v1  ;;  %v2606_v0 = vld [vmem:[#allocation8 + $0xe28] sm:$0xff]  ;;  %v7909_v1 = vcombine.low %v2593_v10, %v2597_v3  ;;  %v7950_v10 = vcombine.high %v2633_v59, %v2637_v60 }
 0x2ef   :  { %5558 = vmatprep.subr.bf16.mxu1 %v7872_v2  ;;  %v7911_v2 = vcombine.low %v2594_v39, %v2598_v5  ;;  %v7920_v6 = vcombine.high %v2602_v63, %v2606_v0  ;;  %v2641_v39 = vld [vmem:[#allocation8 + $0xf40] sm:$0xff] }
 0x2f0   :  { %v2645_v5 = vld [vmem:[#allocation8 + $0xf60] sm:$0xff] }
 0x2f1   :  { %5395 = vmatpush1.bf16.msra.mxu0 %v7869_v16  ;;  %v2610_v16 = vld [vmem:[#allocation8 + $0xe48] sm:$0xff] }
 0x2f2   :  { %5559 = vmatpush1.bf16.msra.mxu1 %v7871_v17  ;;  %5396 = vmatprep.subr.bf16.mxu0 %v7878_v18  ;;  %v2614_v17 = vld [vmem:[#allocation8 + $0xe68] sm:$0xff]  ;;  %v7917_v18 = vcombine.low %v2601_v27, %v2605_v12  ;;  %v7958_v27 = vcombine.high %v2641_v39, %v2645_v5 }
 0x2f3   :  { %5560 = vmatprep.subr.bf16.mxu1 %v7880_v19  ;;  %v7919_v19 = vcombine.low %v2602_v63, %v2606_v0  ;;  %v7928_v20 = vcombine.high %v2610_v16, %v2614_v17  ;;  %v2649_v63 = vld [vmem:[#allocation8 + $0xf80] sm:$0xff] }
 0x2f4   :  { %v2653_v0 = vld [vmem:[#allocation8 + $0xfa0] sm:$0xff] }
 0x2f5   :  { %5397 = vmatpush1.bf16.msra.mxu0 %v7877_v7  ;;  %v2618_v7 = vld [vmem:[#allocation8 + $0xe88] sm:$0xff] }
 0x2f6   :  { %5561 = vmatpush1.bf16.msra.mxu1 %v7879_v23  ;;  %5398 = vmatprep.subr.bf16.mxu0 %v7886_v8  ;;  %v2622_v23 = vld [vmem:[#allocation8 + $0xea8] sm:$0xff]  ;;  %v7925_v8 = vcombine.low %v2609_v11, %v2613_v14  ;;  %v7966_v11 = vcombine.high %v2649_v63, %v2653_v0 }
 0x2f7   :  { %5562 = vmatprep.subr.bf16.mxu1 %v7888_v24  ;;  %v7927_v24 = vcombine.low %v2610_v16, %v2614_v17  ;;  %v7936_v28 = vcombine.high %v2618_v7, %v2622_v23  ;;  %v2657_v16 = vld [vmem:[#allocation8 + $0xfc0] sm:$0xff] }
 0x2f8   :  { %v2661_v17 = vld [vmem:[#allocation8 + $0xfe0] sm:$0xff] }
 0x2f9   :  { %5399 = vmatpush1.bf16.msra.mxu0 %v7885_v37  ;;  %v2626_v37 = vld [vmem:[#allocation8 + $0xec8] sm:$0xff] }
 0x2fa   :  { %5563 = vmatpush1.bf16.msra.mxu1 %v7887_v40  ;;  %5400 = vmatprep.subr.bf16.mxu0 %v7894_v44  ;;  %v2630_v40 = vld [vmem:[#allocation8 + $0xee8] sm:$0xff]  ;;  %v7933_v44 = vcombine.low %v2617_v21, %v2621_v22  ;;  %v7974_v21 = vcombine.high %v2657_v16, %v2661_v17 }
 0x2fb   :  { %5564 = vmatprep.subr.bf16.mxu1 %v7896_v48  ;;  %v7935_v48 = vcombine.low %v2618_v7, %v2622_v23  ;;  %v7944_v56 = vcombine.high %v2626_v37, %v2630_v40  ;;  %v2155_v7 = vld [vmem:[#allocation8 + $0x10] sm:$0xff] }
 0x2fc   :  { %v2159_v23 = vld [vmem:[#allocation8 + $0x30] sm:$0xff] }
 0x2fd   :  { %5401 = vmatpush1.bf16.msra.mxu0 %v7893_v31  ;;  %v2634_v31 = vld [vmem:[#allocation8 + $0xf08] sm:$0xff] }
 0x2fe   :  { %5565 = vmatpush1.bf16.msra.mxu1 %v7895_v32  ;;  %5402 = vmatprep.subr.bf16.mxu0 %v7902_v36  ;;  %v2638_v32 = vld [vmem:[#allocation8 + $0xf28] sm:$0xff]  ;;  %v7941_v36 = vcombine.low %v2625_v43, %v2629_v35  ;;  %v7474_v35 = vcombine.high %v2155_v7, %v2159_v23 }
 0x2ff   :  { %5566 = vmatprep.subr.bf16.mxu1 %v7904_v9  ;;  %v7943_v9 = vcombine.low %v2626_v37, %v2630_v40  ;;  %v7952_v3 = vcombine.high %v2634_v31, %v2638_v32  ;;  %v2163_v40 = vld [vmem:[#allocation8 + $0x50] sm:$0xff] }
 0x301   :  { %5403 = vmatpush1.bf16.msra.mxu0 %v7901_v15  ;;  %v2642_v15 = vld [vmem:[#allocation8 + $0xf48] sm:$0xff] }
 0x302   :  { %5567 = vmatpush1.bf16.msra.mxu1 %v7903_v26  ;;  %5404 = vmatprep.subr.bf16.mxu0 %v7910_v61  ;;  %v2646_v26 = vld [vmem:[#allocation8 + $0xf68] sm:$0xff]  ;;  %v7949_v61 = vcombine.low %v2633_v59, %v2637_v60 }
 0x303   :  { %5568 = vmatprep.subr.bf16.mxu1 %v7912_v25  ;;  %v7951_v25 = vcombine.low %v2634_v31, %v2638_v32  ;;  %v7960_v12 = vcombine.high %v2642_v15, %v2646_v26  ;;  %v2172_v32 = vld [vmem:[#allocation8 + $0x98] sm:$0xff] }
 0x305   :  { %5405 = vmatpush1.bf16.msra.mxu0 %v7909_v1  ;;  %v2650_v1 = vld [vmem:[#allocation8 + $0xf88] sm:$0xff] }
 0x306   :  { %5569 = vmatpush1.bf16.msra.mxu1 %v7911_v2  ;;  %5406 = vmatprep.subr.bf16.mxu0 %v7918_v4  ;;  %v2654_v2 = vld [vmem:[#allocation8 + $0xfa8] sm:$0xff]  ;;  %v7957_v4 = vcombine.low %v2641_v39, %v2645_v5  ;;  %v2179_v5 = vld [vmem:[#allocation8 + $0xd0] sm:$0xff] }
 0x307   :  { %5570 = vmatprep.subr.bf16.mxu1 %v7920_v6  ;;  %v7959_v6 = vcombine.low %v2642_v15, %v2646_v26  ;;  %v7968_v14 = vcombine.high %v2650_v1, %v2654_v2  ;;  %v2183_v15 = vld [vmem:[#allocation8 + $0xf0] sm:$0xff]  ;;  %v2180_v26 = vld [vmem:[#allocation8 + $0xd8] sm:$0xff] }
 0x309   :  { %5407 = vmatpush1.bf16.msra.mxu0 %v7917_v18  ;;  %v2658_v18 = vld [vmem:[#allocation8 + $0xfc8] sm:$0xff] }
 0x30a   :  { %5571 = vmatpush1.bf16.msra.mxu1 %v7919_v19  ;;  %5408 = vmatprep.subr.bf16.mxu0 %v7926_v50  ;;  %v2662_v19 = vld [vmem:[#allocation8 + $0xfe8] sm:$0xff]  ;;  %v7965_v50 = vcombine.low %v2649_v63, %v2653_v0  ;;  %v2187_v0 = vld [vmem:[#allocation8 + $0x110] sm:$0xff] }
 0x30b   :  { %5572 = vmatprep.subr.bf16.mxu1 %v7928_v20  ;;  %v7967_v20 = vcombine.low %v2650_v1, %v2654_v2  ;;  %v7976_v22 = vcombine.high %v2658_v18, %v2662_v19  ;;  %v7975_v43 = vcombine.low %v2658_v18, %v2662_v19  ;;  %v2191_v1 = vld [vmem:[#allocation8 + $0x130] sm:$0xff]  ;;  %v2188_v2 = vld [vmem:[#allocation8 + $0x118] sm:$0xff] }
 0x30c   :  { %v2196_v18 = vld [vmem:[#allocation8 + $0x158] sm:$0xff] }
 0x30d   :  { %5409 = vmatpush1.bf16.msra.mxu0 %v7925_v8  ;;  %v2156_v8 = vld [vmem:[#allocation8 + $0x18] sm:$0xff] }
 0x30e   :  { %5573 = vmatpush1.bf16.msra.mxu1 %v7927_v24  ;;  %5410 = vmatprep.subr.bf16.mxu0 %v7934_v42  ;;  %v2160_v24 = vld [vmem:[#allocation8 + $0x38] sm:$0xff]  ;;  %v7973_v42 = vcombine.low %v2657_v16, %v2661_v17  ;;  %v2195_v16 = vld [vmem:[#allocation8 + $0x150] sm:$0xff] }
 0x30f   :  { %5574 = vmatprep.subr.bf16.mxu1 %v7936_v28  ;;  %v2143_v28 = vmax.f32 %v2135_v34, 0.0  ;;  %v7476_v37 = vcombine.high %v2156_v8, %v2160_v24  ;;  %v7475_v60 = vcombine.low %v2156_v8, %v2160_v24  ;;  %v2175_v34 = vld [vmem:[#allocation8 + $0xb0] sm:$0xff]  ;;  %v2200_v19 = vld [vmem:[#allocation8 + $0x178] sm:$0xff] }
 0x310   :  { %v2199_v17 = vld [vmem:[#allocation8 + $0x170] sm:$0xff]  ;;  %v2204_v8 = vld [vmem:[#allocation8 + $0x198] sm:$0xff] }
 0x311   :  { %5411 = vmatpush1.bf16.msra.mxu0 %v7933_v44  ;;  %v2167_v44 = vld [vmem:[#allocation8 + $0x70] sm:$0xff]  ;;  %v9183_v59 = vpack.c.bf16 %v2143_v28, %v2143_v28  ;;  %v2208_v24 = vld [vmem:[#allocation8 + $0x1b8] sm:$0xff]  ;;  %v7515_v28 = vcombine.low %v2196_v18, %v2200_v19 }
 0x312   :  { %5575 = vmatpush1.bf16.msra.mxu1 %v7935_v48  ;;  %5412 = vmatprep.subr.bf16.mxu0 %v7942_v55  ;;  %v7473_v48 = vcombine.low %v2155_v7, %v2159_v23  ;;  %v2164_v55 = vld [vmem:[#allocation8 + $0x58] sm:$0xff]  ;;  %v7482_v53 = vcombine.high %v2163_v40, %v2167_v44  ;;  %v2203_v7 = vld [vmem:[#allocation8 + $0x190] sm:$0xff] }
 0x313   :  { %5576 = vmatprep.subr.bf16.mxu1 %v7944_v56  ;;  %v2168_v56 = vld [vmem:[#allocation8 + $0x78] sm:$0xff]  ;;  %v2207_v23 = vld [vmem:[#allocation8 + $0x1b0] sm:$0xff] }
 0x314   :  { %v7484_v31 = vcombine.high %v2164_v55, %v2168_v56 }
 0x315   :  { %5413 = vmatpush1.bf16.msra.mxu0 %v7941_v36  ;;  %v2176_v36 = vld [vmem:[#allocation8 + $0xb8] sm:$0xff] }
 0x316   :  { %5577 = vmatpush1.bf16.msra.mxu1 %v7943_v9  ;;  %5414 = vmatprep.subr.bf16.mxu0 %v7950_v10  ;;  %v7481_v9 = vcombine.low %v2163_v40, %v2167_v44  ;;  %v7483_v10 = vcombine.low %v2164_v55, %v2168_v56  ;;  %v7492_v39 = vcombine.high %v2172_v32, %v2176_v36  ;;  %v2215_v40 = vld [vmem:[#allocation8 + $0x1f0] sm:$0xff]  ;;  %v2212_v44 = vld [vmem:[#allocation8 + $0x1d8] sm:$0xff] }
 0x317   :  { %5578 = vmatprep.subr.bf16.mxu1 %v7952_v3  ;;  %v7490_v3 = vcombine.high %v2171_v41, %v2175_v34  ;;  %v7521_v55 = vcombine.low %v2203_v7, %v2207_v23  ;;  %v7523_v56 = vcombine.low %v2204_v8, %v2208_v24 }
 0x319   :  { %5415 = vmatpush1.bf16.msra.mxu0 %v7949_v61  ;;  %v2184_v61 = vld [vmem:[#allocation8 + $0xf8] sm:$0xff] }
 0x31a   :  { %5579 = vmatpush1.bf16.msra.mxu1 %v7951_v25  ;;  %5416 = vmatprep.subr.bf16.mxu0 %v7958_v27  ;;  %v7489_v25 = vcombine.low %v2171_v41, %v2175_v34  ;;  %v7491_v27 = vcombine.low %v2172_v32, %v2176_v36  ;;  %v7500_v63 = vcombine.high %v2180_v26, %v2184_v61  ;;  %v2219_v41 = vld [vmem:[#allocation8 + $0x210] sm:$0xff]  ;;  %v2224_v32 = vld [vmem:[#allocation8 + $0x238] sm:$0xff] }
 0x31b   :  { %5580 = vmatprep.subr.bf16.mxu1 %v7960_v12  ;;  %v7498_v12 = vcombine.high %v2179_v5, %v2183_v15  ;;  %v2223_v34 = vld [vmem:[#allocation8 + $0x230] sm:$0xff] }
 0x31d   :  { %5417 = vmatpush1.bf16.msra.mxu0 %v7957_v4  ;;  %v2192_v4 = vld [vmem:[#allocation8 + $0x138] sm:$0xff] }
 0x31e   :  { %5581 = vmatpush1.bf16.msra.mxu1 %v7959_v6  ;;  %5418 = vmatprep.subr.bf16.mxu0 %v7966_v11  ;;  %v7499_v6 = vcombine.low %v2180_v26, %v2184_v61  ;;  %v7506_v11 = vcombine.high %v2187_v0, %v2191_v1  ;;  %v2232_v26 = vld [vmem:[#allocation8 + $0x278] sm:$0xff]  ;;  %v7537_v61 = vcombine.low %v2219_v41, %v2223_v34 }
 0x31f   :  { %5582 = vmatprep.subr.bf16.mxu1 %v7968_v14  ;;  %v7508_v14 = vcombine.high %v2188_v2, %v2192_v4 }
 0x321   :  { %5419 = vmatpush1.bf16.msra.mxu0 %v7965_v50  ;;  %v7505_v50 = vcombine.low %v2187_v0, %v2191_v1  ;;  %v2239_v0 = vld [vmem:[#allocation8 + $0x2b0] sm:$0xff]  ;;  %v2236_v1 = vld [vmem:[#allocation8 + $0x298] sm:$0xff] }
 0x322   :  { %5583 = vmatpush1.bf16.msra.mxu1 %v7967_v20  ;;  %5420 = vmatprep.subr.bf16.mxu0 %v7974_v21  ;;  %v7507_v20 = vcombine.low %v2188_v2, %v2192_v4  ;;  %v7514_v21 = vcombine.high %v2195_v16, %v2199_v17  ;;  %v2240_v2 = vld [vmem:[#allocation8 + $0x2b8] sm:$0xff] }
 0x323   :  { %5584 = vmatprep.subr.bf16.mxu1 %v7976_v22  ;;  %v7516_v22 = vcombine.high %v2196_v18, %v2200_v19  ;;  %v2248_v18 = vld [vmem:[#allocation8 + $0x2f8] sm:$0xff] }
 0x325   :  { %5421 = vmatpush1.bf16.msra.mxu0 %v7973_v42  ;;  %v7513_v42 = vcombine.low %v2195_v16, %v2199_v17  ;;  %v2247_v16 = vld [vmem:[#allocation8 + $0x2f0] sm:$0xff]  ;;  %v2244_v17 = vld [vmem:[#allocation8 + $0x2d8] sm:$0xff] }
 0x326   :  { %5585 = vmatpush1.bf16.msra.mxu1 %v7975_v43  ;;  %5595 = vmatprep.subr.bf16.mxu0 %v7474_v35  ;;  %v7522_v43 = vcombine.high %v2203_v7, %v2207_v23  ;;  %v7524_v35 = vcombine.high %v2204_v8, %v2208_v24  ;;  %v2255_v7 = vld [vmem:[#allocation8 + $0x330] sm:$0xff]  ;;  %v2252_v23 = vld [vmem:[#allocation8 + $0x318] sm:$0xff] }
 0x327   :  { %5759 = vmatprep.subr.bf16.mxu1 %v7476_v37  ;;  %v2211_v37 = vld [vmem:[#allocation8 + $0x1d0] sm:$0xff]  ;;  %v2256_v8 = vld [vmem:[#allocation8 + $0x338] sm:$0xff] }
 0x328   :  { %5423 = vmatmul.mubr.bf16.vlgmr.msra.gmra.mrb[16].mxu0 %v9183_v59  ;;  %v7529_v36 = vcombine.low %v2211_v37, %v2215_v40 }
 0x329   :  { %5587 = vmatmul.mubr.bf16.vlgmr.msra.gmra.mrb[16].mxu1 %v9183_v59  ;;  %5596 = vmatpush1.bf16.msra.mxu0 %v7473_v48  ;;  %v2216_v48 = vld [vmem:[#allocation8 + $0x1f8] sm:$0xff] }
 0x32a   :  { %5627 = vmatprep.mubr.bf16.mxu0 %v9087_v29  ;;  %5760 = vmatpush1.bf16.msra.mxu1 %v7475_v60  ;;  %v7530_v60 = vcombine.high %v2211_v37, %v2215_v40  ;;  %v2263_v37 = vld [vmem:[#allocation8 + $0x370] sm:$0xff]  ;;  %v2260_v40 = vld [vmem:[#allocation8 + $0x358] sm:$0xff] }
 0x32b   :  { %5791 = vmatprep.mubr.bf16.mxu1 %v9087_v29  ;;  %5597 = vmatprep.subr.bf16.mxu0 %v7482_v53  ;;  %v7497_v29 = vcombine.low %v2179_v5, %v2183_v15  ;;  %v7532_v53 = vcombine.high %v2212_v44, %v2216_v48  ;;  %v2231_v5 = vld [vmem:[#allocation8 + $0x270] sm:$0xff]  ;;  %v2228_v15 = vld [vmem:[#allocation8 + $0x258] sm:$0xff] }
 0x32c   :  { %5761 = vmatprep.subr.bf16.mxu1 %v7484_v31  ;;  %v2220_v31 = vld [vmem:[#allocation8 + $0x218] sm:$0xff] }
 0x32d   :  { %5598 = vmatpush1.bf16.msra.mxu0 %v7481_v9  ;;  %v7531_v9 = vcombine.low %v2212_v44, %v2216_v48  ;;  %v2264_v44 = vld [vmem:[#allocation8 + $0x378] sm:$0xff] }
 0x32e   :  { %5762 = vmatpush1.bf16.msra.mxu1 %v7483_v10  ;;  %5599 = vmatprep.subr.bf16.mxu0 %v7490_v3  ;;  %v7538_v10 = vcombine.high %v2219_v41, %v2223_v34  ;;  %v7540_v3 = vcombine.high %v2220_v31, %v2224_v32  ;;  %v2271_v41 = vld [vmem:[#allocation8 + $0x3b0] sm:$0xff]  ;;  %v2268_v34 = vld [vmem:[#allocation8 + $0x398] sm:$0xff] }
 0x32f   :  { %5763 = vmatprep.subr.bf16.mxu1 %v7492_v39  ;;  %v2227_v39 = vld [vmem:[#allocation8 + $0x250] sm:$0xff] }
 0x330   :  { %v7545_v4 = vcombine.low %v2227_v39, %v2231_v5 }
 0x331   :  { %5600 = vmatpush1.bf16.msra.mxu0 %v7489_v25  ;;  %v7539_v25 = vcombine.low %v2220_v31, %v2224_v32  ;;  %v2272_v31 = vld [vmem:[#allocation8 + $0x3b8] sm:$0xff] }
 0x332   :  { %5764 = vmatpush1.bf16.msra.mxu1 %v7491_v27  ;;  %5601 = vmatprep.subr.bf16.mxu0 %v7498_v12  ;;  %v7546_v27 = vcombine.high %v2227_v39, %v2231_v5  ;;  %v7548_v12 = vcombine.high %v2228_v15, %v2232_v26  ;;  %v2279_v39 = vld [vmem:[#allocation8 + $0x3f0] sm:$0xff]  ;;  %v2276_v5 = vld [vmem:[#allocation8 + $0x3d8] sm:$0xff] }
 0x333   :  { %5765 = vmatprep.subr.bf16.mxu1 %v7500_v63  ;;  %v2235_v63 = vld [vmem:[#allocation8 + $0x290] sm:$0xff] }
 0x334   :  { %v7553_v19 = vcombine.low %v2235_v63, %v2239_v0 }
 0x335   :  { %5602 = vmatpush1.bf16.msra.mxu0 %v7497_v29  ;;  %v7547_v29 = vcombine.low %v2228_v15, %v2232_v26  ;;  %v2280_v15 = vld [vmem:[#allocation8 + $0x3f8] sm:$0xff] }
 0x336   :  { %5766 = vmatpush1.bf16.msra.mxu1 %v7499_v6  ;;  %5603 = vmatprep.subr.bf16.mxu0 %v7506_v11  ;;  %v7554_v6 = vcombine.high %v2235_v63, %v2239_v0  ;;  %v7556_v11 = vcombine.high %v2236_v1, %v2240_v2  ;;  %v2287_v63 = vld [vmem:[#allocation8 + $0x430] sm:$0xff]  ;;  %v2284_v0 = vld [vmem:[#allocation8 + $0x418] sm:$0xff] }
 0x337   :  { %5767 = vmatprep.subr.bf16.mxu1 %v7508_v14  ;;  %v2243_v14 = vld [vmem:[#allocation8 + $0x2d0] sm:$0xff] }
 0x338   :  { %v7561_v24 = vcombine.low %v2243_v14, %v2247_v16 }
 0x339   :  { %5604 = vmatpush1.bf16.msra.mxu0 %v7505_v50  ;;  %v7555_v50 = vcombine.low %v2236_v1, %v2240_v2  ;;  %v2288_v1 = vld [vmem:[#allocation8 + $0x438] sm:$0xff] }
 0x33a   :  { %5768 = vmatpush1.bf16.msra.mxu1 %v7507_v20  ;;  %5605 = vmatprep.subr.bf16.mxu0 %v7514_v21  ;;  %v7562_v20 = vcombine.high %v2243_v14, %v2247_v16  ;;  %v7564_v21 = vcombine.high %v2244_v17, %v2248_v18  ;;  %v2295_v14 = vld [vmem:[#allocation8 + $0x470] sm:$0xff] }
 0x33b   :  { %5769 = vmatprep.subr.bf16.mxu1 %v7516_v22  ;;  %v2251_v22 = vld [vmem:[#allocation8 + $0x310] sm:$0xff] }
 0x33c   :  { %v7569_v48 = vcombine.low %v2251_v22, %v2255_v7 }
 0x33d   :  { %5606 = vmatpush1.bf16.msra.mxu0 %v7513_v42  ;;  %v7563_v42 = vcombine.low %v2244_v17, %v2248_v18  ;;  %v2292_v17 = vld [vmem:[#allocation8 + $0x458] sm:$0xff] }
 0x33e   :  { %5770 = vmatpush1.bf16.msra.mxu1 %v7515_v28  ;;  %5607 = vmatprep.subr.bf16.mxu0 %v7522_v43  ;;  %v7570_v28 = vcombine.high %v2251_v22, %v2255_v7  ;;  %v7572_v43 = vcombine.high %v2252_v23, %v2256_v8  ;;  %v2296_v18 = vld [vmem:[#allocation8 + $0x478] sm:$0xff] }
 0x33f   :  { %5771 = vmatprep.subr.bf16.mxu1 %v7524_v35  ;;  %v2259_v35 = vld [vmem:[#allocation8 + $0x350] sm:$0xff]  ;;  %v7612_v22 = vcombine.high %v2292_v17, %v2296_v18  ;;  %v2300_v7 = vld [vmem:[#allocation8 + $0x498] sm:$0xff] }
 0x340   :  { %v7577_v32 = vcombine.low %v2259_v35, %v2263_v37 }
 0x341   :  { %5608 = vmatpush1.bf16.msra.mxu0 %v7521_v55  ;;  %v7571_v55 = vcombine.low %v2252_v23, %v2256_v8  ;;  %v2304_v23 = vld [vmem:[#allocation8 + $0x4b8] sm:$0xff] }
 0x342   :  { %5772 = vmatpush1.bf16.msra.mxu1 %v7523_v56  ;;  %5609 = vmatprep.subr.bf16.mxu0 %v7530_v60  ;;  %v7578_v56 = vcombine.high %v2259_v35, %v2263_v37  ;;  %v7580_v60 = vcombine.high %v2260_v40, %v2264_v44  ;;  %v2311_v35 = vld [vmem:[#allocation8 + $0x4f0] sm:$0xff]  ;;  %v2308_v37 = vld [vmem:[#allocation8 + $0x4d8] sm:$0xff] }
 0x343   :  { %5773 = vmatprep.subr.bf16.mxu1 %v7532_v53  ;;  %v2267_v53 = vld [vmem:[#allocation8 + $0x390] sm:$0xff] }
 0x344   :  { %v7585_v26 = vcombine.low %v2267_v53, %v2271_v41 }
 0x345   :  { %5610 = vmatpush1.bf16.msra.mxu0 %v7529_v36  ;;  %v7579_v36 = vcombine.low %v2260_v40, %v2264_v44  ;;  %v2312_v40 = vld [vmem:[#allocation8 + $0x4f8] sm:$0xff] }
 0x346   :  { %5774 = vmatpush1.bf16.msra.mxu1 %v7531_v9  ;;  %5611 = vmatprep.subr.bf16.mxu0 %v7538_v10  ;;  %v7586_v9 = vcombine.high %v2267_v53, %v2271_v41  ;;  %v7588_v10 = vcombine.high %v2268_v34, %v2272_v31  ;;  %v2316_v53 = vld [vmem:[#allocation8 + $0x518] sm:$0xff] }
 0x347   :  { %5775 = vmatprep.subr.bf16.mxu1 %v7540_v3  ;;  %v2275_v3 = vld [vmem:[#allocation8 + $0x3d0] sm:$0xff]  ;;  %v2320_v41 = vld [vmem:[#allocation8 + $0x538] sm:$0xff] }
 0x348   :  { %v7593_v2 = vcombine.low %v2275_v3, %v2279_v39 }
 0x349   :  { %5612 = vmatpush1.bf16.msra.mxu0 %v7537_v61  ;;  %v7587_v61 = vcombine.low %v2268_v34, %v2272_v31  ;;  %v7627_v34 = vcombine.low %v2308_v37, %v2312_v40 }
 0x34a   :  { %5776 = vmatpush1.bf16.msra.mxu1 %v7539_v25  ;;  %5613 = vmatprep.subr.bf16.mxu0 %v7546_v27  ;;  %v7594_v25 = vcombine.high %v2275_v3, %v2279_v39  ;;  %v7596_v27 = vcombine.high %v2276_v5, %v2280_v15  ;;  %v2328_v3 = vld [vmem:[#allocation8 + $0x578] sm:$0xff] }
 0x34b   :  { %5777 = vmatprep.subr.bf16.mxu1 %v7548_v12  ;;  %v2283_v12 = vld [vmem:[#allocation8 + $0x410] sm:$0xff] }
 0x34c   :  { %v7601_v16 = vcombine.low %v2283_v12, %v2287_v63 }
 0x34d   :  { %5614 = vmatpush1.bf16.msra.mxu0 %v7545_v4  ;;  %v7595_v4 = vcombine.low %v2276_v5, %v2280_v15  ;;  %v7635_v5 = vcombine.low %v2316_v53, %v2320_v41 }
 0x34e   :  { %5778 = vmatpush1.bf16.msra.mxu1 %v7547_v29  ;;  %5615 = vmatprep.subr.bf16.mxu0 %v7554_v6  ;;  %v7602_v29 = vcombine.high %v2283_v12, %v2287_v63  ;;  %v7604_v6 = vcombine.high %v2284_v0, %v2288_v1  ;;  %v2336_v12 = vld [vmem:[#allocation8 + $0x5b8] sm:$0xff] }
 0x34f   :  { %5779 = vmatprep.subr.bf16.mxu1 %v7556_v11  ;;  %v2291_v11 = vld [vmem:[#allocation8 + $0x450] sm:$0xff] }
 0x350   :  { %v7609_v8 = vcombine.low %v2291_v11, %v2295_v14 }
 0x351   :  { %5616 = vmatpush1.bf16.msra.mxu0 %v7553_v19  ;;  %v7603_v19 = vcombine.low %v2284_v0, %v2288_v1 }
 0x352   :  { %5780 = vmatpush1.bf16.msra.mxu1 %v7555_v50  ;;  %5617 = vmatprep.subr.bf16.mxu0 %v7562_v20  ;;  %v7610_v50 = vcombine.high %v2291_v11, %v2295_v14  ;;  %v2299_v20 = vld [vmem:[#allocation8 + $0x490] sm:$0xff]  ;;  %v2344_v11 = vld [vmem:[#allocation8 + $0x5f8] sm:$0xff] }
 0x353   :  { %5781 = vmatprep.subr.bf16.mxu1 %v7564_v21  ;;  %v2303_v21 = vld [vmem:[#allocation8 + $0x4b0] sm:$0xff] }
 0x354   :  { %v7617_v44 = vcombine.low %v2299_v20, %v2303_v21 }
 0x355   :  { %5618 = vmatpush1.bf16.msra.mxu0 %v7561_v24  ;;  %v7611_v24 = vcombine.low %v2292_v17, %v2296_v18 }
 0x356   :  { %5782 = vmatpush1.bf16.msra.mxu1 %v7563_v42  ;;  %5619 = vmatprep.subr.bf16.mxu0 %v7570_v28  ;;  %v7618_v42 = vcombine.high %v2299_v20, %v2303_v21  ;;  %v7620_v28 = vcombine.high %v2300_v7, %v2304_v23  ;;  %v2348_v20 = vld [vmem:[#allocation8 + $0x618] sm:$0xff] }
 0x357   :  { %5783 = vmatprep.subr.bf16.mxu1 %v7572_v43  ;;  %v2307_v43 = vld [vmem:[#allocation8 + $0x4d0] sm:$0xff]  ;;  %v2352_v21 = vld [vmem:[#allocation8 + $0x638] sm:$0xff] }
 0x359   :  { %5620 = vmatpush1.bf16.msra.mxu0 %v7569_v48  ;;  %v7626_v48 = vcombine.high %v2307_v43, %v2311_v35 }
 0x35a   :  { %5784 = vmatpush1.bf16.msra.mxu1 %v7571_v55  ;;  %5621 = vmatprep.subr.bf16.mxu0 %v7578_v56  ;;  %v7628_v55 = vcombine.high %v2308_v37, %v2312_v40  ;;  %v2315_v56 = vld [vmem:[#allocation8 + $0x510] sm:$0xff]  ;;  %v7667_v37 = vcombine.low %v2348_v20, %v2352_v21 }
 0x35b   :  { %5785 = vmatprep.subr.bf16.mxu1 %v7580_v60  ;;  %v2319_v60 = vld [vmem:[#allocation8 + $0x530] sm:$0xff] }
 0x35c   :  { %v7634_v31 = vcombine.high %v2315_v56, %v2319_v60  ;;  %v7633_v39 = vcombine.low %v2315_v56, %v2319_v60  ;;  %v2368_v56 = vld [vmem:[#allocation8 + $0x6b8] sm:$0xff] }
 0x35d   :  { %5622 = vmatpush1.bf16.msra.mxu0 %v7577_v32  ;;  %v7636_v32 = vcombine.high %v2316_v53, %v2320_v41 }
 0x35e   :  { %5786 = vmatpush1.bf16.msra.mxu1 %v7579_v36  ;;  %5623 = vmatprep.subr.bf16.mxu0 %v7586_v9  ;;  %v2323_v36 = vld [vmem:[#allocation8 + $0x550] sm:$0xff] }
 0x35f   :  { %5787 = vmatprep.subr.bf16.mxu1 %v7588_v10  ;;  %v2327_v9 = vld [vmem:[#allocation8 + $0x570] sm:$0xff]  ;;  %v2324_v10 = vld [vmem:[#allocation8 + $0x558] sm:$0xff] }
 0x360   :  { %v7642_v15 = vcombine.high %v2323_v36, %v2327_v9  ;;  %v7641_v63 = vcombine.low %v2323_v36, %v2327_v9  ;;  %v7643_v0 = vcombine.low %v2324_v10, %v2328_v3  ;;  %v2376_v36 = vld [vmem:[#allocation8 + $0x6f8] sm:$0xff] }
 0x361   :  { %5624 = vmatpush1.bf16.msra.mxu0 %v7585_v26  ;;  %v7644_v26 = vcombine.high %v2324_v10, %v2328_v3 }
 0x362   :  { %5788 = vmatpush1.bf16.msra.mxu1 %v7587_v61  ;;  %5625 = vmatprep.subr.bf16.mxu0 %v7594_v25  ;;  %v2331_v61 = vld [vmem:[#allocation8 + $0x590] sm:$0xff] }
 0x363   :  { %5789 = vmatprep.subr.bf16.mxu1 %v7596_v27  ;;  %v2335_v25 = vld [vmem:[#allocation8 + $0x5b0] sm:$0xff]  ;;  %v2332_v27 = vld [vmem:[#allocation8 + $0x598] sm:$0xff] }
 0x364   :  { %v7650_v1 = vcombine.high %v2331_v61, %v2335_v25  ;;  %v7649_v14 = vcombine.low %v2331_v61, %v2335_v25  ;;  %v2384_v61 = vld [vmem:[#allocation8 + $0x738] sm:$0xff] }
 0x365   :  { %5626 = vmatpush1.bf16.msra.mxu0 %v7593_v2  ;;  %v7652_v2 = vcombine.high %v2332_v27, %v2336_v12 }
 0x366   :  { %5790 = vmatpush1.bf16.msra.mxu1 %v7595_v4  ;;  %5636 = vmatprep.subr.bf16.mxu0 %v7602_v29  ;;  %v2339_v4 = vld [vmem:[#allocation8 + $0x5d0] sm:$0xff] }
 0x367   :  { %5800 = vmatprep.subr.bf16.mxu1 %v7604_v6  ;;  %v2343_v29 = vld [vmem:[#allocation8 + $0x5f0] sm:$0xff]  ;;  %v2340_v6 = vld [vmem:[#allocation8 + $0x5d8] sm:$0xff] }
 0x368   :  { %5628 = vmatmul.mubr.bf16.vlgmr.msra.gmra.mrb[20].mxu0 %v9089_v13  ;;  %v7658_v17 = vcombine.high %v2339_v4, %v2343_v29  ;;  %v7660_v18 = vcombine.high %v2340_v6, %v2344_v11 }
 0x369   :  { %5792 = vmatmul.mubr.bf16.vlgmr.msra.gmra.mrb[20].mxu1 %v9089_v13  ;;  %5637 = vmatpush1.bf16.msra.mxu0 %v7601_v16  ;;  %v7619_v13 = vcombine.low %v2300_v7, %v2304_v23  ;;  %v7651_v16 = vcombine.low %v2332_v27, %v2336_v12  ;;  %v7659_v7 = vcombine.low %v2340_v6, %v2344_v11 }
 0x36a   :  { %5668 = vmatprep.mubr.bf16.mxu0 %v9093_v45  ;;  %5801 = vmatpush1.bf16.msra.mxu1 %v7603_v19  ;;  %v2347_v19 = vld [vmem:[#allocation8 + $0x610] sm:$0xff] }
 0x36b   :  { %5832 = vmatprep.mubr.bf16.mxu1 %v9093_v45  ;;  %5638 = vmatprep.subr.bf16.mxu0 %v7610_v50  ;;  %v7625_v45 = vcombine.low %v2307_v43, %v2311_v35  ;;  %v2351_v50 = vld [vmem:[#allocation8 + $0x630] sm:$0xff]  ;;  %v2360_v43 = vld [vmem:[#allocation8 + $0x678] sm:$0xff] }
 0x36c   :  { %5802 = vmatprep.subr.bf16.mxu1 %v7612_v22  ;;  %v7657_v22 = vcombine.low %v2339_v4, %v2343_v29  ;;  %v7666_v23 = vcombine.high %v2347_v19, %v2351_v50  ;;  %v7665_v35 = vcombine.low %v2347_v19, %v2351_v50  ;;  %v2392_v4 = vld [vmem:[#allocation8 + $0x778] sm:$0xff] }
 0x36d   :  { %5639 = vmatpush1.bf16.msra.mxu0 %v7609_v8  ;;  %v7668_v8 = vcombine.high %v2348_v20, %v2352_v21  ;;  %v2400_v19 = vld [vmem:[#allocation8 + $0x7b8] sm:$0xff] }
 0x36e   :  { %5803 = vmatpush1.bf16.msra.mxu1 %v7611_v24  ;;  %5640 = vmatprep.subr.bf16.mxu0 %v7618_v42  ;;  %v2355_v24 = vld [vmem:[#allocation8 + $0x650] sm:$0xff] }
 0x36f   :  { %5804 = vmatprep.subr.bf16.mxu1 %v7620_v28  ;;  %v2359_v42 = vld [vmem:[#allocation8 + $0x670] sm:$0xff]  ;;  %v2356_v28 = vld [vmem:[#allocation8 + $0x658] sm:$0xff] }
 0x370   :  { %v7674_v40 = vcombine.high %v2355_v24, %v2359_v42  ;;  %v7673_v60 = vcombine.low %v2355_v24, %v2359_v42  ;;  %v7675_v53 = vcombine.low %v2356_v28, %v2360_v43  ;;  %v2408_v24 = vld [vmem:[#allocation8 + $0x7f8] sm:$0xff] }
 0x371   :  { %5641 = vmatpush1.bf16.msra.mxu0 %v7617_v44  ;;  %v7676_v44 = vcombine.high %v2356_v28, %v2360_v43 }
 0x372   :  { %5805 = vmatpush1.bf16.msra.mxu1 %v7619_v13  ;;  %5642 = vmatprep.subr.bf16.mxu0 %v7626_v48  ;;  %v2363_v13 = vld [vmem:[#allocation8 + $0x690] sm:$0xff] }
 0x373   :  { %5806 = vmatprep.subr.bf16.mxu1 %v7628_v55  ;;  %v2367_v48 = vld [vmem:[#allocation8 + $0x6b0] sm:$0xff]  ;;  %v2364_v55 = vld [vmem:[#allocation8 + $0x698] sm:$0xff] }
 0x374   :  { %v7682_v41 = vcombine.high %v2363_v13, %v2367_v48  ;;  %v7681_v9 = vcombine.low %v2363_v13, %v2367_v48  ;;  %v7683_v10 = vcombine.low %v2364_v55, %v2368_v56  ;;  %v2416_v13 = vld [vmem:[#allocation8 + $0x838] sm:$0xff] }
 0x375   :  { %5643 = vmatpush1.bf16.msra.mxu0 %v7625_v45  ;;  %v7684_v45 = vcombine.high %v2364_v55, %v2368_v56 }
 0x376   :  { %5807 = vmatpush1.bf16.msra.mxu1 %v7627_v34  ;;  %5644 = vmatprep.subr.bf16.mxu0 %v7634_v31  ;;  %v2371_v34 = vld [vmem:[#allocation8 + $0x6d0] sm:$0xff] }
 0x377   :  { %5808 = vmatprep.subr.bf16.mxu1 %v7636_v32  ;;  %v2375_v31 = vld [vmem:[#allocation8 + $0x6f0] sm:$0xff]  ;;  %v2372_v32 = vld [vmem:[#allocation8 + $0x6d8] sm:$0xff] }
 0x378   :  { %v7690_v3 = vcombine.high %v2371_v34, %v2375_v31  ;;  %v7689_v25 = vcombine.low %v2371_v34, %v2375_v31  ;;  %v7691_v27 = vcombine.low %v2372_v32, %v2376_v36  ;;  %v2420_v34 = vld [vmem:[#allocation8 + $0x858] sm:$0xff] }
 0x379   :  { %5645 = vmatpush1.bf16.msra.mxu0 %v7633_v39  ;;  %v7692_v39 = vcombine.high %v2372_v32, %v2376_v36  ;;  %v2424_v31 = vld [vmem:[#allocation8 + $0x878] sm:$0xff] }
 0x37a   :  { %5809 = vmatpush1.bf16.msra.mxu1 %v7635_v5  ;;  %5646 = vmatprep.subr.bf16.mxu0 %v7642_v15  ;;  %v2379_v5 = vld [vmem:[#allocation8 + $0x710] sm:$0xff] }
 0x37b   :  { %5810 = vmatprep.subr.bf16.mxu1 %v7644_v26  ;;  %v2383_v15 = vld [vmem:[#allocation8 + $0x730] sm:$0xff]  ;;  %v2380_v26 = vld [vmem:[#allocation8 + $0x718] sm:$0xff] }
 0x37c   :  { %v7698_v12 = vcombine.high %v2379_v5, %v2383_v15  ;;  %v7697_v29 = vcombine.low %v2379_v5, %v2383_v15  ;;  %v7699_v6 = vcombine.low %v2380_v26, %v2384_v61  ;;  %v2432_v5 = vld [vmem:[#allocation8 + $0x8b8] sm:$0xff] }
 0x37d   :  { %5647 = vmatpush1.bf16.msra.mxu0 %v7641_v63  ;;  %v7700_v63 = vcombine.high %v2380_v26, %v2384_v61  ;;  %v7739_v26 = vcombine.low %v2420_v34, %v2424_v31 }
 0x37e   :  { %5811 = vmatpush1.bf16.msra.mxu1 %v7643_v0  ;;  %5648 = vmatprep.subr.bf16.mxu0 %v7650_v1  ;;  %v2387_v0 = vld [vmem:[#allocation8 + $0x750] sm:$0xff] }
 0x37f   :  { %5812 = vmatprep.subr.bf16.mxu1 %v7652_v2  ;;  %v2391_v1 = vld [vmem:[#allocation8 + $0x770] sm:$0xff]  ;;  %v2388_v2 = vld [vmem:[#allocation8 + $0x758] sm:$0xff] }
 0x380   :  { %v7706_v11 = vcombine.high %v2387_v0, %v2391_v1  ;;  %v7705_v50 = vcombine.low %v2387_v0, %v2391_v1  ;;  %v7707_v20 = vcombine.low %v2388_v2, %v2392_v4  ;;  %v2440_v0 = vld [vmem:[#allocation8 + $0x8f8] sm:$0xff] }
 0x381   :  { %5649 = vmatpush1.bf16.msra.mxu0 %v7649_v14  ;;  %v7708_v14 = vcombine.high %v2388_v2, %v2392_v4 }
 0x382   :  { %5813 = vmatpush1.bf16.msra.mxu1 %v7651_v16  ;;  %5650 = vmatprep.subr.bf16.mxu0 %v7658_v17  ;;  %v2395_v16 = vld [vmem:[#allocation8 + $0x790] sm:$0xff] }
 0x383   :  { %5814 = vmatprep.subr.bf16.mxu1 %v7660_v18  ;;  %v2399_v17 = vld [vmem:[#allocation8 + $0x7b0] sm:$0xff]  ;;  %v2396_v18 = vld [vmem:[#allocation8 + $0x798] sm:$0xff] }
 0x384   :  { %v7714_v21 = vcombine.high %v2395_v16, %v2399_v17  ;;  %v7713_v42 = vcombine.low %v2395_v16, %v2399_v17  ;;  %v7715_v28 = vcombine.low %v2396_v18, %v2400_v19 }
 0x385   :  { %5651 = vmatpush1.bf16.msra.mxu0 %v7657_v22  ;;  %v7716_v22 = vcombine.high %v2396_v18, %v2400_v19  ;;  %v2451_v19 = vld [vmem:[#allocation8 + $0x950] sm:$0xff] }
 0x386   :  { %5815 = vmatpush1.bf16.msra.mxu1 %v7659_v7  ;;  %5652 = vmatprep.subr.bf16.mxu0 %v7666_v23  ;;  %v2403_v7 = vld [vmem:[#allocation8 + $0x7d0] sm:$0xff] }
 0x387   :  { %5816 = vmatprep.subr.bf16.mxu1 %v7668_v8  ;;  %v2407_v23 = vld [vmem:[#allocation8 + $0x7f0] sm:$0xff]  ;;  %v2404_v8 = vld [vmem:[#allocation8 + $0x7d8] sm:$0xff] }
 0x388   :  { %v7722_v43 = vcombine.high %v2403_v7, %v2407_v23  ;;  %v7721_v48 = vcombine.low %v2403_v7, %v2407_v23  ;;  %v7723_v55 = vcombine.low %v2404_v8, %v2408_v24 }
 0x389   :  { %5653 = vmatpush1.bf16.msra.mxu0 %v7665_v35  ;;  %v7724_v35 = vcombine.high %v2404_v8, %v2408_v24  ;;  %v2459_v24 = vld [vmem:[#allocation8 + $0x990] sm:$0xff] }
 0x38a   :  { %5817 = vmatpush1.bf16.msra.mxu1 %v7667_v37  ;;  %5654 = vmatprep.subr.bf16.mxu0 %v7674_v40  ;;  %v2411_v37 = vld [vmem:[#allocation8 + $0x810] sm:$0xff] }
 0x38b   :  { %5818 = vmatprep.subr.bf16.mxu1 %v7676_v44  ;;  %v2415_v40 = vld [vmem:[#allocation8 + $0x830] sm:$0xff]  ;;  %v2412_v44 = vld [vmem:[#allocation8 + $0x818] sm:$0xff] }
 0x38c   :  { %v7730_v56 = vcombine.high %v2411_v37, %v2415_v40  ;;  %v7731_v32 = vcombine.low %v2412_v44, %v2416_v13 }
 0x38d   :  { %5655 = vmatpush1.bf16.msra.mxu0 %v7673_v60  ;;  %v7732_v60 = vcombine.high %v2412_v44, %v2416_v13  ;;  %v2467_v13 = vld [vmem:[#allocation8 + $0x9d0] sm:$0xff] }
 0x38e   :  { %5819 = vmatpush1.bf16.msra.mxu1 %v7675_v53  ;;  %5656 = vmatprep.subr.bf16.mxu0 %v7682_v41  ;;  %v2419_v53 = vld [vmem:[#allocation8 + $0x850] sm:$0xff] }
 0x38f   :  { %5820 = vmatprep.subr.bf16.mxu1 %v7684_v45  ;;  %v2423_v41 = vld [vmem:[#allocation8 + $0x870] sm:$0xff]  ;;  %v7729_v45 = vcombine.low %v2411_v37, %v2415_v40 }
 0x390   :  { %v7738_v36 = vcombine.high %v2419_v53, %v2423_v41  ;;  %v7737_v15 = vcombine.low %v2419_v53, %v2423_v41 }
 0x391   :  { %5657 = vmatpush1.bf16.msra.mxu0 %v7681_v9  ;;  %v2427_v9 = vld [vmem:[#allocation8 + $0x890] sm:$0xff] }
 0x392   :  { %5821 = vmatpush1.bf16.msra.mxu1 %v7683_v10  ;;  %5658 = vmatprep.subr.bf16.mxu0 %v7690_v3  ;;  %v2431_v10 = vld [vmem:[#allocation8 + $0x8b0] sm:$0xff]  ;;  %v7740_v3 = vcombine.high %v2420_v34, %v2424_v31 }
 0x393   :  { %5822 = vmatprep.subr.bf16.mxu1 %v7692_v39  ;;  %v2428_v39 = vld [vmem:[#allocation8 + $0x898] sm:$0xff]  ;;  %v7746_v61 = vcombine.high %v2427_v9, %v2431_v10  ;;  %v7745_v1 = vcombine.low %v2427_v9, %v2431_v10  ;;  %v2475_v34 = vld [vmem:[#allocation8 + $0xa10] sm:$0xff] }
 0x394   :  { %v2479_v31 = vld [vmem:[#allocation8 + $0xa30] sm:$0xff] }
 0x395   :  { %5659 = vmatpush1.bf16.msra.mxu0 %v7689_v25  ;;  %v7748_v25 = vcombine.high %v2428_v39, %v2432_v5 }
 0x396   :  { %5823 = vmatpush1.bf16.msra.mxu1 %v7691_v27  ;;  %5660 = vmatprep.subr.bf16.mxu0 %v7698_v12  ;;  %v2435_v27 = vld [vmem:[#allocation8 + $0x8d0] sm:$0xff] }
 0x397   :  { %5824 = vmatprep.subr.bf16.mxu1 %v7700_v63  ;;  %v2439_v12 = vld [vmem:[#allocation8 + $0x8f0] sm:$0xff]  ;;  %v2436_v63 = vld [vmem:[#allocation8 + $0x8d8] sm:$0xff] }
 0x398   :  { %v7754_v2 = vcombine.high %v2435_v27, %v2439_v12  ;;  %v7756_v4 = vcombine.high %v2436_v63, %v2440_v0  ;;  %v7755_v16 = vcombine.low %v2436_v63, %v2440_v0  ;;  %v2491_v0 = vld [vmem:[#allocation8 + $0xa90] sm:$0xff] }
 0x399   :  { %5661 = vmatpush1.bf16.msra.mxu0 %v7697_v29  ;;  %v2443_v29 = vld [vmem:[#allocation8 + $0x910] sm:$0xff] }
 0x39a   :  { %5825 = vmatpush1.bf16.msra.mxu1 %v7699_v6  ;;  %5662 = vmatprep.subr.bf16.mxu0 %v7706_v11  ;;  %v2447_v6 = vld [vmem:[#allocation8 + $0x930] sm:$0xff]  ;;  %v2444_v11 = vld [vmem:[#allocation8 + $0x918] sm:$0xff] }
 0x39b   :  { %5826 = vmatprep.subr.bf16.mxu1 %v7708_v14  ;;  %v2448_v14 = vld [vmem:[#allocation8 + $0x938] sm:$0xff]  ;;  %v7762_v17 = vcombine.high %v2443_v29, %v2447_v6 }
 0x39c   :  { %v7764_v18 = vcombine.high %v2444_v11, %v2448_v14  ;;  %v7763_v7 = vcombine.low %v2444_v11, %v2448_v14  ;;  %v2499_v14 = vld [vmem:[#allocation8 + $0xad0] sm:$0xff] }
 0x39d   :  { %5663 = vmatpush1.bf16.msra.mxu0 %v7705_v50  ;;  %v2455_v50 = vld [vmem:[#allocation8 + $0x970] sm:$0xff] }
 0x39e   :  { %5827 = vmatpush1.bf16.msra.mxu1 %v7707_v20  ;;  %5664 = vmatprep.subr.bf16.mxu0 %v7714_v21  ;;  %v2452_v20 = vld [vmem:[#allocation8 + $0x958] sm:$0xff]  ;;  %v7770_v23 = vcombine.high %v2451_v19, %v2455_v50 }
 0x39f   :  { %5828 = vmatprep.subr.bf16.mxu1 %v7716_v22  ;;  %v2456_v21 = vld [vmem:[#allocation8 + $0x978] sm:$0xff]  ;;  %v7761_v22 = vcombine.low %v2443_v29, %v2447_v6 }
 0x3a0   :  { %v7772_v8 = vcombine.high %v2452_v20, %v2456_v21  ;;  %v7771_v37 = vcombine.low %v2452_v20, %v2456_v21  ;;  %v2507_v21 = vld [vmem:[#allocation8 + $0xb10] sm:$0xff] }
 0x3a1   :  { %5665 = vmatpush1.bf16.msra.mxu0 %v7713_v42  ;;  %v2463_v42 = vld [vmem:[#allocation8 + $0x9b0] sm:$0xff] }
 0x3a2   :  { %5829 = vmatpush1.bf16.msra.mxu1 %v7715_v28  ;;  %5666 = vmatprep.subr.bf16.mxu0 %v7722_v43  ;;  %v2460_v28 = vld [vmem:[#allocation8 + $0x998] sm:$0xff]  ;;  %v7778_v40 = vcombine.high %v2459_v24, %v2463_v42 }
 0x3a3   :  { %5830 = vmatprep.subr.bf16.mxu1 %v7724_v35  ;;  %v2464_v43 = vld [vmem:[#allocation8 + $0x9b8] sm:$0xff]  ;;  %v7769_v35 = vcombine.low %v2451_v19, %v2455_v50 }
 0x3a4   :  { %v7780_v44 = vcombine.high %v2460_v28, %v2464_v43  ;;  %v7779_v53 = vcombine.low %v2460_v28, %v2464_v43  ;;  %v2515_v43 = vld [vmem:[#allocation8 + $0xb50] sm:$0xff] }
 0x3a5   :  { %5667 = vmatpush1.bf16.msra.mxu0 %v7721_v48  ;;  %v2471_v48 = vld [vmem:[#allocation8 + $0x9f0] sm:$0xff] }
 0x3a6   :  { %5831 = vmatpush1.bf16.msra.mxu1 %v7723_v55  ;;  %5677 = vmatprep.subr.bf16.mxu0 %v7730_v56  ;;  %v2468_v55 = vld [vmem:[#allocation8 + $0x9d8] sm:$0xff]  ;;  %v7786_v41 = vcombine.high %v2467_v13, %v2471_v48  ;;  %v7785_v9 = vcombine.low %v2467_v13, %v2471_v48 }
 0x3a7   :  { %5841 = vmatprep.subr.bf16.mxu1 %v7732_v60  ;;  %v2472_v56 = vld [vmem:[#allocation8 + $0x9f8] sm:$0xff]  ;;  %v7777_v60 = vcombine.low %v2459_v24, %v2463_v42 }
 0x3a8   :  { %5669 = vmatmul.mubr.bf16.vlgmr.msra.gmra.mrb[20].mxu0 %v9160_v38  ;;  %v7787_v10 = vcombine.low %v2468_v55, %v2472_v56 }
 0x3a9   :  { %5833 = vmatmul.mubr.bf16.vlgmr.msra.gmra.mrb[20].mxu1 %v9160_v38  ;;  %5678 = vmatpush1.bf16.msra.mxu0 %v7729_v45  ;;  %v7747_v38 = vcombine.low %v2428_v39, %v2432_v5  ;;  %v7788_v45 = vcombine.high %v2468_v55, %v2472_v56  ;;  %v2483_v5 = vld [vmem:[#allocation8 + $0xa50] sm:$0xff] }
 0x3aa   :  { %5709 = vmatprep.mubr.bf16.mxu0 %v9158_v33  ;;  %5842 = vmatpush1.bf16.msra.mxu1 %v7731_v32  ;;  %v2476_v32 = vld [vmem:[#allocation8 + $0xa18] sm:$0xff]  ;;  %v2523_v56 = vld [vmem:[#allocation8 + $0xb90] sm:$0xff] }
 0x3ab   :  { %5873 = vmatprep.mubr.bf16.mxu1 %v9158_v33  ;;  %5679 = vmatprep.subr.bf16.mxu0 %v7738_v36  ;;  %v7753_v33 = vcombine.low %v2435_v27, %v2439_v12  ;;  %v2480_v36 = vld [vmem:[#allocation8 + $0xa38] sm:$0xff] }
 0x3ac   :  { %5843 = vmatprep.subr.bf16.mxu1 %v7740_v3  ;;  %v7794_v3 = vcombine.high %v2475_v34, %v2479_v31  ;;  %v7796_v39 = vcombine.high %v2476_v32, %v2480_v36  ;;  %v7795_v27 = vcombine.low %v2476_v32, %v2480_v36  ;;  %v2531_v36 = vld [vmem:[#allocation8 + $0xbd0] sm:$0xff] }
 0x3ad   :  { %5680 = vmatpush1.bf16.msra.mxu0 %v7737_v15  ;;  %v2487_v15 = vld [vmem:[#allocation8 + $0xa70] sm:$0xff] }
 0x3ae   :  { %5844 = vmatpush1.bf16.msra.mxu1 %v7739_v26  ;;  %5681 = vmatprep.subr.bf16.mxu0 %v7746_v61  ;;  %v2484_v26 = vld [vmem:[#allocation8 + $0xa58] sm:$0xff]  ;;  %v7802_v12 = vcombine.high %v2483_v5, %v2487_v15 }
 0x3af   :  { %5845 = vmatprep.subr.bf16.mxu1 %v7748_v25  ;;  %v2488_v61 = vld [vmem:[#allocation8 + $0xa78] sm:$0xff]  ;;  %v7793_v25 = vcombine.low %v2475_v34, %v2479_v31 }
 0x3b0   :  { %v7804_v63 = vcombine.high %v2484_v26, %v2488_v61  ;;  %v7803_v29 = vcombine.low %v2484_v26, %v2488_v61  ;;  %v2539_v61 = vld [vmem:[#allocation8 + $0xc10] sm:$0xff] }
 0x3b1   :  { %5682 = vmatpush1.bf16.msra.mxu0 %v7745_v1  ;;  %v2495_v1 = vld [vmem:[#allocation8 + $0xab0] sm:$0xff] }
 0x3b2   :  { %5846 = vmatpush1.bf16.msra.mxu1 %v7747_v38  ;;  %5683 = vmatprep.subr.bf16.mxu0 %v7754_v2  ;;  %v2492_v38 = vld [vmem:[#allocation8 + $0xa98] sm:$0xff]  ;;  %v7810_v6 = vcombine.high %v2491_v0, %v2495_v1 }
 0x3b3   :  { %5847 = vmatprep.subr.bf16.mxu1 %v7756_v4  ;;  %v2496_v2 = vld [vmem:[#allocation8 + $0xab8] sm:$0xff]  ;;  %v7801_v4 = vcombine.low %v2483_v5, %v2487_v15 }
 0x3b4   :  { %v7812_v11 = vcombine.high %v2492_v38, %v2496_v2  ;;  %v7811_v19 = vcombine.low %v2492_v38, %v2496_v2  ;;  %v2547_v2 = vld [vmem:[#allocation8 + $0xc50] sm:$0xff] }
 0x3b5   :  { %5684 = vmatpush1.bf16.msra.mxu0 %v7753_v33  ;;  %v2503_v33 = vld [vmem:[#allocation8 + $0xaf0] sm:$0xff] }
 0x3b6   :  { %5848 = vmatpush1.bf16.msra.mxu1 %v7755_v16  ;;  %5685 = vmatprep.subr.bf16.mxu0 %v7762_v17  ;;  %v2500_v16 = vld [vmem:[#allocation8 + $0xad8] sm:$0xff]  ;;  %v7818_v50 = vcombine.high %v2499_v14, %v2503_v33 }
 0x3b7   :  { %5849 = vmatprep.subr.bf16.mxu1 %v7764_v18  ;;  %v2504_v17 = vld [vmem:[#allocation8 + $0xaf8] sm:$0xff]  ;;  %v7809_v18 = vcombine.low %v2491_v0, %v2495_v1 }
 0x3b8   :  { %v7820_v20 = vcombine.high %v2500_v16, %v2504_v17  ;;  %v7819_v24 = vcombine.low %v2500_v16, %v2504_v17  ;;  %v2555_v16 = vld [vmem:[#allocation8 + $0xc90] sm:$0xff] }
 0x3b9   :  { %5686 = vmatpush1.bf16.msra.mxu0 %v7761_v22  ;;  %v2511_v22 = vld [vmem:[#allocation8 + $0xb30] sm:$0xff] }
 0x3ba   :  { %5850 = vmatpush1.bf16.msra.mxu1 %v7763_v7  ;;  %5687 = vmatprep.subr.bf16.mxu0 %v7770_v23  ;;  %v2508_v7 = vld [vmem:[#allocation8 + $0xb18] sm:$0xff]  ;;  %v7826_v42 = vcombine.high %v2507_v21, %v2511_v22  ;;  %v2559_v17 = vld [vmem:[#allocation8 + $0xcb0] sm:$0xff] }
 0x3bb   :  { %5851 = vmatprep.subr.bf16.mxu1 %v7772_v8  ;;  %v2512_v23 = vld [vmem:[#allocation8 + $0xb38] sm:$0xff]  ;;  %v7817_v8 = vcombine.low %v2499_v14, %v2503_v33 }
 0x3bc   :  { %v7828_v28 = vcombine.high %v2508_v7, %v2512_v23  ;;  %v7827_v13 = vcombine.low %v2508_v7, %v2512_v23  ;;  %v2563_v23 = vld [vmem:[#allocation8 + $0xcd0] sm:$0xff] }
 0x3bd   :  { %5688 = vmatpush1.bf16.msra.mxu0 %v7769_v35  ;;  %v2519_v35 = vld [vmem:[#allocation8 + $0xb70] sm:$0xff] }
 0x3be   :  { %5852 = vmatpush1.bf16.msra.mxu1 %v7771_v37  ;;  %5689 = vmatprep.subr.bf16.mxu0 %v7778_v40  ;;  %v2516_v37 = vld [vmem:[#allocation8 + $0xb58] sm:$0xff]  ;;  %v7834_v48 = vcombine.high %v2515_v43, %v2519_v35 }
 0x3bf   :  { %5853 = vmatprep.subr.bf16.mxu1 %v7780_v44  ;;  %v2520_v40 = vld [vmem:[#allocation8 + $0xb78] sm:$0xff]  ;;  %v7825_v44 = vcombine.low %v2507_v21, %v2511_v22  ;;  %v7874_v22 = vcombine.high %v2555_v16, %v2559_v17 }
 0x3c0   :  { %v7836_v55 = vcombine.high %v2516_v37, %v2520_v40  ;;  %v7835_v34 = vcombine.low %v2516_v37, %v2520_v40  ;;  %v2571_v37 = vld [vmem:[#allocation8 + $0xd10] sm:$0xff] }
 0x3c1   :  { %5690 = vmatpush1.bf16.msra.mxu0 %v7777_v60  ;;  %v2527_v60 = vld [vmem:[#allocation8 + $0xbb0] sm:$0xff] }
 0x3c2   :  { %5854 = vmatpush1.bf16.msra.mxu1 %v7779_v53  ;;  %5691 = vmatprep.subr.bf16.mxu0 %v7786_v41  ;;  %v2524_v53 = vld [vmem:[#allocation8 + $0xb98] sm:$0xff]  ;;  %v7842_v31 = vcombine.high %v2523_v56, %v2527_v60  ;;  %v2575_v40 = vld [vmem:[#allocation8 + $0xd30] sm:$0xff] }
 0x3c3   :  { %5855 = vmatprep.subr.bf16.mxu1 %v7788_v45  ;;  %v2528_v41 = vld [vmem:[#allocation8 + $0xbb8] sm:$0xff]  ;;  %v7833_v45 = vcombine.low %v2515_v43, %v2519_v35 }
 0x3c4   :  { %v7844_v32 = vcombine.high %v2524_v53, %v2528_v41  ;;  %v7843_v5 = vcombine.low %v2524_v53, %v2528_v41  ;;  %v2583_v53 = vld [vmem:[#allocation8 + $0xd70] sm:$0xff]  ;;  %v2580_v41 = vld [vmem:[#allocation8 + $0xd58] sm:$0xff] }
 0x3c5   :  { %5692 = vmatpush1.bf16.msra.mxu0 %v7785_v9  ;;  %v2535_v9 = vld [vmem:[#allocation8 + $0xbf0] sm:$0xff] }
 0x3c6   :  { %5856 = vmatpush1.bf16.msra.mxu1 %v7787_v10  ;;  %5693 = vmatprep.subr.bf16.mxu0 %v7794_v3  ;;  %v2532_v10 = vld [vmem:[#allocation8 + $0xbd8] sm:$0xff]  ;;  %v7850_v15 = vcombine.high %v2531_v36, %v2535_v9 }
 0x3c7   :  { %5857 = vmatprep.subr.bf16.mxu1 %v7796_v39  ;;  %v2536_v3 = vld [vmem:[#allocation8 + $0xbf8] sm:$0xff]  ;;  %v7841_v39 = vcombine.low %v2523_v56, %v2527_v60  ;;  %v2579_v60 = vld [vmem:[#allocation8 + $0xd50] sm:$0xff] }
 0x3c8   :  { %v7852_v26 = vcombine.high %v2532_v10, %v2536_v3  ;;  %v7851_v0 = vcombine.low %v2532_v10, %v2536_v3  ;;  %v2591_v10 = vld [vmem:[#allocation8 + $0xdb0] sm:$0xff]  ;;  %v2588_v3 = vld [vmem:[#allocation8 + $0xd98] sm:$0xff] }
 0x3c9   :  { %5694 = vmatpush1.bf16.msra.mxu0 %v7793_v25  ;;  %v2543_v25 = vld [vmem:[#allocation8 + $0xc30] sm:$0xff] }
 0x3ca   :  { %5858 = vmatpush1.bf16.msra.mxu1 %v7795_v27  ;;  %5695 = vmatprep.subr.bf16.mxu0 %v7802_v12  ;;  %v2540_v27 = vld [vmem:[#allocation8 + $0xc18] sm:$0xff]  ;;  %v7858_v1 = vcombine.high %v2539_v61, %v2543_v25 }
 0x3cb   :  { %5859 = vmatprep.subr.bf16.mxu1 %v7804_v63  ;;  %v2544_v12 = vld [vmem:[#allocation8 + $0xc38] sm:$0xff]  ;;  %v7849_v63 = vcombine.low %v2531_v36, %v2535_v9  ;;  %v2587_v9 = vld [vmem:[#allocation8 + $0xd90] sm:$0xff] }
 0x3cc   :  { %v7860_v38 = vcombine.high %v2540_v27, %v2544_v12  ;;  %v7859_v14 = vcombine.low %v2540_v27, %v2544_v12  ;;  %v2595_v27 = vld [vmem:[#allocation8 + $0xdd0] sm:$0xff] }
 0x3cd   :  { %5696 = vmatpush1.bf16.msra.mxu0 %v7801_v4  ;;  %v2551_v4 = vld [vmem:[#allocation8 + $0xc70] sm:$0xff] }
 0x3ce   :  { %5860 = vmatpush1.bf16.msra.mxu1 %v7803_v29  ;;  %5697 = vmatprep.subr.bf16.mxu0 %v7810_v6  ;;  %v7857_v29 = vcombine.low %v2539_v61, %v2543_v25  ;;  %v2548_v6 = vld [vmem:[#allocation8 + $0xc58] sm:$0xff]  ;;  %v7866_v33 = vcombine.high %v2547_v2, %v2551_v4  ;;  %v2599_v12 = vld [vmem:[#allocation8 + $0xdf0] sm:$0xff] }
 0x3cf   :  { %5861 = vmatprep.subr.bf16.mxu1 %v7812_v11  ;;  %v2552_v11 = vld [vmem:[#allocation8 + $0xc78] sm:$0xff] }
 0x3d0   :  { %v7867_v21 = vcombine.low %v2548_v6, %v2552_v11 }
 0x3d1   :  { %5698 = vmatpush1.bf16.msra.mxu0 %v7809_v18  ;;  %v7868_v18 = vcombine.high %v2548_v6, %v2552_v11 }
 0x3d2   :  { %5862 = vmatpush1.bf16.msra.mxu1 %v7811_v19  ;;  %5699 = vmatprep.subr.bf16.mxu0 %v7818_v50  ;;  %v2556_v19 = vld [vmem:[#allocation8 + $0xc98] sm:$0xff] }
 0x3d3   :  { %5863 = vmatprep.subr.bf16.mxu1 %v7820_v20  ;;  %v2560_v50 = vld [vmem:[#allocation8 + $0xcb8] sm:$0xff]  ;;  %v7865_v20 = vcombine.low %v2547_v2, %v2551_v4 }
 0x3d4   :  { %v7876_v7 = vcombine.high %v2556_v19, %v2560_v50 }
 0x3d5   :  { %5700 = vmatpush1.bf16.msra.mxu0 %v7817_v8  ;;  %v2567_v8 = vld [vmem:[#allocation8 + $0xcf0] sm:$0xff] }
 0x3d6   :  { %5864 = vmatpush1.bf16.msra.mxu1 %v7819_v24  ;;  %5701 = vmatprep.subr.bf16.mxu0 %v7826_v42  ;;  %v2564_v24 = vld [vmem:[#allocation8 + $0xcd8] sm:$0xff]  ;;  %v7882_v43 = vcombine.high %v2563_v23, %v2567_v8 }
 0x3d7   :  { %5865 = vmatprep.subr.bf16.mxu1 %v7828_v28  ;;  %v2568_v42 = vld [vmem:[#allocation8 + $0xcf8] sm:$0xff]  ;;  %v7873_v28 = vcombine.low %v2555_v16, %v2559_v17 }
 0x3d8   :  { %v7884_v35 = vcombine.high %v2564_v24, %v2568_v42 }
 0x3d9   :  { %5702 = vmatpush1.bf16.msra.mxu0 %v7825_v44  ;;  %v2572_v44 = vld [vmem:[#allocation8 + $0xd18] sm:$0xff] }
 0x3da   :  { %5866 = vmatpush1.bf16.msra.mxu1 %v7827_v13  ;;  %5703 = vmatprep.subr.bf16.mxu0 %v7834_v48  ;;  %v2576_v13 = vld [vmem:[#allocation8 + $0xd38] sm:$0xff]  ;;  %v7883_v48 = vcombine.low %v2564_v24, %v2568_v42  ;;  %v2615_v24 = vld [vmem:[#allocation8 + $0xe70] sm:$0xff] }
 0x3db   :  { %5867 = vmatprep.subr.bf16.mxu1 %v7836_v55  ;;  %v7890_v55 = vcombine.high %v2571_v37, %v2575_v40  ;;  %v7892_v56 = vcombine.high %v2572_v44, %v2576_v13  ;;  %v2612_v42 = vld [vmem:[#allocation8 + $0xe58] sm:$0xff] }
 0x3dd   :  { %5704 = vmatpush1.bf16.msra.mxu0 %v7833_v45  ;;  %v2584_v45 = vld [vmem:[#allocation8 + $0xd78] sm:$0xff] }
 0x3de   :  { %5868 = vmatpush1.bf16.msra.mxu1 %v7835_v34  ;;  %5705 = vmatprep.subr.bf16.mxu0 %v7842_v31  ;;  %v7889_v34 = vcombine.low %v2571_v37, %v2575_v40  ;;  %v7891_v31 = vcombine.low %v2572_v44, %v2576_v13  ;;  %v7900_v36 = vcombine.high %v2580_v41, %v2584_v45  ;;  %v2619_v40 = vld [vmem:[#allocation8 + $0xe90] sm:$0xff]  ;;  %v2620_v13 = vld [vmem:[#allocation8 + $0xe98] sm:$0xff] }
 0x3df   :  { %5869 = vmatprep.subr.bf16.mxu1 %v7844_v32  ;;  %v7898_v32 = vcombine.high %v2579_v60, %v2583_v53  ;;  %v2623_v44 = vld [vmem:[#allocation8 + $0xeb0] sm:$0xff] }
 0x3e1   :  { %5706 = vmatpush1.bf16.msra.mxu0 %v7841_v39  ;;  %v2592_v39 = vld [vmem:[#allocation8 + $0xdb8] sm:$0xff] }
 0x3e2   :  { %5870 = vmatpush1.bf16.msra.mxu1 %v7843_v5  ;;  %5707 = vmatprep.subr.bf16.mxu0 %v7850_v15  ;;  %v7897_v5 = vcombine.low %v2579_v60, %v2583_v53  ;;  %v7899_v15 = vcombine.low %v2580_v41, %v2584_v45  ;;  %v7908_v25 = vcombine.high %v2588_v3, %v2592_v39  ;;  %v2627_v53 = vld [vmem:[#allocation8 + $0xed0] sm:$0xff]  ;;  %v2628_v45 = vld [vmem:[#allocation8 + $0xed8] sm:$0xff] }
 0x3e3   :  { %5871 = vmatprep.subr.bf16.mxu1 %v7852_v26  ;;  %v7906_v26 = vcombine.high %v2587_v9, %v2591_v10  ;;  %v2631_v41 = vld [vmem:[#allocation8 + $0xef0] sm:$0xff] }
 0x3e5   :  { %5708 = vmatpush1.bf16.msra.mxu0 %v7849_v63 }
 0x3e6   :  { %5872 = vmatpush1.bf16.msra.mxu1 %v7851_v0  ;;  %5718 = vmatprep.subr.bf16.mxu0 %v7858_v1  ;;  %v2596_v1 = vld [vmem:[#allocation8 + $0xdd8] sm:$0xff] }
 0x3e7   :  { %5882 = vmatprep.subr.bf16.mxu1 %v7860_v38  ;;  %v2600_v38 = vld [vmem:[#allocation8 + $0xdf8] sm:$0xff] }
 0x3e8   :  { %5710 = vmatmul.mubr.bf16.vlgmr.msra.gmra.mrb[20].mxu0 %v9172_v49  ;;  %v7916_v17 = vcombine.high %v2596_v1, %v2600_v38 }
 0x3e9   :  { %5874 = vmatmul.mubr.bf16.vlgmr.msra.gmra.mrb[20].mxu1 %v9172_v49  ;;  %5719 = vmatpush1.bf16.msra.mxu0 %v7857_v29  ;;  %v7875_v49 = vcombine.low %v2556_v19, %v2560_v50  ;;  %v7905_v29 = vcombine.low %v2587_v9, %v2591_v10  ;;  %v2607_v19 = vld [vmem:[#allocation8 + $0xe30] sm:$0xff]  ;;  %v2604_v50 = vld [vmem:[#allocation8 + $0xe18] sm:$0xff] }
 0x3ea   :  { %5750 = vmatprep.mubr.bf16.mxu0 %v9174_v62  ;;  %5883 = vmatpush1.bf16.msra.mxu1 %v7859_v14  ;;  %v7907_v14 = vcombine.low %v2588_v3, %v2592_v39  ;;  %v2635_v10 = vld [vmem:[#allocation8 + $0xf10] sm:$0xff]  ;;  %v2636_v39 = vld [vmem:[#allocation8 + $0xf18] sm:$0xff] }
 0x3eb   :  { %5914 = vmatprep.mubr.bf16.mxu1 %v9174_v62  ;;  %5720 = vmatprep.subr.bf16.mxu0 %v7866_v33  ;;  %v7881_v62 = vcombine.low %v2563_v23, %v2567_v8  ;;  %v7914_v33 = vcombine.high %v2595_v27, %v2599_v12  ;;  %v2611_v8 = vld [vmem:[#allocation8 + $0xe50] sm:$0xff] }
 0x3ec   :  { %5884 = vmatprep.subr.bf16.mxu1 %v7868_v18  ;;  %v2603_v18 = vld [vmem:[#allocation8 + $0xe10] sm:$0xff] }
 0x3ed   :  { %5721 = vmatpush1.bf16.msra.mxu0 %v7865_v20  ;;  %v2608_v20 = vld [vmem:[#allocation8 + $0xe38] sm:$0xff]  ;;  %v2639_v3 = vld [vmem:[#allocation8 + $0xf30] sm:$0xff] }
 0x3ee   :  { %5885 = vmatpush1.bf16.msra.mxu1 %v7867_v21  ;;  %5722 = vmatprep.subr.bf16.mxu0 %v7874_v22  ;;  %v7913_v21 = vcombine.low %v2595_v27, %v2599_v12  ;;  %v7915_v22 = vcombine.low %v2596_v1, %v2600_v38  ;;  %v7924_v23 = vcombine.high %v2604_v50, %v2608_v20  ;;  %v2643_v12 = vld [vmem:[#allocation8 + $0xf50] sm:$0xff]  ;;  %v2644_v38 = vld [vmem:[#allocation8 + $0xf58] sm:$0xff] }
 0x3ef   :  { %5886 = vmatprep.subr.bf16.mxu1 %v7876_v7  ;;  %v7922_v7 = vcombine.high %v2603_v18, %v2607_v19  ;;  %v2647_v1 = vld [vmem:[#allocation8 + $0xf70] sm:$0xff] }
 0x3f1   :  { %5723 = vmatpush1.bf16.msra.mxu0 %v7873_v28  ;;  %v2616_v28 = vld [vmem:[#allocation8 + $0xe78] sm:$0xff] }
 0x3f2   :  { %5887 = vmatpush1.bf16.msra.mxu1 %v7875_v49  ;;  %5724 = vmatprep.subr.bf16.mxu0 %v7882_v43  ;;  %v7921_v49 = vcombine.low %v2603_v18, %v2607_v19  ;;  %v7923_v43 = vcombine.low %v2604_v50, %v2608_v20  ;;  %v7932_v37 = vcombine.high %v2612_v42, %v2616_v28  ;;  %v2656_v18 = vld [vmem:[#allocation8 + $0xfb8] sm:$0xff] }
 0x3f3   :  { %5888 = vmatprep.subr.bf16.mxu1 %v7884_v35  ;;  %v7930_v35 = vcombine.high %v2611_v8, %v2615_v24  ;;  %v7961_v19 = vcombine.low %v2643_v12, %v2647_v1 }
 0x3f5   :  { %5725 = vmatpush1.bf16.msra.mxu0 %v7881_v62  ;;  %v2624_v62 = vld [vmem:[#allocation8 + $0xeb8] sm:$0xff] }
 0x3f6   :  { %5889 = vmatpush1.bf16.msra.mxu1 %v7883_v48  ;;  %5726 = vmatprep.subr.bf16.mxu0 %v7890_v55  ;;  %v7929_v48 = vcombine.low %v2611_v8, %v2615_v24  ;;  %v7931_v55 = vcombine.low %v2612_v42, %v2616_v28  ;;  %v7940_v60 = vcombine.high %v2620_v13, %v2624_v62  ;;  %v2664_v8 = vld [vmem:[#allocation8 + $0xff8] sm:$0xff] }
 0x3f7   :  { %5890 = vmatprep.subr.bf16.mxu1 %v7892_v56  ;;  %v7938_v56 = vcombine.high %v2619_v40, %v2623_v44 }
 0x3f9   :  { %5727 = vmatpush1.bf16.msra.mxu0 %v7889_v34  ;;  %v2632_v34 = vld [vmem:[#allocation8 + $0xef8] sm:$0xff] }
 0x3fa   :  { %5891 = vmatpush1.bf16.msra.mxu1 %v7891_v31  ;;  %5728 = vmatprep.subr.bf16.mxu0 %v7898_v32  ;;  %v7937_v31 = vcombine.low %v2619_v40, %v2623_v44  ;;  %v7939_v32 = vcombine.low %v2620_v13, %v2624_v62  ;;  %v7948_v9 = vcombine.high %v2628_v45, %v2632_v34  ;;  %v8280_v40 = vld [vmem:[#allocation11 + $0xc] ss:$16 sps:$4 sm:$0xff]   ;;  %v8275_v44 = vld [vmem:[#allocation11] ss:$16 sps:$4 sm:$0xff]   ;;  %v8278_v13 = vld [vmem:[#allocation11 + $0x8] ss:$16 sps:$4 sm:$0xff]  }
 0x3fb   :  { %v9201_v61 = vpop.f32.mrb[16].mxu0  ;;  %5892 = vmatprep.subr.bf16.mxu1 %v7900_v36  ;;  %v7946_v36 = vcombine.high %v2627_v53, %v2631_v41  ;;  %v8283_v62 = vld [vmem:[#allocation11 + $0x24] ss:$16 sps:$4 sm:$0xff]  }
 0x3fc   :  { %v9203_v63 = vpop.f32.mrb[16].mxu1  ;;  %v9205_v0 = vpop.f32.mrb[17].mxu0 }
 0x3fd   :  { %v9207_v2 = vpop.f32.mrb[17].mxu1  ;;  %v5428_v4 = vpop.f32.mrb[18].mxu0  ;;  %5729 = vmatpush1.bf16.msra.mxu0 %v7897_v5  ;;  %v2640_v5 = vld [vmem:[#allocation8 + $0xf38] sm:$0xff] }
 0x3fe   :  { %v5592_v6 = vpop.f32.mrb[18].mxu1  ;;  %5893 = vmatpush1.bf16.msra.mxu1 %v7899_v15  ;;  %v5429_v11 = vpop.f32.mrb[19].mxu0  ;;  %5730 = vmatprep.subr.bf16.mxu0 %v7906_v26  ;;  %v7945_v15 = vcombine.low %v2627_v53, %v2631_v41  ;;  %v7947_v26 = vcombine.low %v2628_v45, %v2632_v34  ;;  %v7956_v27 = vcombine.high %v2636_v39, %v2640_v5  ;;  %v2648_v4 = vld [vmem:[#allocation8 + $0xf78] sm:$0xff]  ;;  %v8292_v53 = vld [vmem:[#allocation11 + $0x4c] ss:$16 sps:$4 sm:$0xff]  }
 0x3ff   :  { %v5593_v16 = vpop.f32.mrb[19].mxu1  ;;  %5894 = vmatprep.subr.bf16.mxu1 %v7908_v25  ;;  %v7954_v25 = vcombine.high %v2635_v10, %v2639_v3  ;;  %v7955_v6 = vcombine.low %v2636_v39, %v2640_v5  ;;  %v7962_v11 = vcombine.high %v2643_v12, %v2647_v1  ;;  %v7963_v50 = vcombine.low %v2644_v38, %v2648_v4  ;;  %v8287_v41 = vld [vmem:[#allocation11 + $0x40] ss:$16 sps:$4 sm:$0xff]   ;;  %v8290_v45 = vld [vmem:[#allocation11 + $0x48] ss:$16 sps:$4 sm:$0xff]  }
 0x400   :  { %v2655_v16 = vld [vmem:[#allocation8 + $0xfb0] sm:$0xff]  ;;  %v8295_v34 = vld [vmem:[#allocation11 + $0x64] ss:$16 sps:$4 sm:$0xff]   ;;  %v8311_v12 = vld [vmem:[#allocation11 + $0xc0] ss:$16 sps:$4 sm:$0xff]  }
 0x401   :  { %5731 = vmatpush1.bf16.msra.mxu0 %v7905_v29  ;;  %v7953_v29 = vcombine.low %v2635_v10, %v2639_v3  ;;  %v8299_v10 = vld [vmem:[#allocation11 + $0x80] ss:$16 sps:$4 sm:$0xff]   ;;  %v8302_v3 = vld [vmem:[#allocation11 + $0x88] ss:$16 sps:$4 sm:$0xff]   ;;  %v8307_v39 = vld [vmem:[#allocation11 + $0xa4] ss:$16 sps:$4 sm:$0xff]  }
 0x402   :  { %5895 = vmatpush1.bf16.msra.mxu1 %v7907_v14  ;;  %5732 = vmatprep.subr.bf16.mxu0 %v7914_v33  ;;  %v7964_v14 = vcombine.high %v2644_v38, %v2648_v4  ;;  %v2651_v33 = vld [vmem:[#allocation8 + $0xf90] sm:$0xff]  ;;  %v8319_v38 = vld [vmem:[#allocation11 + $0xe4] ss:$16 sps:$4 sm:$0xff]  }
 0x403   :  { %5896 = vmatprep.subr.bf16.mxu1 %v7916_v17  ;;  %v2652_v17 = vld [vmem:[#allocation8 + $0xf98] sm:$0xff]  ;;  %v7970_v20 = vcombine.high %v2651_v33, %v2655_v16  ;;  %v7969_v24 = vcombine.low %v2651_v33, %v2655_v16  ;;  %v8310_v5 = vld [vmem:[#allocation11 + $0xac] ss:$16 sps:$4 sm:$0xff]   ;;  %v8314_v1 = vld [vmem:[#allocation11 + $0xc8] ss:$16 sps:$4 sm:$0xff]  }
 0x404   :  { %v7971_v42 = vcombine.low %v2652_v17, %v2656_v18  ;;  %v8322_v4 = vld [vmem:[#allocation11 + $0xec] ss:$16 sps:$4 sm:$0xff]   ;;  %v8323_v33 = vld [vmem:[#allocation11 + $0x100] ss:$16 sps:$4 sm:$0xff]   ;;  %v8326_v16 = vld [vmem:[#allocation11 + $0x108] ss:$16 sps:$4 sm:$0xff]  }
 0x405   :  { %5733 = vmatpush1.bf16.msra.mxu0 %v7913_v21  ;;  %v7972_v21 = vcombine.high %v2652_v17, %v2656_v18  ;;  %v8331_v17 = vld [vmem:[#allocation11 + $0x124] ss:$16 sps:$4 sm:$0xff]   ;;  %v8334_v18 = vld [vmem:[#allocation11 + $0x12c] ss:$16 sps:$4 sm:$0xff]  }
 0x406   :  { %5897 = vmatpush1.bf16.msra.mxu1 %v7915_v22  ;;  %5734 = vmatprep.subr.bf16.mxu0 %v7922_v7  ;;  %v2659_v22 = vld [vmem:[#allocation8 + $0xfd0] sm:$0xff] }
 0x407   :  { %5898 = vmatprep.subr.bf16.mxu1 %v7924_v23  ;;  %v2663_v7 = vld [vmem:[#allocation8 + $0xff0] sm:$0xff]  ;;  %v2660_v23 = vld [vmem:[#allocation8 + $0xfd8] sm:$0xff] }
 0x408   :  { %v7978_v28 = vcombine.high %v2659_v22, %v2663_v7 }
 0x409   :  { %5735 = vmatpush1.bf16.msra.mxu0 %v7921_v49  ;;  %v7980_v49 = vcombine.high %v2660_v23, %v2664_v8 }
 0x40a   :  { %5899 = vmatpush1.bf16.msra.mxu1 %v7923_v43  ;;  %5736 = vmatprep.subr.bf16.mxu0 %v7930_v35  ;;  %v7977_v43 = vcombine.low %v2659_v22, %v2663_v7  ;;  %v7979_v35 = vcombine.low %v2660_v23, %v2664_v8  ;;  %v8335_v22 = vld [vmem:[#allocation11 + $0x140] ss:$16 sps:$4 sm:$0xff]   ;;  %v8338_v7 = vld [vmem:[#allocation11 + $0x148] ss:$16 sps:$4 sm:$0xff]   ;;  %v8343_v23 = vld [vmem:[#allocation11 + $0x164] ss:$16 sps:$4 sm:$0xff]  }
 0x40b   :  { %5900 = vmatprep.subr.bf16.mxu1 %v7932_v37  ;;  %v8277_v37 = vld [vmem:[#allocation11 + $0x4] ss:$16 sps:$4 sm:$0xff]   ;;  %v8346_v8 = vld [vmem:[#allocation11 + $0x16c] ss:$16 sps:$4 sm:$0xff]  }
 0x40d   :  { %5737 = vmatpush1.bf16.msra.mxu0 %v7929_v48  ;;  %v8286_v48 = vld [vmem:[#allocation11 + $0x2c] ss:$16 sps:$4 sm:$0xff]  }
 0x40e   :  { %5901 = vmatpush1.bf16.msra.mxu1 %v7931_v55  ;;  %5738 = vmatprep.subr.bf16.mxu0 %v7938_v56  ;;  %v8281_v55 = vld [vmem:[#allocation11 + $0x20] ss:$16 sps:$4 sm:$0xff]   ;;  %v8284_v56 = vld [vmem:[#allocation11 + $0x28] ss:$16 sps:$4 sm:$0xff]  }
 0x40f   :  { %5902 = vmatprep.subr.bf16.mxu1 %v7940_v60  ;;  %v8289_v60 = vld [vmem:[#allocation11 + $0x44] ss:$16 sps:$4 sm:$0xff]  }
 0x411   :  { %5739 = vmatpush1.bf16.msra.mxu0 %v7937_v31  ;;  %v8298_v31 = vld [vmem:[#allocation11 + $0x6c] ss:$16 sps:$4 sm:$0xff]  }
 0x412   :  { %5903 = vmatpush1.bf16.msra.mxu1 %v7939_v32  ;;  %5740 = vmatprep.subr.bf16.mxu0 %v7946_v36  ;;  %v8293_v32 = vld [vmem:[#allocation11 + $0x60] ss:$16 sps:$4 sm:$0xff]   ;;  %v8301_v36 = vld [vmem:[#allocation11 + $0x84] ss:$16 sps:$4 sm:$0xff]  }
 0x413   :  { %5904 = vmatprep.subr.bf16.mxu1 %v7948_v9  ;;  %v8304_v9 = vld [vmem:[#allocation11 + $0x8c] ss:$16 sps:$4 sm:$0xff]  }
 0x415   :  { %5741 = vmatpush1.bf16.msra.mxu0 %v7945_v15  ;;  %v8305_v15 = vld [vmem:[#allocation11 + $0xa0] ss:$16 sps:$4 sm:$0xff]  }
 0x416   :  { %5905 = vmatpush1.bf16.msra.mxu1 %v7947_v26  ;;  %5742 = vmatprep.subr.bf16.mxu0 %v7954_v25  ;;  %v8308_v26 = vld [vmem:[#allocation11 + $0xa8] ss:$16 sps:$4 sm:$0xff]   ;;  %v8313_v25 = vld [vmem:[#allocation11 + $0xc4] ss:$16 sps:$4 sm:$0xff]  }
 0x417   :  { %5906 = vmatprep.subr.bf16.mxu1 %v7956_v27  ;;  %v8316_v27 = vld [vmem:[#allocation11 + $0xcc] ss:$16 sps:$4 sm:$0xff]  }
 0x419   :  { %5743 = vmatpush1.bf16.msra.mxu0 %v7953_v29  ;;  %v8317_v29 = vld [vmem:[#allocation11 + $0xe0] ss:$16 sps:$4 sm:$0xff]  }
 0x41a   :  { %5907 = vmatpush1.bf16.msra.mxu1 %v7955_v6  ;;  %5744 = vmatprep.subr.bf16.mxu0 %v7962_v11  ;;  %v8320_v6 = vld [vmem:[#allocation11 + $0xe8] ss:$16 sps:$4 sm:$0xff]   ;;  %v8325_v11 = vld [vmem:[#allocation11 + $0x104] ss:$16 sps:$4 sm:$0xff]  }
 0x41b   :  { %5908 = vmatprep.subr.bf16.mxu1 %v7964_v14  ;;  %v8328_v14 = vld [vmem:[#allocation11 + $0x10c] ss:$16 sps:$4 sm:$0xff]  }
 0x41d   :  { %5745 = vmatpush1.bf16.msra.mxu0 %v7961_v19  ;;  %v8329_v19 = vld [vmem:[#allocation11 + $0x120] ss:$16 sps:$4 sm:$0xff]  }
 0x41e   :  { %5909 = vmatpush1.bf16.msra.mxu1 %v7963_v50  ;;  %5746 = vmatprep.subr.bf16.mxu0 %v7970_v20  ;;  %v8332_v50 = vld [vmem:[#allocation11 + $0x128] ss:$16 sps:$4 sm:$0xff]   ;;  %v8337_v20 = vld [vmem:[#allocation11 + $0x144] ss:$16 sps:$4 sm:$0xff]  }
 0x41f   :  { %5910 = vmatprep.subr.bf16.mxu1 %v7972_v21  ;;  %v8340_v21 = vld [vmem:[#allocation11 + $0x14c] ss:$16 sps:$4 sm:$0xff]  }
 0x421   :  { %5747 = vmatpush1.bf16.msra.mxu0 %v7969_v24  ;;  %v8341_v24 = vld [vmem:[#allocation11 + $0x160] ss:$16 sps:$4 sm:$0xff]  }
 0x422   :  { %5911 = vmatpush1.bf16.msra.mxu1 %v7971_v42  ;;  %5748 = vmatprep.subr.bf16.mxu0 %v7978_v28  ;;  %v8344_v42 = vld [vmem:[#allocation11 + $0x168] ss:$16 sps:$4 sm:$0xff]   ;;  %v8349_v28 = vld [vmem:[#allocation11 + $0x184] ss:$16 sps:$4 sm:$0xff]  }
 0x423   :  { %5912 = vmatprep.subr.bf16.mxu1 %v7980_v49  ;;  %v8352_v49 = vld [vmem:[#allocation11 + $0x18c] ss:$16 sps:$4 sm:$0xff]  }
 0x425   :  { %5749 = vmatpush1.bf16.msra.mxu0 %v7977_v43  ;;  %v8347_v43 = vld [vmem:[#allocation11 + $0x180] ss:$16 sps:$4 sm:$0xff]  }
 0x426   :  { %5913 = vmatpush1.bf16.msra.mxu1 %v7979_v35  ;;  %6725 = vmatprep.subr.bf16.mxu0 %v8277_v37  ;;  %v8350_v35 = vld [vmem:[#allocation11 + $0x188] ss:$16 sps:$4 sm:$0xff]   ;;  %v8355_v37 = vld [vmem:[#allocation11 + $0x1a4] ss:$16 sps:$4 sm:$0xff]  }
 0x427   :  { %6807 = vmatprep.subr.bf16.mxu1 %v8280_v40  ;;  %v8358_v40 = vld [vmem:[#allocation11 + $0x1ac] ss:$16 sps:$4 sm:$0xff]  }
 0x428   :  { %5751 = vmatmul.mubr.bf16.vlgmr.msra.gmra.mrb[20].mxu0 %v9183_v59 }
 0x429   :  { %5915 = vmatmul.mubr.bf16.vlgmr.msra.gmra.mrb[20].mxu1 %v9183_v59  ;;  %6726 = vmatpush1.bf16.msra.mxu0 %v8275_v44  ;;  %v8296_v59 = vld [vmem:[#allocation11 + $0x68] ss:$16 sps:$4 sm:$0xff]   ;;  %v8353_v44 = vld [vmem:[#allocation11 + $0x1a0] ss:$16 sps:$4 sm:$0xff]  }
 0x42a   :  { %6808 = vmatpush1.bf16.msra.mxu1 %v8278_v13  ;;  %6727 = vmatprep.subr.bf16.mxu0 %v8283_v62  ;;  %v8356_v13 = vld [vmem:[#allocation11 + $0x1a8] ss:$16 sps:$4 sm:$0xff]   ;;  %v8361_v62 = vld [vmem:[#allocation11 + $0x1c4] ss:$16 sps:$4 sm:$0xff]  }
 0x42b   :  { %6809 = vmatprep.subr.bf16.mxu1 %v8286_v48  ;;  %v8364_v48 = vld [vmem:[#allocation11 + $0x1cc] ss:$16 sps:$4 sm:$0xff]  }
 0x42d   :  { %6728 = vmatpush1.bf16.msra.mxu0 %v8281_v55  ;;  %v8359_v55 = vld [vmem:[#allocation11 + $0x1c0] ss:$16 sps:$4 sm:$0xff]  }
 0x42e   :  { %6810 = vmatpush1.bf16.msra.mxu1 %v8284_v56  ;;  %6729 = vmatprep.subr.bf16.mxu0 %v8289_v60  ;;  %v8362_v56 = vld [vmem:[#allocation11 + $0x1c8] ss:$16 sps:$4 sm:$0xff]   ;;  %v8367_v60 = vld [vmem:[#allocation11 + $0x1e4] ss:$16 sps:$4 sm:$0xff]  }
 0x42f   :  { %6811 = vmatprep.subr.bf16.mxu1 %v8292_v53  ;;  %v8370_v53 = vld [vmem:[#allocation11 + $0x1ec] ss:$16 sps:$4 sm:$0xff]  }
 0x431   :  { %6730 = vmatpush1.bf16.msra.mxu0 %v8287_v41  ;;  %v8365_v41 = vld [vmem:[#allocation11 + $0x1e0] ss:$16 sps:$4 sm:$0xff]  }
 0x432   :  { %6812 = vmatpush1.bf16.msra.mxu1 %v8290_v45  ;;  %6731 = vmatprep.subr.bf16.mxu0 %v8295_v34  ;;  %v8368_v45 = vld [vmem:[#allocation11 + $0x1e8] ss:$16 sps:$4 sm:$0xff]   ;;  %v8373_v34 = vld [vmem:[#allocation11 + $0x204] ss:$16 sps:$4 sm:$0xff]  }
 0x433   :  { %6813 = vmatprep.subr.bf16.mxu1 %v8298_v31  ;;  %v8376_v31 = vld [vmem:[#allocation11 + $0x20c] ss:$16 sps:$4 sm:$0xff]  }
 0x435   :  { %6732 = vmatpush1.bf16.msra.mxu0 %v8293_v32  ;;  %v2665_v32 = vld [vmem:[#allocation10] sm:$0xff] }
 0x436   :  { %6814 = vmatpush1.bf16.msra.mxu1 %v8296_v59  ;;  %6733 = vmatprep.subr.bf16.mxu0 %v8301_v36  ;;  %v2670_v59 = vrot.slane %v2665_v32, %v9046_v57  ;;  %v2686_v36 = vrot.slane %v2665_v32, %v9106_v30 }
 0x437   :  { %6815 = vmatprep.subr.bf16.mxu1 %v8304_v9  ;;  %v2678_v9 = vrot.slane %v2665_v32, %v9054_v52 }
 0x439   :  { %6734 = vmatpush1.bf16.msra.mxu0 %v8299_v10  ;;  %v2674_v10 = vrot.slane %v2665_v32, %v9051_v51  ;;  %v9221_v30 = vadd.f32 %v9203_v63, %v2678_v9  ;;  %v8413_v9 = vld [vmem:[#allocation11 + $0x2e0] ss:$16 sps:$4 sm:$0xff]  }
 0x43a   :  { %6816 = vmatpush1.bf16.msra.mxu1 %v8302_v3  ;;  %6735 = vmatprep.subr.bf16.mxu0 %v8307_v39  ;;  %v2694_v3 = vrot.slane %v2665_v32, %v9112_v47  ;;  %v2690_v39 = vrot.slane %v2665_v32, %v9109_v46 }
 0x43b   :  { %6817 = vmatprep.subr.bf16.mxu1 %v8310_v5  ;;  %v2682_v5 = vrot.slane %v2665_v32, %v9059_v54 }
 0x43d   :  { %6736 = vmatpush1.bf16.msra.mxu0 %v8305_v15  ;;  %v2698_v15 = vrot.slane %v2665_v32, %v9115_v58  ;;  %v8410_v32 = vld [vmem:[#allocation11 + $0x2c8] ss:$16 sps:$4 sm:$0xff]  }
 0x43e   :  { %6818 = vmatpush1.bf16.msra.mxu1 %v8308_v26  ;;  %6737 = vmatprep.subr.bf16.mxu0 %v8313_v25  ;;  %v8186_v25 = vadd.f32 %v9201_v61, %v2670_v59  ;;  %v8415_v59 = vld [vmem:[#allocation11 + $0x2e4] ss:$16 sps:$4 sm:$0xff]  }
 0x43f   :  { %6819 = vmatprep.subr.bf16.mxu1 %v8316_v27 }
 0x441   :  { %6738 = vmatpush1.bf16.msra.mxu0 %v8311_v12 }
 0x442   :  { %6820 = vmatpush1.bf16.msra.mxu1 %v8314_v1  ;;  %6739 = vmatprep.subr.bf16.mxu0 %v8319_v38  ;;  %v8187_v38 = vadd.f32 %v9205_v0, %v2674_v10  ;;  %v8416_v10 = vld [vmem:[#allocation11 + $0x2e8] ss:$16 sps:$4 sm:$0xff]  }
 0x443   :  { %6821 = vmatprep.subr.bf16.mxu1 %v8322_v4 }
 0x445   :  { %6740 = vmatpush1.bf16.msra.mxu0 %v8317_v29 }
 0x446   :  { %6822 = vmatpush1.bf16.msra.mxu1 %v8320_v6  ;;  %6741 = vmatprep.subr.bf16.mxu0 %v8325_v11  ;;  %v8189_v6 = vadd.f32 %v9207_v2, %v2682_v5  ;;  %v8379_v2 = vld [vmem:[#allocation11 + $0x224] ss:$16 sps:$4 sm:$0xff]   ;;  %v8419_v5 = vld [vmem:[#allocation11 + $0x300] ss:$16 sps:$4 sm:$0xff]  }
 0x447   :  { %6823 = vmatprep.subr.bf16.mxu1 %v8328_v14 }
 0x449   :  { %6742 = vmatpush1.bf16.msra.mxu0 %v8323_v33 }
 0x44a   :  { %6824 = vmatpush1.bf16.msra.mxu1 %v8326_v16  ;;  %6743 = vmatprep.subr.bf16.mxu0 %v8331_v17 }
 0x44b   :  { %6825 = vmatprep.subr.bf16.mxu1 %v8334_v18 }
 0x44d   :  { %6744 = vmatpush1.bf16.msra.mxu0 %v8329_v19 }
 0x44e   :  { %6826 = vmatpush1.bf16.msra.mxu1 %v8332_v50  ;;  %6745 = vmatprep.subr.bf16.mxu0 %v8337_v20  ;;  %v8371_v20 = vld [vmem:[#allocation11 + $0x200] ss:$16 sps:$4 sm:$0xff]  }
 0x44f   :  { %6827 = vmatprep.subr.bf16.mxu1 %v8340_v21  ;;  %v8374_v21 = vld [vmem:[#allocation11 + $0x208] ss:$16 sps:$4 sm:$0xff]  }
 0x451   :  { %6746 = vmatpush1.bf16.msra.mxu0 %v8335_v22 }
 0x452   :  { %6828 = vmatpush1.bf16.msra.mxu1 %v8338_v7  ;;  %6747 = vmatprep.subr.bf16.mxu0 %v8343_v23  ;;  %v8382_v7 = vld [vmem:[#allocation11 + $0x22c] ss:$16 sps:$4 sm:$0xff]  }
 0x453   :  { %6829 = vmatprep.subr.bf16.mxu1 %v8346_v8  ;;  %v8377_v8 = vld [vmem:[#allocation11 + $0x220] ss:$16 sps:$4 sm:$0xff]  }
 0x455   :  { %6748 = vmatpush1.bf16.msra.mxu0 %v8341_v24  ;;  %v8380_v24 = vld [vmem:[#allocation11 + $0x228] ss:$16 sps:$4 sm:$0xff]  }
 0x456   :  { %6830 = vmatpush1.bf16.msra.mxu1 %v8344_v42  ;;  %6749 = vmatprep.subr.bf16.mxu0 %v8349_v28  ;;  %v8385_v42 = vld [vmem:[#allocation11 + $0x244] ss:$16 sps:$4 sm:$0xff]   ;;  %v8388_v28 = vld [vmem:[#allocation11 + $0x24c] ss:$16 sps:$4 sm:$0xff]  }
 0x457   :  { %6831 = vmatprep.subr.bf16.mxu1 %v8352_v49  ;;  %v8383_v49 = vld [vmem:[#allocation11 + $0x240] ss:$16 sps:$4 sm:$0xff]  }
 0x459   :  { %6750 = vmatpush1.bf16.msra.mxu0 %v8347_v43  ;;  %v8386_v43 = vld [vmem:[#allocation11 + $0x248] ss:$16 sps:$4 sm:$0xff]  }
 0x45a   :  { %6832 = vmatpush1.bf16.msra.mxu1 %v8350_v35  ;;  %6751 = vmatprep.subr.bf16.mxu0 %v8355_v37  ;;  %v8391_v35 = vld [vmem:[#allocation11 + $0x264] ss:$16 sps:$4 sm:$0xff]   ;;  %v8394_v37 = vld [vmem:[#allocation11 + $0x26c] ss:$16 sps:$4 sm:$0xff]  }
 0x45b   :  { %6833 = vmatprep.subr.bf16.mxu1 %v8358_v40  ;;  %v8389_v40 = vld [vmem:[#allocation11 + $0x260] ss:$16 sps:$4 sm:$0xff]  }
 0x45d   :  { %6752 = vmatpush1.bf16.msra.mxu0 %v8353_v44  ;;  %v8392_v44 = vld [vmem:[#allocation11 + $0x268] ss:$16 sps:$4 sm:$0xff]  }
 0x45e   :  { %6834 = vmatpush1.bf16.msra.mxu1 %v8356_v13  ;;  %6753 = vmatprep.subr.bf16.mxu0 %v8361_v62  ;;  %v8397_v13 = vld [vmem:[#allocation11 + $0x284] ss:$16 sps:$4 sm:$0xff]   ;;  %v8400_v62 = vld [vmem:[#allocation11 + $0x28c] ss:$16 sps:$4 sm:$0xff]  }
 0x45f   :  { %6835 = vmatprep.subr.bf16.mxu1 %v8364_v48  ;;  %v8395_v48 = vld [vmem:[#allocation11 + $0x280] ss:$16 sps:$4 sm:$0xff]  }
 0x461   :  { %6754 = vmatpush1.bf16.msra.mxu0 %v8359_v55  ;;  %v8398_v55 = vld [vmem:[#allocation11 + $0x288] ss:$16 sps:$4 sm:$0xff]  }
 0x462   :  { %6836 = vmatpush1.bf16.msra.mxu1 %v8362_v56  ;;  %6755 = vmatprep.subr.bf16.mxu0 %v8367_v60  ;;  %v8403_v56 = vld [vmem:[#allocation11 + $0x2a4] ss:$16 sps:$4 sm:$0xff]   ;;  %v8406_v60 = vld [vmem:[#allocation11 + $0x2ac] ss:$16 sps:$4 sm:$0xff]  }
 0x463   :  { %6837 = vmatprep.subr.bf16.mxu1 %v8370_v53  ;;  %v8401_v53 = vld [vmem:[#allocation11 + $0x2a0] ss:$16 sps:$4 sm:$0xff]  }
 0x465   :  { %6756 = vmatpush1.bf16.msra.mxu0 %v8365_v41  ;;  %v8404_v41 = vld [vmem:[#allocation11 + $0x2a8] ss:$16 sps:$4 sm:$0xff]  }
 0x466   :  { %6838 = vmatpush1.bf16.msra.mxu1 %v8368_v45  ;;  %6766 = vmatprep.subr.bf16.mxu0 %v8373_v34  ;;  %v8409_v45 = vld [vmem:[#allocation11 + $0x2c4] ss:$16 sps:$4 sm:$0xff]   ;;  %v8412_v34 = vld [vmem:[#allocation11 + $0x2cc] ss:$16 sps:$4 sm:$0xff]  }
 0x467   :  { %6848 = vmatprep.subr.bf16.mxu1 %v8376_v31  ;;  %v8407_v31 = vld [vmem:[#allocation11 + $0x2c0] ss:$16 sps:$4 sm:$0xff]  }
 0x4fb   :  { %v5752_v26 = vpop.f32.mrb[20].mxu0 }
 0x4fc   :  { %v8190_v27 = vadd.f32 %v5752_v26, %v2686_v36  ;;  %v5916_v12 = vpop.f32.mrb[20].mxu1  ;;  %v5754_v1 = vpop.f32.mrb[21].mxu0  ;;  %v8418_v36 = vld [vmem:[#allocation11 + $0x2ec] ss:$16 sps:$4 sm:$0xff]   ;;  %v8427_v26 = vld [vmem:[#allocation11 + $0x324] ss:$16 sps:$4 sm:$0xff]  }
 0x4fd   :  { %v9224_v4 = vadd.f32 %v5916_v12, %v2694_v3  ;;  %v8191_v47 = vadd.f32 %v5754_v1, %v2690_v39  ;;  %v5918_v29 = vpop.f32.mrb[21].mxu1  ;;  %v5756_v46 = vpop.f32.mrb[22].mxu0  ;;  %v8421_v3 = vld [vmem:[#allocation11 + $0x304] ss:$16 sps:$4 sm:$0xff]   ;;  %v8424_v39 = vld [vmem:[#allocation11 + $0x30c] ss:$16 sps:$4 sm:$0xff]  }
 0x4fe   :  { %v5923_v11 = vmax.f32 %v8186_v25, %v8190_v27  ;;  %v8193_v58 = vadd.f32 %v5918_v29, %v2698_v15  ;;  %v5920_v14 = vpop.f32.mrb[22].mxu1  ;;  %v5757_v33 = vpop.f32.mrb[23].mxu0  ;;  %v8422_v15 = vld [vmem:[#allocation11 + $0x308] ss:$16 sps:$4 sm:$0xff]   ;;  %v8430_v25 = vld [vmem:[#allocation11 + $0x32c] ss:$16 sps:$4 sm:$0xff]  }
 0x4ff   :  { %v5925_v61 = vmax.f32 %v9221_v30, %v9224_v4  ;;  %v5924_v16 = vmax.f32 %v8187_v38, %v8191_v47  ;;  %v5921_v17 = vpop.f32.mrb[23].mxu1  ;;  %v8425_v27 = vld [vmem:[#allocation11 + $0x320] ss:$16 sps:$4 sm:$0xff]   ;;  %v8428_v12 = vld [vmem:[#allocation11 + $0x328] ss:$16 sps:$4 sm:$0xff]  }
 0x500   :  { %v5927_v63 = vmax.f32 %v5923_v11, 0.0  ;;  %v5926_v18 = vmax.f32 %v8189_v6, %v8193_v58  ;;  %v8433_v1 = vld [vmem:[#allocation11 + $0x344] ss:$16 sps:$4 sm:$0xff]   ;;  %v8436_v38 = vld [vmem:[#allocation11 + $0x34c] ss:$16 sps:$4 sm:$0xff]  }
 0x501   :  { %v5928_v19 = vmax.f32 %v5924_v16, 0.0  ;;  %v8431_v47 = vld [vmem:[#allocation11 + $0x340] ss:$16 sps:$4 sm:$0xff]   ;;  %v8434_v29 = vld [vmem:[#allocation11 + $0x348] ss:$16 sps:$4 sm:$0xff]  }
 0x502   :  { %v5930_v0 = vmax.f32 %v5926_v18, 0.0  ;;  %v5931_v22 = vpack.c.bf16 %v5927_v63, %v5927_v63  ;;  %v8439_v46 = vld [vmem:[#allocation11 + $0x364] ss:$16 sps:$4 sm:$0xff]   ;;  %v8442_v6 = vld [vmem:[#allocation11 + $0x36c] ss:$16 sps:$4 sm:$0xff]  }
 0x503   :  { %v5932_v50 = vpack.c.bf16 %v5928_v19, %v5928_v19  ;;  %v8437_v11 = vld [vmem:[#allocation11 + $0x360] ss:$16 sps:$4 sm:$0xff]   ;;  %v8440_v58 = vld [vmem:[#allocation11 + $0x368] ss:$16 sps:$4 sm:$0xff]   ;;  %v8445_v14 = vld [vmem:[#allocation11 + $0x384] ss:$16 sps:$4 sm:$0xff]  }
 0x504   :  { %v5934_v23 = vpack.c.bf16 %v5930_v0, %v5930_v0  ;;  %v8448_v33 = vld [vmem:[#allocation11 + $0x38c] ss:$16 sps:$4 sm:$0xff]   ;;  %v8443_v16 = vld [vmem:[#allocation11 + $0x380] ss:$16 sps:$4 sm:$0xff]   ;;  %v8446_v17 = vld [vmem:[#allocation11 + $0x388] ss:$16 sps:$4 sm:$0xff]  }
 0x505   :  { %6757 = vmatprep.mubr.bf16.mxu0 %v5932_v50  ;;  %6839 = vmatprep.mubr.bf16.mxu1 %v5932_v50  ;;  %v8451_v63 = vld [vmem:[#allocation11 + $0x3a4] ss:$16 sps:$4 sm:$0xff]   ;;  %v8454_v18 = vld [vmem:[#allocation11 + $0x3ac] ss:$16 sps:$4 sm:$0xff]   ;;  %v8449_v19 = vld [vmem:[#allocation11 + $0x3a0] ss:$16 sps:$4 sm:$0xff]  }
 0x506   :  { %6758 = vmatmul.mubr.bf16.vlgmr.msra.gmra.mrb[24].mxu0 %v5931_v22  ;;  %6840 = vmatmul.mubr.bf16.vlgmr.msra.gmra.mrb[24].mxu1 %v5931_v22  ;;  %v8452_v0 = vld [vmem:[#allocation11 + $0x3a8] ss:$16 sps:$4 sm:$0xff]   ;;  %v8457_v50 = vld [vmem:[#allocation11 + $0x3c4] ss:$16 sps:$4 sm:$0xff]   ;;  %v8473_v30 = vld [vmem:[#allocation14 + $0x58] sm:$0xff]  }
 0x507   :  { %6767 = vmatpush1.bf16.msra.mxu0 %v8371_v20  ;;  %6849 = vmatpush1.bf16.msra.mxu1 %v8374_v21  ;;  %v8460_v20 = vld [vmem:[#allocation11 + $0x3cc] ss:$16 sps:$4 sm:$0xff]   ;;  %v8455_v21 = vld [vmem:[#allocation11 + $0x3c0] ss:$16 sps:$4 sm:$0xff]   ;;  %v8458_v22 = vld [vmem:[#allocation11 + $0x3c8] ss:$16 sps:$4 sm:$0xff]  }
 0x508   :  { %6798 = vmatprep.mubr.bf16.mxu0 %v5934_v23  ;;  %6880 = vmatprep.mubr.bf16.mxu1 %v5934_v23  ;;  %v8461_v23 = vld [vmem:[#allocation11 + $0x3e0] ss:$16 sps:$4 sm:$0xff]  }
 0x509   :  { %6768 = vmatprep.subr.bf16.mxu0 %v8379_v2  ;;  %6850 = vmatprep.subr.bf16.mxu1 %v8382_v7  ;;  %v8463_v2 = vld [vmem:[#allocation11 + $0x3e4] ss:$16 sps:$4 sm:$0xff]   ;;  %v8466_v7 = vld [vmem:[#allocation11 + $0x3ec] ss:$16 sps:$4 sm:$0xff]  }
 0x50a   :  { %v8474_v4 = vld [vmem:[#allocation14 + $0x18] sm:$0xff]  }
 0x50b   :  { %6769 = vmatpush1.bf16.msra.mxu0 %v8377_v8  ;;  %6851 = vmatpush1.bf16.msra.mxu1 %v8380_v24  ;;  %v8464_v8 = vld [vmem:[#allocation11 + $0x3e8] ss:$16 sps:$4 sm:$0xff]   ;;  %v5929_v24 = vmax.f32 %v5925_v61, 0.0 }
 0x50c   :  { %6770 = vmatprep.subr.bf16.mxu0 %v8385_v42  ;;  %6852 = vmatprep.subr.bf16.mxu1 %v8388_v28  ;;  %v8467_v42 = vld [vmem:[#allocation14 + $0x40] sm:$0xff]  }
 0x50d   :  { %v8468_v28 = vld [vmem:[#allocation14] sm:$0xff]  }
 0x50e   :  { %v8475_v61 = vld [vmem:[#allocation14 + $0x60] sm:$0xff]  }
 0x50f   :  { %6771 = vmatpush1.bf16.msra.mxu0 %v8383_v49  ;;  %6853 = vmatpush1.bf16.msra.mxu1 %v8386_v43  ;;  %v5933_v49 = vpack.c.bf16 %v5929_v24, %v5929_v24  ;;  %v8469_v43 = vld [vmem:[#allocation14 + $0x48] sm:$0xff]  }
 0x510   :  { %6772 = vmatprep.subr.bf16.mxu0 %v8391_v35  ;;  %6854 = vmatprep.subr.bf16.mxu1 %v8394_v37  ;;  %v8470_v35 = vld [vmem:[#allocation14 + $0x8] sm:$0xff]   ;;  %v8471_v37 = vld [vmem:[#allocation14 + $0x50] sm:$0xff]  }
 0x513   :  { %6773 = vmatpush1.bf16.msra.mxu0 %v8389_v40  ;;  %6855 = vmatpush1.bf16.msra.mxu1 %v8392_v44  ;;  %v8472_v40 = vld [vmem:[#allocation14 + $0x10] sm:$0xff]   ;;  %v8476_v44 = vld [vmem:[#allocation14 + $0x20] sm:$0xff]  }
 0x514   :  { %6774 = vmatprep.subr.bf16.mxu0 %v8397_v13  ;;  %6856 = vmatprep.subr.bf16.mxu1 %v8400_v62  ;;  %v8477_v13 = vld [vmem:[#allocation14 + $0x68] sm:$0xff]  }
 0x515   :  { %v8478_v62 = vld [vmem:[#allocation14 + $0x28] sm:$0xff]  }
 0x517   :  { %6775 = vmatpush1.bf16.msra.mxu0 %v8395_v48  ;;  %6857 = vmatpush1.bf16.msra.mxu1 %v8398_v55  ;;  %v8479_v48 = vld [vmem:[#allocation14 + $0x70] sm:$0xff]  }
 0x518   :  { %6776 = vmatprep.subr.bf16.mxu0 %v8403_v56  ;;  %6858 = vmatprep.subr.bf16.mxu1 %v8406_v60  ;;  %v8480_v55 = vld [vmem:[#allocation14 + $0x30] sm:$0xff]   ;;  %v8481_v56 = vld [vmem:[#allocation14 + $0x78] sm:$0xff]  }
 0x519   :  { %v8482_v60 = vld [vmem:[#allocation14 + $0x38] sm:$0xff]  }
 0x51b   :  { %6777 = vmatpush1.bf16.msra.mxu0 %v8401_v53  ;;  %6859 = vmatpush1.bf16.msra.mxu1 %v8404_v41  ;;  %v8483_v53 = vld [vmem:[#allocation17] sm:$0xff]   ;;  %v8791_v41 = vmov 0.0  }
 0x51c   :  { %6778 = vmatprep.subr.bf16.mxu0 %v8409_v45  ;;  %6860 = vmatprep.subr.bf16.mxu1 %v8412_v34  ;;  %v8484_v45 = vld [vmem:[#allocation17 + $0x8] sm:$0xff]   ;;  %v8485_v34 = vld [vmem:[#allocation17 + $0x10] sm:$0xff]  }
 0x51f   :  { %6779 = vmatpush1.bf16.msra.mxu0 %v8407_v31  ;;  %6861 = vmatpush1.bf16.msra.mxu1 %v8410_v32  ;;  %v8486_v31 = vld [vmem:[#allocation17 + $0x18] sm:$0xff]   ;;  %v8487_v32 = vld [vmem:[#allocation17 + $0x20] sm:$0xff]  }
 0x520   :  { %6780 = vmatprep.subr.bf16.mxu0 %v8415_v59  ;;  %6862 = vmatprep.subr.bf16.mxu1 %v8418_v36  ;;  %v8488_v59 = vld [vmem:[#allocation17 + $0x28] sm:$0xff]   ;;  %v6063_v36 = vld [vmem:[#allocation13] sm:$0xf] }
 0x523   :  { %6781 = vmatpush1.bf16.msra.mxu0 %v8413_v9  ;;  %6863 = vmatpush1.bf16.msra.mxu1 %v8416_v10  ;;  %v6068_v9 = vrot.slane %v6063_v36, %v9046_v57  ;;  %v6076_v10 = vrot.slane %v6063_v36, %v9054_v52 }
 0x524   :  { %6782 = vmatprep.subr.bf16.mxu0 %v8421_v3  ;;  %6864 = vmatprep.subr.bf16.mxu1 %v8424_v39  ;;  %v6072_v3 = vrot.slane %v6063_v36, %v9051_v51  ;;  %v6080_v39 = vrot.slane %v6063_v36, %v9059_v54  ;;  %v8489_v54 = vld [vmem:[#allocation17 + $0x30] sm:$0xff]  }
 0x527   :  { %6783 = vmatpush1.bf16.msra.mxu0 %v8419_v5  ;;  %6865 = vmatpush1.bf16.msra.mxu1 %v8422_v15 }
 0x528   :  { %6784 = vmatprep.subr.bf16.mxu0 %v8427_v26  ;;  %6866 = vmatprep.subr.bf16.mxu1 %v8430_v25 }
 0x52b   :  { %6785 = vmatpush1.bf16.msra.mxu0 %v8425_v27  ;;  %6867 = vmatpush1.bf16.msra.mxu1 %v8428_v12 }
 0x52c   :  { %6786 = vmatprep.subr.bf16.mxu0 %v8433_v1  ;;  %6868 = vmatprep.subr.bf16.mxu1 %v8436_v38 }
 0x52f   :  { %6787 = vmatpush1.bf16.msra.mxu0 %v8431_v47  ;;  %6869 = vmatpush1.bf16.msra.mxu1 %v8434_v29 }
 0x530   :  { %6788 = vmatprep.subr.bf16.mxu0 %v8439_v46  ;;  %6870 = vmatprep.subr.bf16.mxu1 %v8442_v6 }
 0x533   :  { %6789 = vmatpush1.bf16.msra.mxu0 %v8437_v11  ;;  %6871 = vmatpush1.bf16.msra.mxu1 %v8440_v58 }
 0x534   :  { %6790 = vmatprep.subr.bf16.mxu0 %v8445_v14  ;;  %6872 = vmatprep.subr.bf16.mxu1 %v8448_v33  ;;  %v8490_v33 = vld [vmem:[#allocation17 + $0x38] sm:$0xff]  }
 0x537   :  { %6791 = vmatpush1.bf16.msra.mxu0 %v8443_v16  ;;  %6873 = vmatpush1.bf16.msra.mxu1 %v8446_v17  ;;  %v8109_v17 = vld [vmem:[#allocation16] ss:$0 sm:$0xff] }
 0x538   :  { %6792 = vmatprep.subr.bf16.mxu0 %v8451_v63  ;;  %6874 = vmatprep.subr.bf16.mxu1 %v8454_v18 }
 0x53b   :  { %6793 = vmatpush1.bf16.msra.mxu0 %v8449_v19  ;;  %6875 = vmatpush1.bf16.msra.mxu1 %v8452_v0 }
 0x53c   :  { %6794 = vmatprep.subr.bf16.mxu0 %v8457_v50  ;;  %6876 = vmatprep.subr.bf16.mxu1 %v8460_v20 }
 0x53f   :  { %6795 = vmatpush1.bf16.msra.mxu0 %v8455_v21  ;;  %6877 = vmatpush1.bf16.msra.mxu1 %v8458_v22  ;;  %v8126_v22 = vld [vmem:[#allocation19] ss:$0 sm:$0xff] }
 0x540   :  { %6796 = vmatprep.subr.bf16.mxu0 %v8463_v2  ;;  %6878 = vmatprep.subr.bf16.mxu1 %v8466_v7 }
 0x543   :  { %6797 = vmatpush1.bf16.msra.mxu0 %v8461_v23  ;;  %6879 = vmatpush1.bf16.msra.mxu1 %v8464_v8 }
 0x544   :  { %8135 = vmatprep.subr.bf16.mxu0 %v8467_v42  ;;  %8166 = vmatprep.subr.bf16.mxu1 %v8791_v41 }
 0x546   :  { %6799 = vmatmul.mubr.bf16.vlgmr.msra.gmra.mrb[24].mxu0 %v5933_v49  ;;  %6881 = vmatmul.mubr.bf16.vlgmr.msra.gmra.mrb[24].mxu1 %v5933_v49 }
 0x547   :  { %8136 = vmatpush3.bf16.msra.mxu0 %v8468_v28  ;;  %8167 = vmatpush3.bf16.msra.mxu1 %v8483_v53 }
 0x548   :  { %8137 = vmatprep.subr.bf16.mxu0 %v8469_v43  ;;  %8168 = vmatprep.subr.bf16.mxu1 %v8791_v41 }
 0x549   :  { %8182 = vmatprep.mubr.msk.bf16.mxu1 %vm8792_vm0, %v8791_v41 }
 0x54b   :  { %8138 = vmatpush3.bf16.msra.mxu0 %v8470_v35  ;;  %8169 = vmatpush3.bf16.msra.mxu1 %v8484_v45 }
 0x54c   :  { %8139 = vmatprep.subr.bf16.mxu0 %v8471_v37  ;;  %8170 = vmatprep.subr.bf16.mxu1 %v8791_v41 }
 0x54f   :  { %8140 = vmatpush3.bf16.msra.mxu0 %v8472_v40  ;;  %8171 = vmatpush3.bf16.msra.mxu1 %v8485_v34 }
 0x550   :  { %8141 = vmatprep.subr.bf16.mxu0 %v8473_v30  ;;  %8172 = vmatprep.subr.bf16.mxu1 %v8791_v41 }
 0x553   :  { %8142 = vmatpush3.bf16.msra.mxu0 %v8474_v4  ;;  %8173 = vmatpush3.bf16.msra.mxu1 %v8486_v31 }
 0x554   :  { %8143 = vmatprep.subr.bf16.mxu0 %v8475_v61  ;;  %8174 = vmatprep.subr.bf16.mxu1 %v8791_v41 }
 0x557   :  { %8144 = vmatpush3.bf16.msra.mxu0 %v8476_v44  ;;  %8175 = vmatpush3.bf16.msra.mxu1 %v8487_v32 }
 0x558   :  { %8145 = vmatprep.subr.bf16.mxu0 %v8477_v13  ;;  %8176 = vmatprep.subr.bf16.mxu1 %v8791_v41 }
 0x55b   :  { %8146 = vmatpush3.bf16.msra.mxu0 %v8478_v62  ;;  %8177 = vmatpush3.bf16.msra.mxu1 %v8488_v59 }
 0x55c   :  { %8147 = vmatprep.subr.bf16.mxu0 %v8479_v48  ;;  %8178 = vmatprep.subr.bf16.mxu1 %v8791_v41 }
 0x55f   :  { %8148 = vmatpush3.bf16.msra.mxu0 %v8480_v55  ;;  %8179 = vmatpush3.bf16.msra.mxu1 %v8489_v54 }
 0x560   :  { %8149 = vmatprep.subr.bf16.mxu0 %v8481_v56  ;;  %8180 = vmatprep.subr.bf16.mxu1 %v8791_v41 }
 0x563   :  { %8150 = vmatpush3.bf16.msra.mxu0 %v8482_v60  ;;  %8181 = vmatpush3.bf16.msra.mxu1 %v8490_v33 }
 0x619   :  { %v6800_v5 = vpop.f32.mrb[24].mxu0  ;;  %v6882_v15 = vpop.f32.mrb[24].mxu1 }
 0x61a   :  { %v8194_v26 = vadd.f32 %v6800_v5, %v6068_v9  ;;  %v8196_v25 = vadd.f32 %v6882_v15, %v6076_v10  ;;  %v6802_v27 = vpop.f32.mrb[25].mxu0  ;;  %v6884_v12 = vpop.f32.mrb[25].mxu1 }
 0x61b   :  { %v8195_v1 = vadd.f32 %v6802_v27, %v6072_v3  ;;  %v8197_v38 = vadd.f32 %v6884_v12, %v6080_v39  ;;  %v6804_v47 = vpop.f32.mrb[26].mxu0  ;;  %v6886_v29 = vpop.f32.mrb[26].mxu1 }
 0x61c   :  { %v6889_v46 = vmax.f32 %v8194_v26, %v8196_v25  ;;  %v6805_v6 = vpop.f32.mrb[27].mxu0  ;;  %v6887_v11 = vpop.f32.mrb[27].mxu1 }
 0x61d   :  { %v6890_v57 = vmax.f32 %v8195_v1, %v8197_v38 }
 0x61e   :  { %v6891_v58 = vmax.f32 %v6889_v46, 0.0 }
 0x61f   :  { %v6892_v52 = vmax.f32 %v6890_v57, 0.0 }
 0x620   :  { %v6893_v51 = vpack.c.bf16 %v6891_v58, %v6891_v58 }
 0x621   :  { %v6894_v14 = vpack.c.bf16 %v6892_v52, %v6892_v52 }
 0x623   :  { %7062 = vmatprep.mubr.bf16.mxu0 %v6894_v14 }
 0x624   :  { %7063 = vmatmul.mubr.bf16.vlgmr.msra.gmra.mrb[28].mxu0 %v6893_v51 }
 0x6f7   :  { %v8151_v16 = vpop.f32.mrb[28].mxu0 }
 0x6f8   :  { %v8152_v63 = vpop.f32.mrb[29].mxu0 }
 0x6f9   :  { %v8153_v18 = vadd.f32 %v8152_v63, %v8151_v16  ;;  %v8154_v19 = vpop.f32.mrb[30].mxu0 }
 0x6fa   :  { %v8155_v0 = vpop.f32.mrb[31].mxu0 }
 0x6fb   :  { %v7065_v50 = vadd.f32 %v8153_v18, %v8109_v17 }
 0x6fd   :  { %v7070_v20 = vmax.f32 %v7065_v50, 0.0 }
 0x6ff   :  { %v7071_v21 = vpack.c.bf16 %v7070_v20, %v7070_v20 }
 0x701   :  { %8183 = vmatmul.mubr.bf16.vlgmr.msra.gmra.mrb[28].mxu1 %v7071_v21 }
 0x7d4   :  { %v7177_v2 = vpop.f32.mrb[28].mxu1 }
 0x7d5   :  { %v7178_v7 = vadd.f32 %v8126_v22, %v7177_v2  ;;  %v8184_v23 = vpop.f32.mrb[29].mxu1 }
 0x7d6   :  { %v7180_v8 = vpop.f32.mrb[30].mxu1 }
 0x7d7   :  { %7183 = vmax.xlane.f32.xlu0 %v7178_v7  ;;  %v8185_v24 = vpop.f32.mrb[31].mxu1 }
 0x864   :  { %v7184_v42 = vpop.xlane.xlu0 %7183 }
 0x865   :  { %v7185_v28 = vsub.f32 %v7178_v7, %v7184_v42 }
 0x867   :  { %v7186_v49 = vmul.f32 1.442695, %v7185_v28 }
 0x869   :  { %8491 = vpow2.f32 %v7186_v49 }
 0x873   :  { %v8492_v43 = vpop.eup %8491 }
 0x874   :  { %7188 = vadd.xlane.f32.xlu0 %v8492_v43 }
 0x901   :  { %v7189_v35 = vpop.xlane.xlu0 %7188 }
 0x902   :  { %8493 = vrcp.f32 %v7189_v35 }
 0x90c   :  { %v8494_v37 = vpop.eup %8493 }
 0x90d   :  { %v7191_v40 = vmul.f32 %v8494_v37, %v8492_v43 }
 0x90f   :  { %7192 = vst [vmem:[#allocation20] sm:$0xff] %v7191_v40 }
 0x910   :  { %8748 = shalt.err (!%p8745_p8)
}
 0x911   :  { %s8749_s7 = scalar_lea.hbm %s9259_s11, 128 }
 0x912   :  { %p8750_p9 = scmp.ne.s32.totalorder %s9259_s11, %s8749_s7  ;;  %p8753_p10 = scmp.lt.u32.totalorder %s8749_s7, %s9259_s11 }
 0x914   :  { %p8755_p11 = pnand %p8753_p10, %p8750_p9 }
 0x916   :  { %8758 = shalt.err (!%p8755_p11)
}
 0x917   :  { %7202 = dma.vmem_to_hbm [thread:$0]  %s7200_s1, 128, %s9259_s11, [#allocation4]  }
 0x918   :  { %8771 = dma.done.wait [#allocation4], 128  }
 0x919   :  { %8772 = vsyncadd [#allocation4], 4294967168 }
 0x91a   :  { %7206 = vsyncpa [#allocation3], 1 }
 0x91b   :  { %7207 = vsyncpa [#allocation6], 1 }
 0x91c   :  { %7208 = vsyncpa [#allocation9], 1 }
 0x91d   :  { %7209 = vsyncpa [#allocation12], 1 }
 0x91e   :  { %7210 = vsyncpa [#allocation15], 1 }
 0x91f   :  { %7211 = vsyncpa [#allocation18], 1 }
 0x920   :  { %7212 = vsyncpa [#allocation4], 1 }

</bundles_post_ra>
